<compile_context>
chip_gen: v7x
topology: tpu7x:2x2x1
jax: 0.10.0
libtpu: 0.0.40
codegen_flags: <defaults>
</compile_context>

<pallas_src>
import math
import jax
import jax.numpy as jnp
from jax.experimental import pallas as pl
from jax.experimental.pallas import tpu as pltpu

NEG_INF = -1e9          # matches the module's additive inf-mask convention
MASK_PAD = -2e9         # strictly below any real (tanh-clipped + NEG_INF) score


def _round_up(x, m):
    return ((x + m - 1) // m) * m


def _cdiv(a, b):
    return (a + b - 1) // b


# --------------------------------------------------------------------------
# kernel
# --------------------------------------------------------------------------
def _make_kernel(b_blk, n, P_pad, E, H, inv_sqrt_d, inv_sqrt_emb, logit_clip):
    rows = b_blk * n
    HE = H * E

    def kernel(eln_ref, lc_ref, enodes_ref, mask_ref,
               mq_ref, mqlc_ref, mv_ref, w_ref, b_ref, probs_ref):
        cdt = enodes_ref.dtype                           # MXU compute dtype
        eln_flat = eln_ref[...].reshape(rows, E)         # (rows, E) f32
        lc_flat = lc_ref[...].reshape(rows, 8)           # (rows, 8) f32
        enodes = enodes_ref[...]                         # (b_blk, P_pad, E) cdt
        mask = mask_ref[...]                             # (b_blk, n, P_pad) f32

        # ---- stacked-head query projection (load/capacity rows folded in) ----
        q_all = (jnp.dot(eln_flat, mq_ref[...], preferred_element_type=jnp.float32)
                 + jnp.dot(lc_flat, mqlc_ref[...],
                           preferred_element_type=jnp.float32))        # (rows, H*E)
        q = q_all.reshape(b_blk, n * H, E).astype(cdt)   # rows ordered (query, head)

        # ---- all-head attention scores in one batched matmul ----
        s = jnp.einsum('bqe,bpe->bqp', q, enodes,
                       preferred_element_type=jnp.float32) * inv_sqrt_d
        s = s.reshape(b_blk, n, H, P_pad) + mask[:, :, None, :]
        s = s - jnp.max(s, axis=-1, keepdims=True)       # unbounded -> keep max-sub
        ex = jnp.exp(s)
        w = ex * pl.reciprocal(jnp.sum(ex, axis=-1, keepdims=True))
        w = w.reshape(b_blk, n * H, P_pad).astype(cdt)

        # ---- attention-weighted node sum, THEN fused Wv@Wmhc (reassociated) ----
        a = jnp.einsum('bqp,bpe->bqe', w, enodes,
                       preferred_element_type=jnp.float32)             # (b, n*H, E)
        mh = (jnp.dot(a.reshape(rows, HE), mv_ref[...],
                      preferred_element_type=jnp.float32)
              + b_ref[0])                                              # (rows, E)

        # ---- SRU cell (x = hidden = mh) ----
        b_g = jnp.dot(mh, w_ref[0], preferred_element_type=jnp.float32) + b_ref[1]
        u_g = jnp.dot(mh, w_ref[1], preferred_element_type=jnp.float32) + b_ref[2]
        f_g = jnp.dot(mh, w_ref[2], preferred_element_type=jnp.float32) + b_ref[3]
        u = jax.nn.sigmoid(u_g)
        f = jax.nn.sigmoid(f_g)
        c = f * mh + (1.0 - f) * b_g
        sru = u * jnp.tanh(c) + (1.0 - u) * mh

        # ---- phase feed-forward (Linear -> ReLU -> Linear) ----
        p1 = jnp.maximum(
            jnp.dot(sru, w_ref[3], preferred_element_type=jnp.float32) + b_ref[4],
            0.0)
        p2 = jnp.dot(p1, w_ref[4], preferred_element_type=jnp.float32) + b_ref[5]
        p2 = p2.reshape(b_blk, n, E).astype(cdt)

        # ---- single-head scoring + masked softmax (lane-dense padded P) ----
        sc = jnp.einsum('bne,bpe->bnp', p2, enodes,
                        preferred_element_type=jnp.float32) * inv_sqrt_emb
        sc = logit_clip * jnp.tanh(sc) + mask
        # max-subtraction kept: fully-masked rows stay finite (match reference).
        sc = sc - jnp.max(sc, axis=-1, keepdims=True)
        e2 = jnp.exp(sc)
        probs_ref[...] = e2 * pl.reciprocal(jnp.sum(e2, axis=-1, keepdims=True))

    return kernel


# --------------------------------------------------------------------------
# chip-aware sizing helpers
# --------------------------------------------------------------------------
def _device_kind():
    try:
        return (jax.devices()[0].device_kind or "").lower()
    except Exception:
        return ""


def _tensorcores_per_chip(kind):
    # v4 / v5p / v7x expose 2 TensorCores behind one device (megacore);
    # v5e / v6e have a single TensorCore.
    return 2 if any(t in kind for t in ("v7", "v5p", "v4")) else 1


def _physical_vmem_bytes(kind):
    try:
        info = pltpu.get_tpu_info()
        cap = getattr(info, "vmem_capacity_bytes", None)
        if cap:
            return int(cap)
    except Exception:
        pass
    return (64 << 20) if "v7" in kind else (128 << 20)


def _estimate_vmem_bytes(b_blk, n, P_pad, E, H, en_bytes):
    """Generous per-grid-step VMEM estimate (double-buffered blocks + weights +
    in-kernel temporaries)."""
    rows, HE = b_blk * n, H * E
    pipelined = 2 * (rows * E * 4 + rows * 8 * 4                # eln, load/cap
                     + b_blk * P_pad * E * en_bytes             # encoded_nodes
                     + 2 * b_blk * n * P_pad * 4)               # mask + probs
    weights = 2 * ((E + 8) * HE * 4 + HE * E * 4 + 5 * E * E * 4 + 6 * E * 4)
    temps = (4 * b_blk * n * H * P_pad * 4                      # score/exp/softmax
             + 2 * rows * HE * 4                                # q_all, attn out
             + 8 * rows * E * 4)                                # SRU / FF activations
    return pipelined + weights + temps


def _pick_b_blk(B, n, P_pad, E, H, en_bytes, n_cores, budget):
    b = 1
    for cand in range(1, min(B, 256) + 1):
        if _estimate_vmem_bytes(cand, n, P_pad, E, H, en_bytes) <= budget:
            b = cand
        else:
            break
    if n_cores >= 2 and B > 1:
        # even number of grid steps >= 2 so megacore splits the work evenly
        steps = max(2, _cdiv(B, b))
        steps += steps % 2
        b = max(1, _cdiv(B, steps))
    return b


# --------------------------------------------------------------------------
# host wrappers
# --------------------------------------------------------------------------
def prepare_encoded_nodes(encoded_nodes, use_bf16=False):
    """One-time prep of encoded_nodes: pad P up to a multiple of 128 and cast
    to the MXU compute dtype.  encoded_nodes is constant across an
    autoregressive decode, so hoisting this out of lrp_decoder_forward removes
    a full read+write of the largest tensor from every decode step."""
    P = encoded_nodes.shape[1]
    P_pad = _round_up(P, 128)
    dt = jnp.bfloat16 if use_bf16 else jnp.float32
    if P_pad != P:
        encoded_nodes = jnp.pad(encoded_nodes, ((0, 0), (0, P_pad - P), (0, 0)))
    return encoded_nodes.astype(dt)


def lrp_decoder_forward(params, model_params, encoded_nodes, encoded_last_node,
                        load, capacity, inf_mask, selected_count,
                        *, b_blk=None, use_bf16=False):
    B, n, E = encoded_last_node.shape
    P = inf_mask.shape[-1]
    H = model_params['head_num']
    D = model_params['qkv_dim']
    HD, HE = H * D, H * E
    f32 = jnp.float32
    cdt = jnp.bfloat16 if use_bf16 else jnp.float32
    P_pad = _round_up(P, 128)

    # ---- host-side control flow (selected_count is a Python scalar here) ----
    if selected_count == 0:
        # q = Wq_1(encoded_last_node): pad with two zero rows so (load, capacity)
        # contribute nothing.
        wq_eff = jnp.concatenate([params['Wq_1'], jnp.zeros((2, HD), f32)], axis=0)
    else:
        wq_eff = params['Wq_last']
    phase = (0 if selected_count <
             model_params['distribution_point_num'] + model_params['customer_num']
             else 1)
    wff1, bff1, wff2, bff2 = params['phase_ff'][phase]

    # ---- fuse + stack per-head weights ----
    #   Mq_h = Wq_h @ Wk_h^T (E+2, E),  Mv_h = Wv_h @ Wmhc_h (E, E)
    wq_h = wq_eff.reshape(E + 2, H, D)
    wk_h = params['Wk'].reshape(E, H, D)
    wv_h = params['Wv'].reshape(E, H, D)
    wmhc_h = params['Wmhc'].reshape(H, D, E)
    Mq = jnp.einsum('ihd,jhd->hij', wq_h, wk_h)              # (H, E+2, E)
    Mq = Mq.transpose(1, 0, 2).reshape(E + 2, HE)            # columns ordered (h, e)
    mq_e = Mq[:E]                                            # (E, H*E)
    mq_lc = jnp.pad(Mq[E:], ((0, 6), (0, 0)))                # (8, H*E), rows 2..7 zero
    mv = jnp.einsum('ehd,hdf->hef', wv_h, wmhc_h).reshape(HE, E)   # rows ordered (h, e)

    # SRU / FF weights regrouped per gate, biases packed.
    wsru_g = params['Wsru'].reshape(E, 3, E).transpose(1, 0, 2)    # (3, E, E): b, u, f
    bsru_g = params['bsru'].reshape(3, 1, E)
    w_rows = jnp.concatenate([wsru_g, wff1[None], wff2[None]], axis=0)   # (5, E, E)
    biases = jnp.stack([params['bmhc'], bsru_g[0], bsru_g[1] + params['Bsru'],
                        bsru_g[2], bff1, bff2], axis=0)                  # (6, 1, E)

    # ---- encoded_nodes: accept pre-prepared (padded + cast) or prepare here ----
    if encoded_nodes.shape[1] != P_pad or encoded_nodes.dtype != cdt:
        encoded_nodes = prepare_encoded_nodes(encoded_nodes, use_bf16)

    # ---- VMEM-aware batch blocking ----
    kind = _device_kind()
    n_cores = _tensorcores_per_chip(kind)
    phys_vmem = _physical_vmem_bytes(kind)
    en_bytes = 2 if use_bf16 else 4
    if b_blk is None:
        budget = int(phys_vmem * 3 // 4 * 0.6)
        b_blk = _pick_b_blk(B, n, P_pad, E, H, en_bytes, n_cores, budget)
    B_pad = _round_up(B, b_blk)
    db, dp = B_pad - B, P_pad - P

    est = _estimate_vmem_bytes(b_blk, n, P_pad, E, H, en_bytes)
    vmem_limit = int(min(phys_vmem * 3 // 4, max(32 << 20, 2 * est)))

    # ---- per-step input padding (cheap tensors only; enodes pad is hoisted) ----
    eln = (jnp.pad(encoded_last_node, ((0, db), (0, 0), (0, 0)))
           if db else encoded_last_node)
    lc = jnp.stack([load, capacity], axis=-1)                    # (B, n, 2)
    lc = jnp.pad(lc, ((0, db), (0, 0), (0, 6)))                  # (B_pad, n, 8)
    enodes = (jnp.pad(encoded_nodes, ((0, db), (0, 0), (0, 0)))
              if db else encoded_nodes)                          # (B_pad, P_pad, E)
    # Padded columns get a value strictly below any real masked score so they
    # receive exactly zero probability even for fully-masked rows.
    mask = jnp.pad(inf_mask, ((0, 0), (0, 0), (0, dp)), constant_values=MASK_PAD)
    mask = jnp.pad(mask, ((0, db), (0, 0), (0, 0))) if db else mask

    inv_sqrt_d = 1.0 / math.sqrt(D)
    inv_sqrt_emb = 1.0 / model_params['sqrt_embedding_dim']
    logit_clip = model_params['logit_clipping']

    kernel = _make_kernel(b_blk, n, P_pad, E, H,
                          inv_sqrt_d, inv_sqrt_emb, logit_clip)

    batch_map = lambda i: (i, 0, 0)
    const2 = lambda i: (0, 0)
    const3 = lambda i: (0, 0, 0)
    grid_spec = pltpu.PrefetchScalarGridSpec(
        num_scalar_prefetch=0,
        grid=(B_pad // b_blk,),
        in_specs=[
            pl.BlockSpec((b_blk, n, E), batch_map),       # encoded_last_node
            pl.BlockSpec((b_blk, n, 8), batch_map),       # (load, capacity, 0-pad)
            pl.BlockSpec((b_blk, P_pad, E), batch_map),   # encoded_nodes (P padded)
            pl.BlockSpec((b_blk, n, P_pad), batch_map),   # rank-3 inf mask (P padded)
            pl.BlockSpec((E, HE), const2),                # stacked Mq (node rows)
            pl.BlockSpec((8, HE), const2),                # stacked Mq (load/cap rows)
            pl.BlockSpec((HE, E), const2),                # stacked Mv (Wv @ Wmhc)
            pl.BlockSpec((5, E, E), const3),              # SRU b/u/f + FF1/FF2
            pl.BlockSpec((6, 1, E), const3),              # packed biases
        ],
        out_specs=pl.BlockSpec((b_blk, n, P_pad), batch_map),
    )

    probs_pad = pl.pallas_call(
        kernel,
        out_shape=jax.ShapeDtypeStruct((B_pad, n, P_pad), jnp.float32),
        grid_spec=grid_spec,
        compiler_params=pltpu.CompilerParams(
            dimension_semantics=("parallel",),
            vmem_limit_bytes=vmem_limit),
    )(eln, lc, enodes, mask, mq_e, mq_lc, mv, w_rows, biases)

    return probs_pad[:B, :, :P]


# --------------------------------------------------------------------------
# pure-JAX reference mirroring the PyTorch semantics
# --------------------------------------------------------------------------
def _reference_forward(params, model_params, encoded_nodes, encoded_last_node,
                       load, capacity, inf_mask, selected_count):
    B, P, E = encoded_nodes.shape
    n = encoded_last_node.shape[1]
    H = model_params['head_num']
    D = model_params['qkv_dim']
    HD = H * D

    input_cat = jnp.concatenate(
        [encoded_last_node, load[:, :, None], capacity[:, :, None]], axis=2)
    if selected_count == 0:
        q_flat = encoded_last_node @ params['Wq_1']
    else:
        q_flat = input_cat @ params['Wq_last']
    phase = (0 if selected_count <
             model_params['distribution_point_num'] + model_params['customer_num']
             else 1)
    wff1, bff1, wff2, bff2 = params['phase_ff'][phase]

    q = q_flat.reshape(B, n, H, D).transpose(0, 2, 1, 3)
    k = (encoded_nodes @ params['Wk']).reshape(B, P, H, D).transpose(0, 2, 1, 3)
    v = (encoded_nodes @ params['Wv']).reshape(B, P, H, D).transpose(0, 2, 1, 3)
    s = jnp.einsum('bhnd,bhpd->bhnp', q, k) / math.sqrt(D) + inf_mask[:, None]
    w = jax.nn.softmax(s, axis=-1)
    o = jnp.einsum('bhnp,bhpd->bhnd', w, v).transpose(0, 2, 1, 3).reshape(B, n, HD)

    mh = o @ params['Wmhc'] + params['bmhc']
    wx = mh @ params['Wsru'] + params['bsru']
    b_, u_, f_ = wx[..., :E], wx[..., E:2 * E], wx[..., 2 * E:]
    u = jax.nn.sigmoid(u_ + params['Bsru'])
    f = jax.nn.sigmoid(f_)
    c = f * mh + (1.0 - f) * b_
    sru = u * jnp.tanh(c) + (1.0 - u) * mh

    p1 = jax.nn.relu(sru @ wff1 + bff1)
    p2 = p1 @ wff2 + bff2
    score = jnp.einsum('bne,bpe->bnp', p2, encoded_nodes)
    score = (model_params['logit_clipping']
             * jnp.tanh(score / model_params['sqrt_embedding_dim']) + inf_mask)
    return jax.nn.softmax(score, axis=-1)


# --------------------------------------------------------------------------
if __name__ == "__main__":
    # Small shapes; E/H/D use the LRP model's standard config (128 / 8 / 16).
    B, n, P = 2, 8, 16
    E, H, D = 128, 8, 16
    HD = H * D
    model_params = dict(
        embedding_dim=E, head_num=H, qkv_dim=D,
        sqrt_embedding_dim=math.sqrt(E), logit_clipping=10.0,
        distribution_point_num=4, customer_num=12, phase_size=2,
    )

    key = jax.random.PRNGKey(0)
    ks = jax.random.split(key, 24)
    scale = 0.1
    params = {
        'Wq_1':    scale * jax.random.normal(ks[0], (E, HD), jnp.float32),
        'Wq_last': scale * jax.random.normal(ks[1], (E + 2, HD), jnp.float32),
        'Wk':      scale * jax.random.normal(ks[2], (E, HD), jnp.float32),
        'Wv':      scale * jax.random.normal(ks[3], (E, HD), jnp.float32),
        'Wmhc':    scale * jax.random.normal(ks[4], (HD, E), jnp.float32),
        'bmhc':    scale * jax.random.normal(ks[5], (1, E), jnp.float32),
        'Wsru':    scale * jax.random.normal(ks[6], (E, 3 * E), jnp.float32),
        'bsru':    scale * jax.random.normal(ks[7], (1, 3 * E), jnp.float32),
        'Bsru':    scale * jax.random.normal(ks[8], (1, E), jnp.float32),
        'phase_ff': [
            (scale * jax.random.normal(ks[9], (E, E), jnp.float32),
             scale * jax.random.normal(ks[10], (1, E), jnp.float32),
             scale * jax.random.normal(ks[11], (E, E), jnp.float32),
             scale * jax.random.normal(ks[12], (1, E), jnp.float32)),
            (scale * jax.random.normal(ks[13], (E, E), jnp.float32),
             scale * jax.random.normal(ks[14], (1, E), jnp.float32),
             scale * jax.random.normal(ks[15], (E, E), jnp.float32),
             scale * jax.random.normal(ks[16], (1, E), jnp.float32)),
        ],
    }

    encoded_nodes = jax.random.normal(ks[17], (B, P, E), jnp.float32)
    encoded_last_node = jax.random.normal(ks[18], (B, n, E), jnp.float32)
    load = jax.random.uniform(ks[19], (B, n), jnp.float32)
    capacity = jax.random.uniform(ks[20], (B, n), jnp.float32)
    mask_bits = jax.random.bernoulli(ks[21], 0.2, (B, n, P))
    mask_bits = mask_bits.at[:, :, 0].set(False)       # never a fully masked row
    inf_mask = jnp.where(mask_bits, NEG_INF, 0.0).astype(jnp.float32)

    # One-time (per problem instance) prep, hoisted out of the decode step.
    enodes_f32 = prepare_encoded_nodes(encoded_nodes, use_bf16=False)
    enodes_bf16 = prepare_encoded_nodes(encoded_nodes, use_bf16=True)

    # ---- strict f32 checks, both query paths (Wq_last / Wq_1) ----
    for selected_count in (3, 0):
        ref = _reference_forward(params, model_params, encoded_nodes,
                                 encoded_last_node, load, capacity,
                                 inf_mask, selected_count)
        # selected_count==0 passes raw (unpadded) enodes to exercise the
        # in-wrapper prepare branch; the other call uses the hoisted prep.
        enc = encoded_nodes if selected_count == 0 else enodes_f32
        probs = lrp_decoder_forward(params, model_params, enc,
                                    encoded_last_node, load, capacity,
                                    inf_mask, selected_count, use_bf16=False)
        probs = jax.block_until_ready(probs)
        assert probs.shape == (B, n, P)
        # 2e-4: host-fused head weights (Wq@Wk^T, Wv@Wmhc) and the reassociated
        # value path reorder f32 matmuls relative to the unfused reference.
        assert jnp.allclose(probs, ref, atol=2e-4, rtol=2e-4), \
            f"f32 mismatch vs reference (selected_count={selected_count})"
        assert jnp.allclose(jnp.sum(probs, axis=-1), 1.0, atol=1e-5)

    # ---- bf16 compute-dtype fast path (halves the dominant enodes DMA) ----
    # Reduced precision by construction: only a loose sanity bound here; the
    # strict correctness claim rests on the f32 path above.
    ref = _reference_forward(params, model_params, encoded_nodes,
                             encoded_last_node, load, capacity, inf_mask, 3)
    probs_bf = lrp_decoder_forward(params, model_params, enodes_bf16,
                                   encoded_last_node, load, capacity,
                                   inf_mask, 3, use_bf16=True)
    probs_bf = jax.block_until_ready(probs_bf)
    assert probs_bf.shape == (B, n, P)
    assert bool(jnp.all(jnp.isfinite(probs_bf)))
    assert bool(jnp.all(probs_bf >= -1e-6))
    assert jnp.allclose(jnp.sum(probs_bf, axis=-1), 1.0, atol=1e-3)
    assert float(jnp.max(jnp.abs(probs_bf - ref))) < 0.25, "bf16 path diverged"

    print("KERNEL_OK")
</pallas_src>

<mosaic_0001>
module attributes {stable_mosaic.version = 11 : i64} {
  func.func @kernel(%arg0: i32, %arg1: memref<2x8x128xf32, #tpu.memory_space<vmem>>, %arg2: memref<2x8x8xf32, #tpu.memory_space<vmem>>, %arg3: memref<2x128x128xf32, #tpu.memory_space<vmem>>, %arg4: memref<2x8x128xf32, #tpu.memory_space<vmem>>, %arg5: memref<128x1024xf32, #tpu.memory_space<vmem>>, %arg6: memref<8x1024xf32, #tpu.memory_space<vmem>>, %arg7: memref<1024x128xf32, #tpu.memory_space<vmem>>, %arg8: memref<5x128x128xf32, #tpu.memory_space<vmem>>, %arg9: memref<6x1x128xf32, #tpu.memory_space<vmem>>, %arg10: memref<2x8x128xf32, #tpu.memory_space<vmem>>) attributes {dimension_semantics = [#tpu.dimension_semantics<parallel>], iteration_bounds = array<i64: 1>, scalar_prefetch = 0 : i64, scratch_operands = 0 : i64, tpu.core_type = #tpu.core_type<tc>, window_params = [{transform_indices = @transform_0, window_bounds = array<i64: 2, 8, 128>}, {transform_indices = @transform_1, window_bounds = array<i64: 2, 8, 8>}, {transform_indices = @transform_2, window_bounds = array<i64: 2, 128, 128>}, {transform_indices = @transform_3, window_bounds = array<i64: 2, 8, 128>}, {pipeline_mode = #tpu.pipeline_mode<synchronous>, transform_indices = @transform_4, window_bounds = array<i64: 128, 1024>}, {pipeline_mode = #tpu.pipeline_mode<synchronous>, transform_indices = @transform_5, window_bounds = array<i64: 8, 1024>}, {pipeline_mode = #tpu.pipeline_mode<synchronous>, transform_indices = @transform_6, window_bounds = array<i64: 1024, 128>}, {pipeline_mode = #tpu.pipeline_mode<synchronous>, transform_indices = @transform_7, window_bounds = array<i64: 5, 128, 128>}, {pipeline_mode = #tpu.pipeline_mode<synchronous>, transform_indices = @transform_8, window_bounds = array<i64: 6, 1, 128>}, {transform_indices = @transform_9, window_bounds = array<i64: 2, 8, 128>}]} {
    %c0 = arith.constant 0 : index
    %c0_0 = arith.constant 0 : index
    %c0_1 = arith.constant 0 : index
    %0 = vector.load %arg1[%c0, %c0_0, %c0_1] : memref<2x8x128xf32, #tpu.memory_space<vmem>>, vector<2x8x128xf32>
    %1 = vector.shape_cast %0 : vector<2x8x128xf32> to vector<16x128xf32>
    %c0_2 = arith.constant 0 : index
    %c0_3 = arith.constant 0 : index
    %c0_4 = arith.constant 0 : index
    %2 = vector.load %arg2[%c0_2, %c0_3, %c0_4] : memref<2x8x8xf32, #tpu.memory_space<vmem>>, vector<2x8x8xf32>
    %3 = vector.shape_cast %2 : vector<2x8x8xf32> to vector<16x8xf32>
    %c0_5 = arith.constant 0 : index
    %c0_6 = arith.constant 0 : index
    %c0_7 = arith.constant 0 : index
    %4 = vector.load %arg3[%c0_5, %c0_6, %c0_7] : memref<2x128x128xf32, #tpu.memory_space<vmem>>, vector<2x128x128xf32>
    %c0_8 = arith.constant 0 : index
    %c0_9 = arith.constant 0 : index
    %c0_10 = arith.constant 0 : index
    %5 = vector.load %arg4[%c0_8, %c0_9, %c0_10] : memref<2x8x128xf32, #tpu.memory_space<vmem>>, vector<2x8x128xf32>
    %c0_11 = arith.constant 0 : index
    %c0_12 = arith.constant 0 : index
    %6 = vector.load %arg5[%c0_11, %c0_12] : memref<128x1024xf32, #tpu.memory_space<vmem>>, vector<128x1024xf32>
    %cst = arith.constant dense<0.000000e+00> : vector<16x1024xf32>
    %7 = tpu.matmul %1, %6, %cst {dimension_numbers = #tpu.dot_dimension_numbers<[1], [0], [0], [1], [0, 0, 1, 1], [], []>} : vector<16x128xf32>, vector<128x1024xf32>, vector<16x1024xf32> -> vector<16x1024xf32>
    %c0_13 = arith.constant 0 : index
    %c0_14 = arith.constant 0 : index
    %8 = vector.load %arg6[%c0_13, %c0_14] : memref<8x1024xf32, #tpu.memory_space<vmem>>, vector<8x1024xf32>
    %cst_15 = arith.constant dense<0.000000e+00> : vector<16x1024xf32>
    %9 = tpu.matmul %3, %8, %cst_15 {dimension_numbers = #tpu.dot_dimension_numbers<[1], [0], [0], [1], [0, 0, 1, 1], [], []>} : vector<16x8xf32>, vector<8x1024xf32>, vector<16x1024xf32> -> vector<16x1024xf32>
    %10 = arith.addf %7, %9 : vector<16x1024xf32>
    %11 = vector.shape_cast %10 : vector<16x1024xf32> to vector<2x64x128xf32>
    "tpu.trace_start"() <{level = 10 : i32, message = "bqe,bpe->bqp"}> : () -> ()
    %cst_16 = arith.constant dense<0.000000e+00> : vector<2x64x128xf32>
    %12 = tpu.matmul %11, %4, %cst_16 {dimension_numbers = #tpu.dot_dimension_numbers<[2], [2], [1], [1], [0, 0, 0, 1, 1, 1], [0], [0]>} : vector<2x64x128xf32>, vector<2x128x128xf32>, vector<2x64x128xf32> -> vector<2x64x128xf32>
    "tpu.trace_stop"() : () -> ()
    %cst_17 = arith.constant 2.500000e-01 : f32
    %13 = vector.broadcast %cst_17 : f32 to vector<2x64x128xf32>
    %14 = arith.mulf %12, %13 : vector<2x64x128xf32>
    %15 = vector.shape_cast %14 : vector<2x64x128xf32> to vector<2x8x8x128xf32>
    %16 = vector.shape_cast %5 : vector<2x8x128xf32> to vector<2x8x1x128xf32>
    %17 = vector.broadcast %16 : vector<2x8x1x128xf32> to vector<2x8x8x128xf32>
    %18 = arith.addf %15, %17 : vector<2x8x8x128xf32>
    %cst_18 = arith.constant dense<0xFF800000> : vector<2x8x8xf32>
    %19 = vector.multi_reduction <maximumf>, %18, %cst_18 [3] : vector<2x8x8x128xf32> to vector<2x8x8xf32>
    %20 = vector.shape_cast %19 : vector<2x8x8xf32> to vector<2x8x8x1xf32>
    %21 = vector.broadcast %20 : vector<2x8x8x1xf32> to vector<2x8x8x128xf32>
    %22 = arith.subf %18, %21 : vector<2x8x8x128xf32>
    %23 = math.exp %22 : vector<2x8x8x128xf32>
    %cst_19 = arith.constant dense<0.000000e+00> : vector<2x8x8xf32>
    %24 = vector.multi_reduction <add>, %23, %cst_19 [3] : vector<2x8x8x128xf32> to vector<2x8x8xf32>
    %25 = vector.shape_cast %24 : vector<2x8x8xf32> to vector<2x8x8x1xf32>
    %26 = tpu.reciprocal %25 : vector<2x8x8x1xf32> -> vector<2x8x8x1xf32>
    %27 = vector.broadcast %26 : vector<2x8x8x1xf32> to vector<2x8x8x128xf32>
    %28 = arith.mulf %23, %27 : vector<2x8x8x128xf32>
    %29 = vector.shape_cast %28 : vector<2x8x8x128xf32> to vector<2x64x128xf32>
    "tpu.trace_start"() <{level = 10 : i32, message = "bqp,bpe->bqe"}> : () -> ()
    %cst_20 = arith.constant dense<0.000000e+00> : vector<2x64x128xf32>
    %30 = tpu.matmul %29, %4, %cst_20 {dimension_numbers = #tpu.dot_dimension_numbers<[2], [1], [1], [2], [0, 0, 0, 1, 1, 2], [0], [0]>} : vector<2x64x128xf32>, vector<2x128x128xf32>, vector<2x64x128xf32> -> vector<2x64x128xf32>
    "tpu.trace_stop"() : () -> ()
    %31 = vector.shape_cast %30 : vector<2x64x128xf32> to vector<16x1024xf32>
    %c0_21 = arith.constant 0 : index
    %c0_22 = arith.constant 0 : index
    %32 = vector.load %arg7[%c0_21, %c0_22] : memref<1024x128xf32, #tpu.memory_space<vmem>>, vector<1024x128xf32>
    %cst_23 = arith.constant dense<0.000000e+00> : vector<16x128xf32>
    %33 = tpu.matmul %31, %32, %cst_23 {dimension_numbers = #tpu.dot_dimension_numbers<[1], [0], [0], [1], [0, 0, 1, 1], [], []>} : vector<16x1024xf32>, vector<1024x128xf32>, vector<16x128xf32> -> vector<16x128xf32>
    %c0_24 = arith.constant 0 : index
    %c0_25 = arith.constant 0 : index
    %c0_26 = arith.constant 0 : index
    %34 = vector.load %arg9[%c0_24, %c0_25, %c0_26] : memref<6x1x128xf32, #tpu.memory_space<vmem>>, vector<1x1x128xf32>
    %35 = vector.shape_cast %34 : vector<1x1x128xf32> to vector<1x128xf32>
    %36 = vector.broadcast %35 : vector<1x128xf32> to vector<16x128xf32>
    %37 = arith.addf %33, %36 : vector<16x128xf32>
    %c0_27 = arith.constant 0 : index
    %c0_28 = arith.constant 0 : index
    %c0_29 = arith.constant 0 : index
    %38 = vector.load %arg8[%c0_27, %c0_28, %c0_29] : memref<5x128x128xf32, #tpu.memory_space<vmem>>, vector<1x128x128xf32>
    %39 = vector.shape_cast %38 : vector<1x128x128xf32> to vector<128x128xf32>
    %cst_30 = arith.constant dense<0.000000e+00> : vector<16x128xf32>
    %40 = tpu.matmul %37, %39, %cst_30 {dimension_numbers = #tpu.dot_dimension_numbers<[1], [0], [0], [1], [0, 0, 1, 1], [], []>} : vector<16x128xf32>, vector<128x128xf32>, vector<16x128xf32> -> vector<16x128xf32>
    %c1 = arith.constant 1 : index
    %c0_31 = arith.constant 0 : index
    %c0_32 = arith.constant 0 : index
    %41 = vector.load %arg9[%c1, %c0_31, %c0_32] : memref<6x1x128xf32, #tpu.memory_space<vmem>>, vector<1x1x128xf32>
    %42 = vector.shape_cast %41 : vector<1x1x128xf32> to vector<1x128xf32>
    %43 = vector.broadcast %42 : vector<1x128xf32> to vector<16x128xf32>
    %44 = arith.addf %40, %43 : vector<16x128xf32>
    %c1_33 = arith.constant 1 : index
    %c0_34 = arith.constant 0 : index
    %c0_35 = arith.constant 0 : index
    %45 = vector.load %arg8[%c1_33, %c0_34, %c0_35] : memref<5x128x128xf32, #tpu.memory_space<vmem>>, vector<1x128x128xf32>
    %46 = vector.shape_cast %45 : vector<1x128x128xf32> to vector<128x128xf32>
    %cst_36 = arith.constant dense<0.000000e+00> : vector<16x128xf32>
    %47 = tpu.matmul %37, %46, %cst_36 {dimension_numbers = #tpu.dot_dimension_numbers<[1], [0], [0], [1], [0, 0, 1, 1], [], []>} : vector<16x128xf32>, vector<128x128xf32>, vector<16x128xf32> -> vector<16x128xf32>
    %c2 = arith.constant 2 : index
    %c0_37 = arith.constant 0 : index
    %c0_38 = arith.constant 0 : index
    %48 = vector.load %arg9[%c2, %c0_37, %c0_38] : memref<6x1x128xf32, #tpu.memory_space<vmem>>, vector<1x1x128xf32>
    %49 = vector.shape_cast %48 : vector<1x1x128xf32> to vector<1x128xf32>
    %50 = vector.broadcast %49 : vector<1x128xf32> to vector<16x128xf32>
    %51 = arith.addf %47, %50 : vector<16x128xf32>
    %c2_39 = arith.constant 2 : index
    %c0_40 = arith.constant 0 : index
    %c0_41 = arith.constant 0 : index
    %52 = vector.load %arg8[%c2_39, %c0_40, %c0_41] : memref<5x128x128xf32, #tpu.memory_space<vmem>>, vector<1x128x128xf32>
    %53 = vector.shape_cast %52 : vector<1x128x128xf32> to vector<128x128xf32>
    %cst_42 = arith.constant dense<0.000000e+00> : vector<16x128xf32>
    %54 = tpu.matmul %37, %53, %cst_42 {dimension_numbers = #tpu.dot_dimension_numbers<[1], [0], [0], [1], [0, 0, 1, 1], [], []>} : vector<16x128xf32>, vector<128x128xf32>, vector<16x128xf32> -> vector<16x128xf32>
    %c3 = arith.constant 3 : index
    %c0_43 = arith.constant 0 : index
    %c0_44 = arith.constant 0 : index
    %55 = vector.load %arg9[%c3, %c0_43, %c0_44] : memref<6x1x128xf32, #tpu.memory_space<vmem>>, vector<1x1x128xf32>
    %56 = vector.shape_cast %55 : vector<1x1x128xf32> to vector<1x128xf32>
    %57 = vector.broadcast %56 : vector<1x128xf32> to vector<16x128xf32>
    %58 = arith.addf %54, %57 : vector<16x128xf32>
    %59 = arith.negf %51 : vector<16x128xf32>
    %60 = math.exp %59 : vector<16x128xf32>
    %cst_45 = arith.constant 1.000000e+00 : f32
    %61 = vector.broadcast %cst_45 : f32 to vector<16x128xf32>
    %62 = arith.addf %61, %60 : vector<16x128xf32>
    %63 = arith.divf %61, %62 : vector<16x128xf32>
    %64 = arith.negf %58 : vector<16x128xf32>
    %65 = math.exp %64 : vector<16x128xf32>
    %cst_46 = arith.constant 1.000000e+00 : f32
    %66 = vector.broadcast %cst_46 : f32 to vector<16x128xf32>
    %67 = arith.addf %66, %65 : vector<16x128xf32>
    %68 = arith.divf %66, %67 : vector<16x128xf32>
    %69 = arith.mulf %68, %37 : vector<16x128xf32>
    %cst_47 = arith.constant 1.000000e+00 : f32
    %70 = vector.broadcast %cst_47 : f32 to vector<16x128xf32>
    %71 = arith.subf %70, %68 : vector<16x128xf32>
    %72 = arith.mulf %71, %44 : vector<16x128xf32>
    %73 = arith.addf %69, %72 : vector<16x128xf32>
    %74 = math.tanh %73 : vector<16x128xf32>
    %75 = arith.mulf %63, %74 : vector<16x128xf32>
    %cst_48 = arith.constant 1.000000e+00 : f32
    %76 = vector.broadcast %cst_48 : f32 to vector<16x128xf32>
    %77 = arith.subf %76, %63 : vector<16x128xf32>
    %78 = arith.mulf %77, %37 : vector<16x128xf32>
    %79 = arith.addf %75, %78 : vector<16x128xf32>
    %c3_49 = arith.constant 3 : index
    %c0_50 = arith.constant 0 : index
    %c0_51 = arith.constant 0 : index
    %80 = vector.load %arg8[%c3_49, %c0_50, %c0_51] : memref<5x128x128xf32, #tpu.memory_space<vmem>>, vector<1x128x128xf32>
    %81 = vector.shape_cast %80 : vector<1x128x128xf32> to vector<128x128xf32>
    %cst_52 = arith.constant dense<0.000000e+00> : vector<16x128xf32>
    %82 = tpu.matmul %79, %81, %cst_52 {dimension_numbers = #tpu.dot_dimension_numbers<[1], [0], [0], [1], [0, 0, 1, 1], [], []>} : vector<16x128xf32>, vector<128x128xf32>, vector<16x128xf32> -> vector<16x128xf32>
    %c4 = arith.constant 4 : index
    %c0_53 = arith.constant 0 : index
    %c0_54 = arith.constant 0 : index
    %83 = vector.load %arg9[%c4, %c0_53, %c0_54] : memref<6x1x128xf32, #tpu.memory_space<vmem>>, vector<1x1x128xf32>
    %84 = vector.shape_cast %83 : vector<1x1x128xf32> to vector<1x128xf32>
    %85 = vector.broadcast %84 : vector<1x128xf32> to vector<16x128xf32>
    %86 = arith.addf %82, %85 : vector<16x128xf32>
    %cst_55 = arith.constant 0.000000e+00 : f32
    %87 = vector.broadcast %cst_55 : f32 to vector<16x128xf32>
    %88 = arith.maximumf %86, %87 : vector<16x128xf32>
    %c4_56 = arith.constant 4 : index
    %c0_57 = arith.constant 0 : index
    %c0_58 = arith.constant 0 : index
    %89 = vector.load %arg8[%c4_56, %c0_57, %c0_58] : memref<5x128x128xf32, #tpu.memory_space<vmem>>, vector<1x128x128xf32>
    %90 = vector.shape_cast %89 : vector<1x128x128xf32> to vector<128x128xf32>
    %cst_59 = arith.constant dense<0.000000e+00> : vector<16x128xf32>
    %91 = tpu.matmul %88, %90, %cst_59 {dimension_numbers = #tpu.dot_dimension_numbers<[1], [0], [0], [1], [0, 0, 1, 1], [], []>} : vector<16x128xf32>, vector<128x128xf32>, vector<16x128xf32> -> vector<16x128xf32>
    %c5 = arith.constant 5 : index
    %c0_60 = arith.constant 0 : index
    %c0_61 = arith.constant 0 : index
    %92 = vector.load %arg9[%c5, %c0_60, %c0_61] : memref<6x1x128xf32, #tpu.memory_space<vmem>>, vector<1x1x128xf32>
    %93 = vector.shape_cast %92 : vector<1x1x128xf32> to vector<1x128xf32>
    %94 = vector.broadcast %93 : vector<1x128xf32> to vector<16x128xf32>
    %95 = arith.addf %91, %94 : vector<16x128xf32>
    %96 = vector.shape_cast %95 : vector<16x128xf32> to vector<2x8x128xf32>
    "tpu.trace_start"() <{level = 10 : i32, message = "bne,bpe->bnp"}> : () -> ()
    %cst_62 = arith.constant dense<0.000000e+00> : vector<2x8x128xf32>
    %97 = tpu.matmul %96, %4, %cst_62 {dimension_numbers = #tpu.dot_dimension_numbers<[2], [2], [1], [1], [0, 0, 0, 1, 1, 1], [0], [0]>} : vector<2x8x128xf32>, vector<2x128x128xf32>, vector<2x8x128xf32> -> vector<2x8x128xf32>
    "tpu.trace_stop"() : () -> ()
    %cst_63 = arith.constant 0.0883883461 : f32
    %98 = vector.broadcast %cst_63 : f32 to vector<2x8x128xf32>
    %99 = arith.mulf %97, %98 : vector<2x8x128xf32>
    %100 = math.tanh %99 : vector<2x8x128xf32>
    %cst_64 = arith.constant 1.000000e+01 : f32
    %101 = vector.broadcast %cst_64 : f32 to vector<2x8x128xf32>
    %102 = arith.mulf %101, %100 : vector<2x8x128xf32>
    %103 = arith.addf %102, %5 : vector<2x8x128xf32>
    %cst_65 = arith.constant dense<0xFF800000> : vector<2x8xf32>
    %104 = vector.multi_reduction <maximumf>, %103, %cst_65 [2] : vector<2x8x128xf32> to vector<2x8xf32>
    %105 = vector.shape_cast %104 : vector<2x8xf32> to vector<2x8x1xf32>
    %106 = vector.broadcast %105 : vector<2x8x1xf32> to vector<2x8x128xf32>
    %107 = arith.subf %103, %106 : vector<2x8x128xf32>
    %108 = math.exp %107 : vector<2x8x128xf32>
    %cst_66 = arith.constant dense<0.000000e+00> : vector<2x8xf32>
    %109 = vector.multi_reduction <add>, %108, %cst_66 [2] : vector<2x8x128xf32> to vector<2x8xf32>
    %110 = vector.shape_cast %109 : vector<2x8xf32> to vector<2x8x1xf32>
    %111 = tpu.reciprocal %110 : vector<2x8x1xf32> -> vector<2x8x1xf32>
    %112 = vector.broadcast %111 : vector<2x8x1xf32> to vector<2x8x128xf32>
    %113 = arith.mulf %108, %112 : vector<2x8x128xf32>
    %c0_67 = arith.constant 0 : index
    %c0_68 = arith.constant 0 : index
    %c0_69 = arith.constant 0 : index
    %114 = vector.load %arg10[%c0_67, %c0_68, %c0_69] : memref<2x8x128xf32, #tpu.memory_space<vmem>>, vector<2x8x128xf32>
    tpu.vector_store %arg10[%c0_67, %c0_68, %c0_69], %113 {strides = array<i32>} : memref<2x8x128xf32, #tpu.memory_space<vmem>>, vector<2x8x128xf32>,
    return
  }
  func.func @transform_0(%arg0: i32) -> (i32, i32, i32) {
    %c0_i32 = arith.constant 0 : i32
    %c0_i32_0 = arith.constant 0 : i32
    %c0_i32_1 = arith.constant 0 : i32
    return %arg0, %c0_i32, %c0_i32_0 : i32, i32, i32
  }
  func.func @transform_1(%arg0: i32) -> (i32, i32, i32) {
    %c0_i32 = arith.constant 0 : i32
    %c0_i32_0 = arith.constant 0 : i32
    %c0_i32_1 = arith.constant 0 : i32
    return %arg0, %c0_i32, %c0_i32_0 : i32, i32, i32
  }
  func.func @transform_2(%arg0: i32) -> (i32, i32, i32) {
    %c0_i32 = arith.constant 0 : i32
    %c0_i32_0 = arith.constant 0 : i32
    %c0_i32_1 = arith.constant 0 : i32
    return %arg0, %c0_i32, %c0_i32_0 : i32, i32, i32
  }
  func.func @transform_3(%arg0: i32) -> (i32, i32, i32) {
    %c0_i32 = arith.constant 0 : i32
    %c0_i32_0 = arith.constant 0 : i32
    %c0_i32_1 = arith.constant 0 : i32
    return %arg0, %c0_i32, %c0_i32_0 : i32, i32, i32
  }
  func.func @transform_4(%arg0: i32) -> (i32, i32) {
    %c0_i32 = arith.constant 0 : i32
    %c0_i32_0 = arith.constant 0 : i32
    %c0_i32_1 = arith.constant 0 : i32
    return %c0_i32, %c0_i32_0 : i32, i32
  }
  func.func @transform_5(%arg0: i32) -> (i32, i32) {
    %c0_i32 = arith.constant 0 : i32
    %c0_i32_0 = arith.constant 0 : i32
    %c0_i32_1 = arith.constant 0 : i32
    return %c0_i32, %c0_i32_0 : i32, i32
  }
  func.func @transform_6(%arg0: i32) -> (i32, i32) {
    %c0_i32 = arith.constant 0 : i32
    %c0_i32_0 = arith.constant 0 : i32
    %c0_i32_1 = arith.constant 0 : i32
    return %c0_i32, %c0_i32_0 : i32, i32
  }
  func.func @transform_7(%arg0: i32) -> (i32, i32, i32) {
    %c0_i32 = arith.constant 0 : i32
    %c0_i32_0 = arith.constant 0 : i32
    %c0_i32_1 = arith.constant 0 : i32
    %c0_i32_2 = arith.constant 0 : i32
    return %c0_i32, %c0_i32_0, %c0_i32_1 : i32, i32, i32
  }
  func.func @transform_8(%arg0: i32) -> (i32, i32, i32) {
    %c0_i32 = arith.constant 0 : i32
    %c0_i32_0 = arith.constant 0 : i32
    %c0_i32_1 = arith.constant 0 : i32
    %c0_i32_2 = arith.constant 0 : i32
    return %c0_i32, %c0_i32_0, %c0_i32_1 : i32, i32, i32
  }
  func.func @transform_9(%arg0: i32) -> (i32, i32, i32) {
    %c0_i32 = arith.constant 0 : i32
    %c0_i32_0 = arith.constant 0 : i32
    %c0_i32_1 = arith.constant 0 : i32
    return %arg0, %c0_i32, %c0_i32_0 : i32, i32, i32
  }
}

</mosaic_0001>

<bundles_post_ra>
// kernel: tpu_custom_call.1
= control target key start
LH: loop header
LB: loop body
LE: loop exit
PB: predicated region body
PF: predicated region fallthrough
CT: control target
= control target key end

     0   :  { %14 = vsyncpa [#allocation3], 0  ;;  %s5969_s0 = inlined_call_operand.hbm [shape: f32[2,8,128], index: 0, kind: input, shape index: {}]   ;;  %s5970_s1 = inlined_call_operand.hbm [shape: f32[2,8,8], index: 1, kind: input, shape index: {}]   ;;  %s5971_s2 = inlined_call_operand.hbm [shape: f32[2,128,128], index: 2, kind: input, shape index: {}]   ;;  %s5972_s3 = inlined_call_operand.hbm [shape: f32[2,8,128], index: 3, kind: input, shape index: {}]   ;;  %s5973_s4 = inlined_call_operand.hbm [shape: f32[128,1024], index: 4, kind: input, shape index: {}]   ;;  %s5974_s5 = inlined_call_operand.hbm [shape: f32[8,1024], index: 5, kind: input, shape index: {}]   ;;  %s5975_s6 = inlined_call_operand.hbm [shape: f32[1024,128], index: 6, kind: input, shape index: {}]   ;;  %s5976_s7 = inlined_call_operand.hbm [shape: f32[5,128,128], index: 7, kind: input, shape index: {}]   ;;  %s5977_s8 = inlined_call_operand.vmem [shape: f32[6,1,128], index: 8, kind: input, shape index: {}]   ;;  %s5978_s9 = inlined_call_operand.hbm [shape: f32[2,8,128], index: 9, kind: output, shape index: {}]  }
   0x1   :  { %15 = vsyncpa [#allocation6], 0 }
   0x2   :  { %16 = vsyncpa [#allocation9], 0 }
   0x3   :  { %17 = vsyncpa [#allocation12], 0 }
   0x4   :  { %18 = vsyncpa [#allocation15], 0 }
   0x5   :  { %19 = vsyncpa [#allocation4], 0  ;;  %s5239_s30 = smov [#allocation5]   ;;  %s5240_s11 = smov [#allocation8]  }
   0x6   :  { %s37_s10 = sshll.u32 %s5239_s30, 4  ;;  %s61_s12 = sshll.u32 %s5240_s11, 4  ;;  %s38_s10 = int_to_ptr.vmem [resolvable:$true] %s37_s10  ;;  %s5306_s12 = int_to_ptr.vmem [resolvable:$true] %s61_s12 }
   0x7   :  { %s5029_s15 = scalar_lea.hbm %s5970_s1, 256 }
   0x8   :  { %p5030_p0 = scmp.ne.s32.totalorder %s5970_s1, %s5029_s15  ;;  %p5033_p1 = scmp.lt.u32.totalorder %s5029_s15, %s5970_s1 }
   0xa   :  { %p5035_p2 = pnand %p5033_p1, %p5030_p0 }
   0xc   :  { %5038 = shalt.err (!%p5035_p2)
}
   0xd   :  { %s5039_s20 = scalar_lea.vmem %s38_s10, 256  ;;  %p5044_p4 = scmp.lt.s32.totalorder %s38_s10, %s38_s10 }
   0xe   :  { %p5040_p3 = scmp.ne.s32.totalorder %s38_s10, %s5039_s20  ;;  %p5045_p5 = scmp.lt.s32.totalorder %s5039_s20, %s5039_s20 }
  0x10   :  { %p5046_p6 = por %p5045_p5, %p5044_p4 }
  0x12   :  { %p5047_p7 = pnand %p5046_p6, %p5040_p3 }
  0x14   :  { %5050 = shalt.err (!%p5047_p7)
}
  0x15   :  { %s5241_s21 = smov 128   ;;  %s5242_s22 = smov 8  }
  0x16   :  { %43 = dma.hbm_to_vmem [thread:$0]  %s5970_s1, 256, %s38_s10, [#allocation6], %s5241_s21, %s5241_s21, %s5242_s22  }
  0x17   :  { %s5051_s27 = scalar_lea.hbm %s5972_s3, 256 }
  0x18   :  { %p5052_p8 = scmp.ne.s32.totalorder %s5972_s3, %s5051_s27  ;;  %p5055_p9 = scmp.lt.u32.totalorder %s5051_s27, %s5972_s3 }
  0x1a   :  { %p5057_p10 = pnand %p5055_p9, %p5052_p8 }
  0x1c   :  { %5060 = shalt.err (!%p5057_p10)
}
  0x1d   :  { %s5061_s13 = scalar_lea.vmem %s5306_s12, 256  ;;  %p5066_p12 = scmp.lt.s32.totalorder %s5306_s12, %s5306_s12 }
  0x1e   :  { %p5062_p11 = scmp.ne.s32.totalorder %s5306_s12, %s5061_s13  ;;  %p5067_p13 = scmp.lt.s32.totalorder %s5061_s13, %s5061_s13 }
  0x20   :  { %p5068_p0 = por %p5067_p13, %p5066_p12 }
  0x22   :  { %p5069_p1 = pnand %p5068_p0, %p5062_p11 }
  0x24   :  { %5072 = shalt.err (!%p5069_p1)
}
  0x25   :  { %67 = dma.hbm_to_vmem [thread:$0]  %s5972_s3, 256, %s5306_s12, [#allocation9], %s5241_s21, %s5241_s21, %s5242_s22  }
  0x26   :  { %s5243_s14 = smov [#allocation11]   ;;  %s5244_s16 = smov [#allocation2]  }
  0x27   :  { %s86_s15 = sshll.u32 %s5243_s14, 4  ;;  %s25_s17 = sshll.u32 %s5244_s16, 4  ;;  %s87_s15 = int_to_ptr.vmem [resolvable:$true] %s86_s15  ;;  %s5343_s17 = int_to_ptr.vmem [resolvable:$true] %s25_s17 }
  0x28   :  { %s5073_s20 = scalar_lea.hbm %s5974_s5, 1024 }
  0x29   :  { %p5074_p2 = scmp.ne.s32.totalorder %s5974_s5, %s5073_s20  ;;  %p5077_p3 = scmp.lt.u32.totalorder %s5073_s20, %s5974_s5 }
  0x2b   :  { %p5079_p4 = pnand %p5077_p3, %p5074_p2 }
  0x2d   :  { %5082 = shalt.err (!%p5079_p4)
}
  0x2e   :  { %s5083_s3 = scalar_lea.vmem %s87_s15, 1024  ;;  %p5088_p6 = scmp.lt.s32.totalorder %s87_s15, %s87_s15 }
  0x2f   :  { %p5084_p5 = scmp.ne.s32.totalorder %s87_s15, %s5083_s3  ;;  %p5089_p7 = scmp.lt.s32.totalorder %s5083_s3, %s5083_s3 }
  0x31   :  { %p5090_p8 = por %p5089_p7, %p5088_p6 }
  0x33   :  { %p5091_p9 = pnand %p5090_p8, %p5084_p5 }
  0x35   :  { %5094 = shalt.err (!%p5091_p9)
}
  0x36   :  { %89 = dma.hbm_to_vmem [thread:$0]  %s5974_s5, 1024, %s87_s15, [#allocation12]  }
  0x37   :  { %s5095_s30 = scalar_lea.hbm %s5969_s0, 256 }
  0x38   :  { %p5096_p10 = scmp.ne.s32.totalorder %s5969_s0, %s5095_s30  ;;  %p5099_p11 = scmp.lt.u32.totalorder %s5095_s30, %s5969_s0 }
  0x3a   :  { %p5101_p12 = pnand %p5099_p11, %p5096_p10 }
  0x3c   :  { %5104 = shalt.err (!%p5101_p12)
}
  0x3d   :  { %s5105_s14 = scalar_lea.vmem %s5343_s17, 256  ;;  %p5110_p0 = scmp.lt.s32.totalorder %s5343_s17, %s5343_s17 }
  0x3e   :  { %p5106_p13 = scmp.ne.s32.totalorder %s5343_s17, %s5105_s14  ;;  %p5111_p1 = scmp.lt.s32.totalorder %s5105_s14, %s5105_s14 }
  0x40   :  { %p5112_p2 = por %p5111_p1, %p5110_p0 }
  0x42   :  { %p5113_p3 = pnand %p5112_p2, %p5106_p13 }
  0x44   :  { %5116 = shalt.err (!%p5113_p3)
}
  0x45   :  { %31 = dma.hbm_to_vmem [thread:$0]  %s5969_s0, 256, %s5343_s17, [#allocation3], %s5241_s21, %s5241_s21, %s5242_s22  }
  0x46   :  { %s5245_s16 = smov [#allocation7]   ;;  %s5246_s19 = smov [#allocation10]  }
  0x47   :  { %s49_s18 = sshll.u32 %s5245_s16, 4  ;;  %s73_s20 = sshll.u32 %s5246_s19, 4  ;;  %s50_s18 = int_to_ptr.vmem [resolvable:$true] %s49_s18  ;;  %s5377_s20 = int_to_ptr.vmem [resolvable:$true] %s73_s20 }
  0x48   :  { %s5117_s25 = scalar_lea.hbm %s5971_s2, 4096 }
  0x49   :  { %p5118_p4 = scmp.ne.s32.totalorder %s5971_s2, %s5117_s25  ;;  %p5121_p5 = scmp.lt.u32.totalorder %s5117_s25, %s5971_s2 }
  0x4b   :  { %p5123_p6 = pnand %p5121_p5, %p5118_p4 }
  0x4d   :  { %5126 = shalt.err (!%p5123_p6)
}
  0x4e   :  { %s5127_s0 = scalar_lea.vmem %s50_s18, 4096  ;;  %p5132_p8 = scmp.lt.s32.totalorder %s50_s18, %s50_s18 }
  0x4f   :  { %p5128_p7 = scmp.ne.s32.totalorder %s50_s18, %s5127_s0  ;;  %p5133_p9 = scmp.lt.s32.totalorder %s5127_s0, %s5127_s0 }
  0x51   :  { %p5134_p10 = por %p5133_p9, %p5132_p8 }
  0x53   :  { %p5135_p11 = pnand %p5134_p10, %p5128_p7 }
  0x55   :  { %5138 = shalt.err (!%p5135_p11)
}
  0x56   :  { %55 = dma.hbm_to_vmem [thread:$0]  %s5971_s2, 4096, %s50_s18, [#allocation6], %s5241_s21, %s5241_s21, %s5242_s22  }
  0x57   :  { %s5139_s11 = scalar_lea.hbm %s5973_s4, 16384 }
  0x58   :  { %p5140_p12 = scmp.ne.s32.totalorder %s5973_s4, %s5139_s11  ;;  %p5143_p13 = scmp.lt.u32.totalorder %s5139_s11, %s5973_s4 }
  0x5a   :  { %p5145_p0 = pnand %p5143_p13, %p5140_p12 }
  0x5c   :  { %5148 = shalt.err (!%p5145_p0)
}
  0x5d   :  { %s5149_s5 = scalar_lea.vmem %s5377_s20, 16384  ;;  %p5154_p2 = scmp.lt.s32.totalorder %s5377_s20, %s5377_s20 }
  0x5e   :  { %p5150_p1 = scmp.ne.s32.totalorder %s5377_s20, %s5149_s5  ;;  %p5155_p3 = scmp.lt.s32.totalorder %s5149_s5, %s5149_s5 }
  0x60   :  { %p5156_p4 = por %p5155_p3, %p5154_p2 }
  0x62   :  { %p5157_p5 = pnand %p5156_p4, %p5150_p1 }
  0x64   :  { %5160 = shalt.err (!%p5157_p5)
}
  0x65   :  { %s5247_s2 = smov 1024   ;;  %s5248_s15 = smov 64  }
  0x66   :  { %79 = dma.hbm_to_vmem [thread:$0]  %s5973_s4, 16384, %s5377_s20, [#allocation9], %s5247_s2, %s5247_s2, %s5248_s15  }
  0x67   :  { %s5249_s19 = smov [#allocation13]   ;;  %s5250_s24 = smov [#allocation14]  }
  0x68   :  { %s95_s23 = sshll.u32 %s5249_s19, 4  ;;  %s107_s25 = sshll.u32 %s5250_s24, 4  ;;  %s96_s23 = int_to_ptr.vmem [resolvable:$true] %s95_s23  ;;  %s5411_s25 = int_to_ptr.vmem [resolvable:$true] %s107_s25 }
  0x69   :  { %s5161_s12 = scalar_lea.hbm %s5975_s6, 16384 }
  0x6a   :  { %p5162_p6 = scmp.ne.s32.totalorder %s5975_s6, %s5161_s12  ;;  %p5165_p7 = scmp.lt.u32.totalorder %s5161_s12, %s5975_s6 }
  0x6c   :  { %p5167_p8 = pnand %p5165_p7, %p5162_p6 }
  0x6e   :  { %5170 = shalt.err (!%p5167_p8)
}
  0x6f   :  { %s5171_s4 = scalar_lea.vmem %s96_s23, 16384  ;;  %p5176_p10 = scmp.lt.s32.totalorder %s96_s23, %s96_s23 }
  0x70   :  { %p5172_p9 = scmp.ne.s32.totalorder %s96_s23, %s5171_s4  ;;  %p5177_p11 = scmp.lt.s32.totalorder %s5171_s4, %s5171_s4 }
  0x72   :  { %p5178_p12 = por %p5177_p11, %p5176_p10 }
  0x74   :  { %p5179_p13 = pnand %p5178_p12, %p5172_p9 }
  0x76   :  { %5182 = shalt.err (!%p5179_p13)
}
  0x77   :  { %101 = dma.hbm_to_vmem [thread:$0]  %s5975_s6, 16384, %s96_s23, [#allocation12], %s5241_s21, %s5241_s21, %s5242_s22  }
  0x78   :  { %s5183_s13 = scalar_lea.hbm %s5976_s7, 10240 }
  0x79   :  { %p5184_p0 = scmp.ne.s32.totalorder %s5976_s7, %s5183_s13  ;;  %p5187_p1 = scmp.lt.u32.totalorder %s5183_s13, %s5976_s7 }
  0x7b   :  { %p5189_p2 = pnand %p5187_p1, %p5184_p0 }
  0x7d   :  { %5192 = shalt.err (!%p5189_p2)
}
  0x7e   :  { %s5193_s2 = scalar_lea.vmem %s5411_s25, 10240  ;;  %p5198_p4 = scmp.lt.s32.totalorder %s5411_s25, %s5411_s25 }
  0x7f   :  { %p5194_p3 = scmp.ne.s32.totalorder %s5411_s25, %s5193_s2  ;;  %p5199_p5 = scmp.lt.s32.totalorder %s5193_s2, %s5193_s2 }
  0x81   :  { %p5200_p6 = por %p5199_p5, %p5198_p4 }
  0x83   :  { %p5201_p7 = pnand %p5200_p6, %p5194_p3 }
  0x85   :  { %5204 = shalt.err (!%p5201_p7)
}
  0x86   :  { %113 = dma.hbm_to_vmem [thread:$0]  %s5976_s7, 10240, %s5411_s25, [#allocation15], %s5241_s21, %s5241_s21, %s5242_s22  }
  0x87   :  { %5227 = dma.done.wait [#allocation3], 256  }
  0x88   :  { %5228 = vsyncadd [#allocation3], 4294967040 }
  0x89   :  { %5229 = dma.done.wait [#allocation6], 4352  }
  0x8a   :  { %5230 = vsyncadd [#allocation6], 4294962944 }
  0x8b   :  { %5231 = dma.done.wait [#allocation9], 16640  }
  0x8c   :  { %5232 = vsyncadd [#allocation9], 4294950656 }
  0x8d   :  { %5233 = dma.done.wait [#allocation12], 17408  }
  0x8e   :  { %5234 = vsyncadd [#allocation12], 4294949888 }
  0x8f   :  { %5235 = dma.done.wait [#allocation15], 10240  }
  0x90   :  { %5236 = vsyncadd [#allocation15], 4294957056  ;;  %v5979_v0 = vmov 0.0   ;;  %v307_v1 = vld [vmem:[#allocation11 + $0x8] sm:$0xff]  ;;  %v306_v2 = vld [vmem:[#allocation11] sm:$0xff]  ;;  %vm314_vm0 = vcmask 64512  }
  0x91   :  { %385 = vmatprep.mubr.f32.mxu1 %v5979_v0  ;;  %693 = vmatprep.mubr.f32.mxu0 %v5979_v0  ;;  %v5450_v3 = vld [vmem:[#allocation5] sm:$0xff]  ;;  %v309_v4 = vld [vmem:[#allocation11 + $0x18] sm:$0xff]  ;;  %v179_v5 = vld [vmem:[#allocation10 + $0x8] sm:$0xff]  ;;  %vm5254_vm1 = vmmov 0  }
  0x92   :  { %321 = vmatprep.subr.mxu1 %v307_v1  ;;  %v187_v6 = vld [vmem:[#allocation10 + $0x48] sm:$0xff]  ;;  %v308_v8 = vld [vmem:[#allocation11 + $0x10] sm:$0xff]  ;;  %v178_v9 = vld [vmem:[#allocation10] sm:$0xff] }
  0x93   :  { %322 = vmatpush1.msra.mxu1 %v306_v2  ;;  %v4304_v7 = vpack.c.bf16 %v187_v6, %v179_v5  ;;  %v186_v10 = vld [vmem:[#allocation10 + $0x40] sm:$0xff]  ;;  %v5454_v12 = vld [vmem:[#allocation5 + $0x8] sm:$0xff]  ;;  %v313_v32 = vld [vmem:[#allocation11 + $0x38] sm:$0xff] }
  0x94   :  { %3488 = vmatmul.mubr.msk.f32.vlgmr.msra.gmra.mrb[0].mxu1 %vm314_vm0, %v5450_v3  ;;  %398 = vmatprep.subr.mxu1 %v309_v4  ;;  %v4306_v11 = vpack.c.bf16 %v186_v10, %v178_v9  ;;  %v195_v13 = vld [vmem:[#allocation10 + $0x88] sm:$0xff]  ;;  %v194_v16 = vld [vmem:[#allocation10 + $0x80] sm:$0xff]  ;;  %v181_v39 = vld [vmem:[#allocation10 + $0x18] sm:$0xff] }
  0x95   :  { %v203_v14 = vld [vmem:[#allocation10 + $0xc8] sm:$0xff]  ;;  %4305 = vmatprep.subr.bf16.mxu0 %v4304_v7  ;;  %399 = vmatpush1.msra.mxu1 %v308_v8  ;;  %v202_v17 = vld [vmem:[#allocation10 + $0xc0] sm:$0xff]  ;;  %v189_v40 = vld [vmem:[#allocation10 + $0x58] sm:$0xff] }
  0x96   :  { %v4308_v15 = vpack.c.bf16 %v203_v14, %v195_v13  ;;  %v311_v18 = vld [vmem:[#allocation11 + $0x28] sm:$0xff]  ;;  %4307 = vmatpush1.bf16.msra.mxu0 %v4306_v11  ;;  %391 = vmatprep.mubr.f32.mxu1 %v5979_v0  ;;  %v4310_v19 = vpack.c.bf16 %v202_v17, %v194_v16  ;;  %v210_v23 = vld [vmem:[#allocation10 + $0x100] sm:$0xff]  ;;  %v312_v43 = vld [vmem:[#allocation11 + $0x30] sm:$0xff]  ;;  %v4336_v45 = vpack.c.bf16 %v189_v40, %v181_v39 }
  0x97   :  { %v211_v20 = vld [vmem:[#allocation10 + $0x108] sm:$0xff]  ;;  %475 = vmatprep.subr.mxu1 %v311_v18  ;;  %v218_v24 = vld [vmem:[#allocation10 + $0x140] sm:$0xff]  ;;  %v180_v52 = vld [vmem:[#allocation10 + $0x10] sm:$0xff] }
  0x98   :  { %v219_v21 = vld [vmem:[#allocation10 + $0x148] sm:$0xff]  ;;  %4309 = vmatprep.subr.bf16.mxu0 %v4308_v15  ;;  %3489 = vmatmul.mubr.msk.f32.gmra.mrb[2].mxu1 %vm314_vm0, %v5454_v12  ;;  %v310_v27 = vld [vmem:[#allocation11 + $0x20] sm:$0xff]  ;;  %v4314_v28 = vpack.c.bf16 %v218_v24, %v210_v23  ;;  %v188_v53 = vld [vmem:[#allocation10 + $0x50] sm:$0xff] }
  0x99   :  { %v4312_v22 = vpack.c.bf16 %v219_v21, %v211_v20  ;;  %v227_v25 = vld [vmem:[#allocation10 + $0x188] sm:$0xff]  ;;  %462 = vmatprep.mubr.f32.mxu1 %v5979_v0  ;;  %v226_v30 = vld [vmem:[#allocation10 + $0x180] sm:$0xff]  ;;  %v197_v57 = vld [vmem:[#allocation10 + $0x98] sm:$0xff]  ;;  %v4338_v61 = vpack.c.bf16 %v188_v53, %v180_v52 }
  0x9a   :  { %v235_v26 = vld [vmem:[#allocation10 + $0x1c8] sm:$0xff]  ;;  %4311 = vmatpush1.bf16.msra.mxu0 %v4310_v19  ;;  %v234_v31 = vld [vmem:[#allocation10 + $0x1c0] sm:$0xff]  ;;  %v205_v58 = vld [vmem:[#allocation10 + $0xd8] sm:$0xff] }
  0x9b   :  { %4313 = vmatprep.subr.bf16.mxu0 %v4312_v22  ;;  %v4316_v29 = vpack.c.bf16 %v235_v26, %v227_v25  ;;  %v243_v33 = vld [vmem:[#allocation10 + $0x208] sm:$0xff]  ;;  %v4318_v35 = vpack.c.bf16 %v234_v31, %v226_v30  ;;  %v242_v36 = vld [vmem:[#allocation10 + $0x200] sm:$0xff]  ;;  %v4340_v63 = vpack.c.bf16 %v205_v58, %v197_v57  ;;  %v196_v1 = vld [vmem:[#allocation10 + $0x90] sm:$0xff] }
  0x9c   :  { %3490 = vmatmul.mubr.msk.f32.vlgmr.msra.gmra.mrb[4].mxu1 %vm314_vm0, %v5450_v3  ;;  %v251_v34 = vld [vmem:[#allocation10 + $0x248] sm:$0xff]  ;;  %v250_v38 = vld [vmem:[#allocation10 + $0x240] sm:$0xff]  ;;  %v204_v2 = vld [vmem:[#allocation10 + $0xd0] sm:$0xff] }
  0x9d   :  { %476 = vmatpush1.msra.mxu1 %v310_v27  ;;  %468 = vmatprep.mubr.f32.mxu1 %v5979_v0  ;;  %v4320_v37 = vpack.c.bf16 %v251_v34, %v243_v33  ;;  %v259_v41 = vld [vmem:[#allocation10 + $0x288] sm:$0xff]  ;;  %v4322_v44 = vpack.c.bf16 %v250_v38, %v242_v36  ;;  %v258_v47 = vld [vmem:[#allocation10 + $0x280] sm:$0xff]  ;;  %v213_v7 = vld [vmem:[#allocation10 + $0x118] sm:$0xff]  ;;  %v4342_v11 = vpack.c.bf16 %v204_v2, %v196_v1 }
  0x9e   :  { %4315 = vmatpush1.bf16.msra.mxu0 %v4314_v28  ;;  %552 = vmatprep.subr.mxu1 %v313_v32  ;;  %v267_v42 = vld [vmem:[#allocation10 + $0x2c8] sm:$0xff]  ;;  %v266_v48 = vld [vmem:[#allocation10 + $0x2c0] sm:$0xff]  ;;  %v221_v8 = vld [vmem:[#allocation10 + $0x158] sm:$0xff] }
  0x9f   :  { %4317 = vmatprep.subr.bf16.mxu0 %v4316_v29  ;;  %v4324_v46 = vpack.c.bf16 %v267_v42, %v259_v41  ;;  %v275_v49 = vld [vmem:[#allocation10 + $0x308] sm:$0xff]  ;;  %v4326_v51 = vpack.c.bf16 %v266_v48, %v258_v47  ;;  %v274_v54 = vld [vmem:[#allocation10 + $0x300] sm:$0xff]  ;;  %v4344_v14 = vpack.c.bf16 %v221_v8, %v213_v7  ;;  %v212_v15 = vld [vmem:[#allocation10 + $0x110] sm:$0xff] }
  0xa0   :  { %3491 = vmatmul.mubr.msk.f32.gmra.mrb[6].mxu1 %vm314_vm0, %v5454_v12  ;;  %v283_v50 = vld [vmem:[#allocation10 + $0x348] sm:$0xff]  ;;  %v282_v56 = vld [vmem:[#allocation10 + $0x340] sm:$0xff]  ;;  %v220_v16 = vld [vmem:[#allocation10 + $0x150] sm:$0xff] }
  0xa1   :  { %539 = vmatprep.mubr.f32.mxu1 %v5979_v0  ;;  %v4328_v55 = vpack.c.bf16 %v283_v50, %v275_v49  ;;  %v291_v59 = vld [vmem:[#allocation10 + $0x388] sm:$0xff]  ;;  %v4330_v62 = vpack.c.bf16 %v282_v56, %v274_v54  ;;  %v290_v4 = vld [vmem:[#allocation10 + $0x380] sm:$0xff]  ;;  %v229_v20 = vld [vmem:[#allocation10 + $0x198] sm:$0xff]  ;;  %v4346_v24 = vpack.c.bf16 %v220_v16, %v212_v15 }
  0xa2   :  { %4319 = vmatpush1.bf16.msra.mxu0 %v4318_v35  ;;  %v299_v60 = vld [vmem:[#allocation10 + $0x3c8] sm:$0xff]  ;;  %v298_v6 = vld [vmem:[#allocation10 + $0x3c0] sm:$0xff]  ;;  %v237_v21 = vld [vmem:[#allocation10 + $0x1d8] sm:$0xff] }
  0xa3   :  { %4321 = vmatprep.subr.bf16.mxu0 %v4320_v37  ;;  %v4332_v5 = vpack.c.bf16 %v299_v60, %v291_v59  ;;  %v183_v9 = vld [vmem:[#allocation10 + $0x28] sm:$0xff]  ;;  %v4334_v13 = vpack.c.bf16 %v298_v6, %v290_v4  ;;  %v182_v18 = vld [vmem:[#allocation10 + $0x20] sm:$0xff]  ;;  %v5477_v23 = vld [vmem:[#allocation2] sm:$0xff]  ;;  %v4348_v29 = vpack.c.bf16 %v237_v21, %v229_v20 }
  0xa4   :  { %3492 = vmatmul.mubr.msk.f32.vlgmr.msra.gmra.mrb[8].mxu1 %vm314_vm0, %v5450_v3  ;;  %v191_v10 = vld [vmem:[#allocation10 + $0x68] sm:$0xff]  ;;  %v190_v19 = vld [vmem:[#allocation10 + $0x60] sm:$0xff]  ;;  %v228_v26 = vld [vmem:[#allocation10 + $0x190] sm:$0xff] }
  0xa5   :  { %553 = vmatpush1.msra.mxu1 %v312_v43  ;;  %545 = vmatprep.mubr.f32.mxu1 %v5979_v0  ;;  %v4368_v17 = vpack.c.bf16 %v191_v10, %v183_v9  ;;  %v199_v22 = vld [vmem:[#allocation10 + $0xa8] sm:$0xff]  ;;  %v4370_v25 = vpack.c.bf16 %v190_v19, %v182_v18  ;;  %v236_v27 = vld [vmem:[#allocation10 + $0x1d0] sm:$0xff]  ;;  %v198_v28 = vld [vmem:[#allocation10 + $0xa0] sm:$0xff] }
  0xa6   :  { %4323 = vmatpush1.bf16.msra.mxu0 %v4322_v44  ;;  %4337 = vmatprep.subr.bf16.mxu1 %v4336_v45  ;;  %v206_v31 = vld [vmem:[#allocation10 + $0xe0] sm:$0xff]  ;;  %v245_v32 = vld [vmem:[#allocation10 + $0x218] sm:$0xff]  ;;  %v215_v34 = vld [vmem:[#allocation10 + $0x128] sm:$0xff]  ;;  %v4350_v36 = vpack.c.bf16 %v236_v27, %v228_v26 }
  0xa7   :  { %4325 = vmatprep.subr.bf16.mxu0 %v4324_v46  ;;  %v253_v33 = vld [vmem:[#allocation10 + $0x258] sm:$0xff]  ;;  %v4374_v37 = vpack.c.bf16 %v206_v31, %v198_v28  ;;  %v244_v39 = vld [vmem:[#allocation10 + $0x210] sm:$0xff]  ;;  %v214_v41 = vld [vmem:[#allocation10 + $0x120] sm:$0xff] }
  0xa8   :  { %3493 = vmatmul.mubr.msk.f32.gmra.mrb[10].mxu1 %vm314_vm0, %v5454_v12  ;;  %v5481_v35 = vld [vmem:[#allocation2 + $0x8] sm:$0xff]  ;;  %v4352_v38 = vpack.c.bf16 %v253_v33, %v245_v32  ;;  %v252_v40 = vld [vmem:[#allocation10 + $0x250] sm:$0xff]  ;;  %v222_v43 = vld [vmem:[#allocation10 + $0x160] sm:$0xff] }
  0xa9   :  { %616 = vmatprep.mubr.f32.mxu1 %v5979_v0  ;;  %v261_v44 = vld [vmem:[#allocation10 + $0x298] sm:$0xff]  ;;  %v231_v46 = vld [vmem:[#allocation10 + $0x1a8] sm:$0xff]  ;;  %v4354_v48 = vpack.c.bf16 %v252_v40, %v244_v39  ;;  %v4378_v49 = vpack.c.bf16 %v222_v43, %v214_v41  ;;  %v268_v52 = vld [vmem:[#allocation10 + $0x2d0] sm:$0xff] }
  0xaa   :  { %4327 = vmatpush1.bf16.msra.mxu0 %v4326_v51  ;;  %v269_v45 = vld [vmem:[#allocation10 + $0x2d8] sm:$0xff]  ;;  %v239_v47 = vld [vmem:[#allocation10 + $0x1e8] sm:$0xff]  ;;  %v260_v51 = vld [vmem:[#allocation10 + $0x290] sm:$0xff] }
  0xab   :  { %4329 = vmatprep.subr.bf16.mxu0 %v4328_v55  ;;  %v4356_v50 = vpack.c.bf16 %v269_v45, %v261_v44  ;;  %v230_v53 = vld [vmem:[#allocation10 + $0x1a0] sm:$0xff]  ;;  %v4380_v54 = vpack.c.bf16 %v239_v47, %v231_v46  ;;  %v277_v56 = vld [vmem:[#allocation10 + $0x318] sm:$0xff]  ;;  %v247_v58 = vld [vmem:[#allocation10 + $0x228] sm:$0xff]  ;;  %v4358_v60 = vpack.c.bf16 %v268_v52, %v260_v51 }
  0xac   :  { %3494 = vmatmul.mubr.msk.f32.vlgmr.msra.gmra.mrb[12].mxu1 %vm314_vm0, %v5450_v3  ;;  %v207_v3 = vld [vmem:[#allocation10 + $0xe8] sm:$0xff]  ;;  %v238_v55 = vld [vmem:[#allocation10 + $0x1e0] sm:$0xff]  ;;  %v285_v57 = vld [vmem:[#allocation10 + $0x358] sm:$0xff] }
  0xad   :  { %4339 = vmatpush1.bf16.msra.mxu1 %v4338_v61  ;;  %622 = vmatprep.mubr.f32.mxu1 %v5979_v0  ;;  %v4372_v30 = vpack.c.bf16 %v207_v3, %v199_v22  ;;  %v255_v59 = vld [vmem:[#allocation10 + $0x268] sm:$0xff]  ;;  %v4382_v61 = vpack.c.bf16 %v238_v55, %v230_v53  ;;  %v284_v1 = vld [vmem:[#allocation10 + $0x350] sm:$0xff]  ;;  %v246_v2 = vld [vmem:[#allocation10 + $0x220] sm:$0xff] }
  0xae   :  { %4331 = vmatpush1.bf16.msra.mxu0 %v4330_v62  ;;  %4341 = vmatprep.subr.bf16.mxu1 %v4340_v63  ;;  %v4360_v62 = vpack.c.bf16 %v285_v57, %v277_v56  ;;  %v276_v63 = vld [vmem:[#allocation10 + $0x310] sm:$0xff]  ;;  %v4384_v4 = vpack.c.bf16 %v255_v59, %v247_v58  ;;  %v293_v6 = vld [vmem:[#allocation10 + $0x398] sm:$0xff]  ;;  %v263_v8 = vld [vmem:[#allocation10 + $0x2a8] sm:$0xff] }
  0xaf   :  { %4333 = vmatprep.subr.bf16.mxu0 %v4332_v5  ;;  %v254_v5 = vld [vmem:[#allocation10 + $0x260] sm:$0xff]  ;;  %v301_v7 = vld [vmem:[#allocation10 + $0x3d8] sm:$0xff]  ;;  %v271_v9 = vld [vmem:[#allocation10 + $0x2e8] sm:$0xff]  ;;  %v4362_v10 = vpack.c.bf16 %v284_v1, %v276_v63 }
  0xb0   :  { %3495 = vmatmul.mubr.msk.f32.gmra.mrb[14].mxu1 %vm314_vm0, %v5454_v12  ;;  %v223_v12 = vld [vmem:[#allocation10 + $0x168] sm:$0xff]  ;;  %v300_v15 = vld [vmem:[#allocation10 + $0x3d0] sm:$0xff]  ;;  %v262_v16 = vld [vmem:[#allocation10 + $0x2a0] sm:$0xff] }
  0xb1   :  { %4343 = vmatpush1.bf16.msra.mxu1 %v4342_v11  ;;  %770 = vmatprep.mubr.f32.mxu1 %v5979_v0  ;;  %v4376_v42 = vpack.c.bf16 %v223_v12, %v215_v34  ;;  %v4386_v11 = vpack.c.bf16 %v254_v5, %v246_v2  ;;  %v270_v18 = vld [vmem:[#allocation10 + $0x2e0] sm:$0xff]  ;;  %v185_v19 = vld [vmem:[#allocation10 + $0x38] sm:$0xff]  ;;  %v279_v21 = vld [vmem:[#allocation10 + $0x328] sm:$0xff] }
  0xb2   :  { %4335 = vmatpush1.bf16.msra.mxu0 %v4334_v13  ;;  %4345 = vmatprep.subr.bf16.mxu1 %v4344_v14  ;;  %v4364_v13 = vpack.c.bf16 %v301_v7, %v293_v6  ;;  %v292_v14 = vld [vmem:[#allocation10 + $0x390] sm:$0xff]  ;;  %v193_v20 = vld [vmem:[#allocation10 + $0x78] sm:$0xff]  ;;  %v287_v22 = vld [vmem:[#allocation10 + $0x368] sm:$0xff] }
  0xb3   :  { %4369 = vmatprep.subr.bf16.mxu0 %v4368_v17  ;;  %v4388_v17 = vpack.c.bf16 %v271_v9, %v263_v8  ;;  %v4366_v3 = vpack.c.bf16 %v300_v15, %v292_v14  ;;  %v184_v26 = vld [vmem:[#allocation10 + $0x30] sm:$0xff]  ;;  %v278_v28 = vld [vmem:[#allocation10 + $0x320] sm:$0xff]  ;;  %v201_v31 = vld [vmem:[#allocation10 + $0xb8] sm:$0xff] }
  0xb4   :  { %v192_v27 = vld [vmem:[#allocation10 + $0x70] sm:$0xff]  ;;  %v209_v32 = vld [vmem:[#allocation10 + $0xf8] sm:$0xff]  ;;  %v295_v33 = vld [vmem:[#allocation10 + $0x3a8] sm:$0xff] }
  0xb5   :  { %694 = vmatmul.mubr.f32.vlgmr.msra.gmra.mrb[0].mxu0 %v5477_v23  ;;  %4347 = vmatpush1.bf16.msra.mxu1 %v4346_v24  ;;  %v4390_v24 = vpack.c.bf16 %v270_v18, %v262_v16  ;;  %v303_v34 = vld [vmem:[#allocation10 + $0x3e8] sm:$0xff]  ;;  %v4402_v12 = vpack.c.bf16 %v192_v27, %v184_v26  ;;  %v208_v39 = vld [vmem:[#allocation10 + $0xf0] sm:$0xff]  ;;  %v294_v40 = vld [vmem:[#allocation10 + $0x3a0] sm:$0xff] }
  0xb6   :  { %4371 = vmatpush1.bf16.msra.mxu0 %v4370_v25  ;;  %699 = vmatprep.mubr.f32.mxu0 %v5979_v0  ;;  %v4400_v25 = vpack.c.bf16 %v193_v20, %v185_v19  ;;  %v4396_v41 = vpack.c.bf16 %v303_v34, %v295_v33  ;;  %v217_v43 = vld [vmem:[#allocation10 + $0x138] sm:$0xff]  ;;  %v240_v55 = vld [vmem:[#allocation10 + $0x1f0] sm:$0xff]  ;;  %v147_v26 = vld [vmem:[#allocation7 + $0x18] sm:$0xff] }
  0xb7   :  { %4349 = vmatprep.subr.bf16.mxu1 %v4348_v29  ;;  %4373 = vmatprep.subr.bf16.mxu0 %v4372_v30  ;;  %v4392_v29 = vpack.c.bf16 %v287_v22, %v279_v21  ;;  %v286_v30 = vld [vmem:[#allocation10 + $0x360] sm:$0xff]  ;;  %v225_v44 = vld [vmem:[#allocation10 + $0x178] sm:$0xff]  ;;  %v272_v5 = vld [vmem:[#allocation10 + $0x2f0] sm:$0xff] }
  0xb8   :  { %v4408_v47 = vpack.c.bf16 %v225_v44, %v217_v43  ;;  %v241_v51 = vld [vmem:[#allocation10 + $0x1f8] sm:$0xff]  ;;  %v304_v18 = vld [vmem:[#allocation10 + $0x3f0] sm:$0xff] }
  0xb9   :  { %700 = vmatmul.mubr.f32.gmra.mrb[2].mxu0 %v5481_v35  ;;  %4351 = vmatpush1.bf16.msra.mxu1 %v4350_v36  ;;  %v4394_v36 = vpack.c.bf16 %v286_v30, %v278_v28  ;;  %v249_v56 = vld [vmem:[#allocation10 + $0x238] sm:$0xff]  ;;  %v144_v20 = vld [vmem:[#allocation7] sm:$0xff]  ;;  %v163_v28 = vld [vmem:[#allocation7 + $0x98] sm:$0xff] }
  0xba   :  { %4375 = vmatpush1.bf16.msra.mxu0 %v4374_v37  ;;  %4353 = vmatprep.subr.bf16.mxu1 %v4352_v38  ;;  %v4404_v37 = vpack.c.bf16 %v209_v32, %v201_v31  ;;  %v200_v38 = vld [vmem:[#allocation10 + $0xb0] sm:$0xff]  ;;  %v257_v57 = vld [vmem:[#allocation10 + $0x278] sm:$0xff] }
  0xbb   :  { %4377 = vmatprep.subr.bf16.mxu0 %v4376_v42  ;;  %847 = vmatprep.mubr.f32.mxu0 %v5979_v0  ;;  %v302_v42 = vld [vmem:[#allocation10 + $0x3e0] sm:$0xff]  ;;  %v4406_v45 = vpack.c.bf16 %v208_v39, %v200_v38  ;;  %v4416_v59 = vpack.c.bf16 %v257_v57, %v249_v56  ;;  %v273_v63 = vld [vmem:[#allocation10 + $0x2f8] sm:$0xff]  ;;  %v164_v33 = vld [vmem:[#allocation7 + $0xa0] sm:$0xff] }
  0xbc   :  { %v4398_v46 = vpack.c.bf16 %v302_v42, %v294_v40  ;;  %v281_v6 = vld [vmem:[#allocation10 + $0x338] sm:$0xff]  ;;  %v166_v39 = vld [vmem:[#allocation7 + $0xb0] sm:$0xff]  ;;  %v167_v40 = vld [vmem:[#allocation7 + $0xb8] sm:$0xff] }
  0xbd   :  { %4355 = vmatpush1.bf16.msra.mxu1 %v4354_v48  ;;  %v216_v48 = vld [vmem:[#allocation10 + $0x130] sm:$0xff]  ;;  %v289_v7 = vld [vmem:[#allocation10 + $0x378] sm:$0xff] }
  0xbe   :  { %4379 = vmatpush1.bf16.msra.mxu0 %v4378_v49  ;;  %4357 = vmatprep.subr.bf16.mxu1 %v4356_v50  ;;  %v224_v49 = vld [vmem:[#allocation10 + $0x170] sm:$0xff]  ;;  %v233_v50 = vld [vmem:[#allocation10 + $0x1b8] sm:$0xff]  ;;  %v4424_v9 = vpack.c.bf16 %v289_v7, %v281_v6 }
  0xbf   :  { %4381 = vmatprep.subr.bf16.mxu0 %v4380_v54  ;;  %v4410_v52 = vpack.c.bf16 %v224_v49, %v216_v48  ;;  %v4412_v53 = vpack.c.bf16 %v241_v51, %v233_v50  ;;  %v232_v54 = vld [vmem:[#allocation10 + $0x1b0] sm:$0xff]  ;;  %v305_v14 = vld [vmem:[#allocation10 + $0x3f8] sm:$0xff]  ;;  %v154_v48 = vld [vmem:[#allocation7 + $0x50] sm:$0xff] }
  0xc0   :  { %v4414_v58 = vpack.c.bf16 %v240_v55, %v232_v54  ;;  %v145_v21 = vld [vmem:[#allocation7 + $0x8] sm:$0xff]  ;;  %v152_v42 = vld [vmem:[#allocation7 + $0x40] sm:$0xff]  ;;  %v155_v49 = vld [vmem:[#allocation7 + $0x58] sm:$0xff] }
  0xc1   :  { %4359 = vmatpush1.bf16.msra.mxu1 %v4358_v60  ;;  %v248_v60 = vld [vmem:[#allocation10 + $0x230] sm:$0xff]  ;;  %v5496_v22 = vpack.c.bf16 %v145_v21, %v144_v20  ;;  %v149_v31 = vld [vmem:[#allocation7 + $0x28] sm:$0xff]  ;;  %v170_v50 = vld [vmem:[#allocation7 + $0xd0] sm:$0xff]  ;;  %v5536_v51 = vpack.c.bf16 %v155_v49, %v154_v48 }
  0xc2   :  { %4383 = vmatpush1.bf16.msra.mxu0 %v4382_v61  ;;  %4361 = vmatprep.subr.bf16.mxu1 %v4360_v62  ;;  %v256_v61 = vld [vmem:[#allocation10 + $0x270] sm:$0xff]  ;;  %v265_v62 = vld [vmem:[#allocation10 + $0x2b8] sm:$0xff] }
  0xc3   :  { %4385 = vmatprep.subr.bf16.mxu0 %v4384_v4  ;;  %v4418_v1 = vpack.c.bf16 %v256_v61, %v248_v60  ;;  %v4420_v2 = vpack.c.bf16 %v273_v63, %v265_v62  ;;  %v264_v4 = vld [vmem:[#allocation10 + $0x2b0] sm:$0xff]  ;;  %v165_v34 = vld [vmem:[#allocation7 + $0xa8] sm:$0xff]  ;;  %v158_v60 = vld [vmem:[#allocation7 + $0x70] sm:$0xff] }
  0xc4   :  { %v4422_v8 = vpack.c.bf16 %v272_v5, %v264_v4  ;;  %v153_v43 = vld [vmem:[#allocation7 + $0x48] sm:$0xff]  ;;  %v172_v57 = vld [vmem:[#allocation7 + $0xe0] sm:$0xff]  ;;  %v159_v61 = vld [vmem:[#allocation7 + $0x78] sm:$0xff] }
  0xc5   :  { %4363 = vmatpush1.bf16.msra.mxu1 %v4362_v10  ;;  %v280_v10 = vld [vmem:[#allocation10 + $0x330] sm:$0xff]  ;;  %v5528_v44 = vpack.c.bf16 %v153_v43, %v152_v42  ;;  %v157_v54 = vld [vmem:[#allocation7 + $0x68] sm:$0xff]  ;;  %v5552_v62 = vpack.c.bf16 %v159_v61, %v158_v60  ;;  %v174_v63 = vld [vmem:[#allocation7 + $0xf0] sm:$0xff] }
  0xc6   :  { %4387 = vmatpush1.bf16.msra.mxu0 %v4386_v11  ;;  %4365 = vmatprep.subr.bf16.mxu1 %v4364_v13  ;;  %v288_v11 = vld [vmem:[#allocation10 + $0x370] sm:$0xff]  ;;  %v297_v13 = vld [vmem:[#allocation10 + $0x3b8] sm:$0xff] }
  0xc7   :  { %4389 = vmatprep.subr.bf16.mxu0 %v4388_v17  ;;  %v4426_v15 = vpack.c.bf16 %v288_v11, %v280_v10  ;;  %v4428_v16 = vpack.c.bf16 %v305_v14, %v297_v13  ;;  %v296_v17 = vld [vmem:[#allocation10 + $0x3b0] sm:$0xff] }
  0xc8   :  { %v4430_v19 = vpack.c.bf16 %v304_v18, %v296_v17 }
  0xc9   :  { %4367 = vmatpush1.bf16.msra.mxu1 %v4366_v3  ;;  %v160_v3 = vld [vmem:[#allocation7 + $0x80] sm:$0xff] }
  0xca   :  { %4391 = vmatpush1.bf16.msra.mxu0 %v4390_v24  ;;  %4401 = vmatprep.subr.bf16.mxu1 %v4400_v25  ;;  %v161_v24 = vld [vmem:[#allocation7 + $0x88] sm:$0xff] }
  0xcb   :  { %4393 = vmatprep.subr.bf16.mxu0 %v4392_v29  ;;  %v5500_v25 = vpack.c.bf16 %v161_v24, %v160_v3  ;;  %v148_v29 = vld [vmem:[#allocation7 + $0x20] sm:$0xff] }
  0xcc   :  { %771 = vmatmul.mubr.f32.vlgmr.msra.gmra.mrb[4].mxu1 %v5477_v23  ;;  %v5509_v32 = vpack.c.bf16 %v149_v31, %v148_v29 }
  0xcd   :  { %4403 = vmatpush1.bf16.msra.mxu1 %v4402_v12  ;;  %776 = vmatprep.mubr.f32.mxu1 %v5979_v0  ;;  %v5516_v12 = vpack.c.bf16 %v165_v34, %v164_v33 }
  0xce   :  { %4395 = vmatpush1.bf16.msra.mxu0 %v4394_v36  ;;  %4405 = vmatprep.subr.bf16.mxu1 %v4404_v37  ;;  %v150_v36 = vld [vmem:[#allocation7 + $0x30] sm:$0xff]  ;;  %v151_v37 = vld [vmem:[#allocation7 + $0x38] sm:$0xff] }
  0xcf   :  { %4397 = vmatprep.subr.bf16.mxu0 %v4396_v41  ;;  %v5520_v38 = vpack.c.bf16 %v151_v37, %v150_v36  ;;  %v5524_v41 = vpack.c.bf16 %v167_v40, %v166_v39 }
  0xd0   :  { %777 = vmatmul.mubr.f32.gmra.mrb[6].mxu1 %v5481_v35 }
  0xd1   :  { %4407 = vmatpush1.bf16.msra.mxu1 %v4406_v45  ;;  %924 = vmatprep.mubr.f32.mxu1 %v5979_v0  ;;  %v168_v45 = vld [vmem:[#allocation7 + $0xc0] sm:$0xff] }
  0xd2   :  { %4399 = vmatpush1.bf16.msra.mxu0 %v4398_v46  ;;  %4409 = vmatprep.subr.bf16.mxu1 %v4408_v47  ;;  %v169_v46 = vld [vmem:[#allocation7 + $0xc8] sm:$0xff] }
  0xd3   :  { %4433 = vmatprep.subr.bf16.mxu0 %v5496_v22  ;;  %v5532_v47 = vpack.c.bf16 %v169_v46, %v168_v45 }
  0xd5   :  { %848 = vmatmul.mubr.f32.vlgmr.msra.gmra.mrb[4].mxu0 %v5477_v23  ;;  %4411 = vmatpush1.bf16.msra.mxu1 %v4410_v52  ;;  %v171_v52 = vld [vmem:[#allocation7 + $0xd8] sm:$0xff] }
  0xd6   :  { %853 = vmatprep.mubr.f32.mxu0 %v5979_v0  ;;  %4413 = vmatprep.subr.bf16.mxu1 %v4412_v53  ;;  %v156_v53 = vld [vmem:[#allocation7 + $0x60] sm:$0xff]  ;;  %v5538_v55 = vpack.c.bf16 %v171_v52, %v170_v50 }
  0xd7   :  { %v5540_v56 = vpack.c.bf16 %v157_v54, %v156_v53 }
  0xd9   :  { %854 = vmatmul.mubr.f32.gmra.mrb[6].mxu0 %v5481_v35  ;;  %4415 = vmatpush1.bf16.msra.mxu1 %v4414_v58  ;;  %v173_v58 = vld [vmem:[#allocation7 + $0xe8] sm:$0xff] }
  0xda   :  { %4417 = vmatprep.subr.bf16.mxu1 %v4416_v59  ;;  %v5548_v59 = vpack.c.bf16 %v173_v58, %v172_v57 }
  0xdb   :  { %4435 = vmatpush3.bf16.xpose.msra.mxu0 %v5496_v22 }
  0xdd   :  { %4419 = vmatpush1.bf16.msra.mxu1 %v4418_v1  ;;  %v175_v1 = vld [vmem:[#allocation7 + $0xf8] sm:$0xff] }
  0xde   :  { %4421 = vmatprep.subr.bf16.mxu1 %v4420_v2  ;;  %v5556_v2 = vpack.c.bf16 %v175_v1, %v174_v63 }
  0xe1   :  { %4423 = vmatpush1.bf16.msra.mxu1 %v4422_v8 }
  0xe2   :  { %4425 = vmatprep.subr.bf16.mxu1 %v4424_v9 }
  0xe5   :  { %4427 = vmatpush1.bf16.msra.mxu1 %v4426_v15 }
  0xe6   :  { %4429 = vmatprep.subr.bf16.mxu1 %v4428_v16 }
  0xe9   :  { %4431 = vmatpush1.bf16.msra.mxu1 %v4430_v19 }
  0xea   :  { %4465 = vmatprep.subr.bf16.mxu1 %v5500_v25 }
  0xec   :  { %925 = vmatmul.mubr.f32.vlgmr.msra.gmra.mrb[12].mxu1 %v5477_v23  ;;  %v146_v23 = vld [vmem:[#allocation7 + $0x10] sm:$0xff] }
  0xed   :  { %930 = vmatprep.mubr.f32.mxu1 %v5979_v0  ;;  %v5504_v27 = vpack.c.bf16 %v147_v26, %v146_v23  ;;  %v5252_v26 = vmov 1966171168  }
  0xef   :  { %4437 = vmatprep.subr.bf16.mxu0 %v5504_v27 }
  0xf0   :  { %931 = vmatmul.mubr.f32.gmra.mrb[14].mxu1 %v5481_v35  ;;  %v162_v35 = vld [vmem:[#allocation7 + $0x90] sm:$0xff]  ;;  %4439 = vmatpush3.bf16.xpose.msra.mxu0 %v5504_v27 }
  0xf1   :  { %v5506_v30 = vpack.c.bf16 %v163_v28, %v162_v35  ;;  %4441 = vmatprep.subr.bf16.mxu0 %v5509_v32  ;;  %v962_v35 = vunpack.c.l.s4 %v5252_v26  ;;  %v964_v28 = vlaneseq }
  0xf2   :  { %4467 = vmatpush3.bf16.xpose.msra.mxu1 %v5500_v25 }
  0xf3   :  { %4469 = vmatprep.subr.bf16.mxu1 %v5506_v30  ;;  %v963_v29 = vunpack.c.0.s8 %v962_v35  ;;  %v5562_v31 = vshrl.u32 %v964_v28, 7 }
  0xf5   :  { %v5565_v33 = vsub.s32 %v963_v29, %v5562_v31 }
  0xf8   :  { %4443 = vmatpush3.bf16.xpose.msra.mxu0 %v5509_v32 }
  0xf9   :  { %4445 = vmatprep.subr.bf16.mxu0 %v5520_v38 }
  0xfa   :  { %4471 = vmatpush3.bf16.xpose.msra.mxu1 %v5506_v30 }
  0xfb   :  { %4473 = vmatprep.subr.bf16.mxu1 %v5516_v12 }
 0x100   :  { %4447 = vmatpush3.bf16.xpose.msra.mxu0 %v5520_v38 }
 0x101   :  { %4449 = vmatprep.subr.bf16.mxu0 %v5528_v44 }
 0x102   :  { %4475 = vmatpush3.bf16.xpose.msra.mxu1 %v5516_v12 }
 0x103   :  { %4477 = vmatprep.subr.bf16.mxu1 %v5524_v41 }
 0x108   :  { %4451 = vmatpush3.bf16.xpose.msra.mxu0 %v5528_v44 }
 0x109   :  { %4453 = vmatprep.subr.bf16.mxu0 %v5536_v51 }
 0x10a   :  { %4479 = vmatpush3.bf16.xpose.msra.mxu1 %v5524_v41 }
 0x10b   :  { %4481 = vmatprep.subr.bf16.mxu1 %v5532_v47 }
 0x110   :  { %4455 = vmatpush3.bf16.xpose.msra.mxu0 %v5536_v51 }
 0x111   :  { %4457 = vmatprep.subr.bf16.mxu0 %v5540_v56 }
 0x112   :  { %4483 = vmatpush3.bf16.xpose.msra.mxu1 %v5532_v47 }
 0x113   :  { %4485 = vmatprep.subr.bf16.mxu1 %v5538_v55 }
 0x118   :  { %4459 = vmatpush3.bf16.xpose.msra.mxu0 %v5540_v56 }
 0x119   :  { %4461 = vmatprep.subr.bf16.mxu0 %v5552_v62 }
 0x11a   :  { %4487 = vmatpush3.bf16.xpose.msra.mxu1 %v5538_v55 }
 0x11b   :  { %4489 = vmatprep.subr.bf16.mxu1 %v5548_v59 }
 0x120   :  { %4463 = vmatpush3.bf16.xpose.msra.mxu0 %v5552_v62 }
 0x121   :  { %4497 = vmatprep.subr.bf16.mxu0 %v5496_v22 }
 0x122   :  { %4491 = vmatpush3.bf16.xpose.msra.mxu1 %v5548_v59 }
 0x123   :  { %4493 = vmatprep.subr.bf16.mxu1 %v5556_v2 }
 0x12a   :  { %4495 = vmatpush3.bf16.xpose.msra.mxu1 %v5556_v2 }
 0x12b   :  { %4529 = vmatprep.subr.bf16.mxu1 %v5500_v25 }
 0x167   :  { %v387_v4 = vpop.f32.mrb[0].mxu1 }
 0x168   :  { %v389_v5 = vpop.f32.mrb[1].mxu1 }
 0x16b   :  { %v393_v6 = vpop.f32.mrb[2].mxu1 }
 0x16c   :  { %v395_v7 = vpop.f32.mrb[3].mxu1 }
 0x177   :  { %v541_v8 = vpop.f32.mrb[8].mxu1 }
 0x178   :  { %v543_v9 = vpop.f32.mrb[9].mxu1 }
 0x17b   :  { %v547_v10 = vpop.f32.mrb[10].mxu1 }
 0x17c   :  { %v549_v11 = vpop.f32.mrb[11].mxu1 }
 0x188   :  { %v695_v13 = vpop.f32.mrb[0].mxu0 }
 0x189   :  { %v696_v14 = vadd.f32 %v695_v13, %v387_v4  ;;  %v697_v15 = vpop.f32.mrb[1].mxu0 }
 0x18a   :  { %v698_v16 = vadd.f32 %v697_v15, %v389_v5 }
 0x18c   :  { %v953_v17 = vcombine.low %v696_v14, %v698_v16  ;;  %v954_v18 = vcombine.high %v696_v14, %v698_v16  ;;  %v701_v19 = vpop.f32.mrb[2].mxu0 }
 0x18d   :  { %v702_v20 = vadd.f32 %v701_v19, %v393_v6  ;;  %v703_v21 = vpop.f32.mrb[3].mxu0 }
 0x18e   :  { %v704_v3 = vadd.f32 %v703_v21, %v395_v7  ;;  %v967_v40 = vrot.slane %v953_v17, %v5565_v33  ;;  %v974_v42 = vrot.slane %v954_v18, %v5565_v33 }
 0x190   :  { %v1089_v24 = vcombine.low %v702_v20, %v704_v3  ;;  %v1090_v23 = vcombine.high %v702_v20, %v704_v3 }
 0x192   :  { %v1103_v58 = vrot.slane %v1089_v24, %v5565_v33  ;;  %v5573_v60 = vrot.slane %v1090_v23, %v5565_v33 }
 0x19f   :  { %v772_v34 = vpop.f32.mrb[4].mxu1 }
 0x1a0   :  { %v774_v36 = vpop.f32.mrb[5].mxu1 }
 0x1a1   :  { %v955_v37 = vcombine.low %v772_v34, %v774_v36  ;;  %v956_v39 = vcombine.high %v772_v34, %v774_v36 }
 0x1a3   :  { %v981_v43 = vrot.slane %v955_v37, %v5565_v33  ;;  %v988_v45 = vrot.slane %v956_v39, %v5565_v33  ;;  %v778_v46 = vpop.f32.mrb[6].mxu1 }
 0x1a4   :  { %v780_v48 = vpop.f32.mrb[7].mxu1 }
 0x1a5   :  { %v1017_v49 = vcombine.low %v967_v40, %v981_v43  ;;  %v1018_v50 = vcombine.high %v967_v40, %v981_v43  ;;  %v1019_v52 = vcombine.low %v974_v42, %v988_v45  ;;  %v1020_v53 = vcombine.high %v974_v42, %v988_v45 }
 0x1a6   :  { %v1091_v54 = vcombine.low %v778_v46, %v780_v48  ;;  %v1092_v57 = vcombine.high %v778_v46, %v780_v48 }
 0x1a7   :  { %v1045_v37 = vrot.slane %v1018_v50, %v5565_v33  ;;  %v1038_v39 = vrot.slane %v1019_v52, %v5565_v33  ;;  %v5591_v40 = vrot.slane %v1020_v53, %v5565_v33 }
 0x1a8   :  { %v1117_v61 = vrot.slane %v1091_v54, %v5565_v33  ;;  %v5577_v63 = vrot.slane %v1092_v57, %v5565_v33  ;;  %v849_v1 = vpop.f32.mrb[4].mxu0 }
 0x1a9   :  { %v850_v4 = vadd.f32 %v849_v1, %v541_v8  ;;  %v851_v5 = vpop.f32.mrb[5].mxu0 }
 0x1aa   :  { %v1153_v6 = vcombine.low %v1103_v58, %v1117_v61  ;;  %v1154_v7 = vcombine.high %v1103_v58, %v1117_v61  ;;  %v1155_v13 = vcombine.low %v5573_v60, %v5577_v63  ;;  %v1156_v14 = vcombine.high %v5573_v60, %v5577_v63 }
 0x1ab   :  { %v852_v15 = vadd.f32 %v851_v5, %v543_v9 }
 0x1ac   :  { %v855_v16 = vpop.f32.mrb[6].mxu0  ;;  %v1181_v48 = vrot.slane %v1154_v7, %v5565_v33  ;;  %v1167_v58 = vrot.slane %v1153_v6, %v5565_v33 }
 0x1ad   :  { %v957_v17 = vcombine.low %v850_v4, %v852_v15  ;;  %v958_v18 = vcombine.high %v850_v4, %v852_v15  ;;  %v856_v19 = vadd.f32 %v855_v16, %v547_v10  ;;  %v857_v20 = vpop.f32.mrb[7].mxu0 }
 0x1ae   :  { %v858_v21 = vadd.f32 %v857_v20, %v549_v11  ;;  %v1031_v11 = vrot.slane %v1017_v49, %v5565_v33 }
 0x1af   :  { %v995_v28 = vrot.slane %v957_v17, %v5565_v33  ;;  %v1002_v29 = vrot.slane %v958_v18, %v5565_v33 }
 0x1b0   :  { %v1093_v3 = vcombine.low %v856_v19, %v858_v21  ;;  %v1094_v24 = vcombine.high %v856_v19, %v858_v21 }
 0x1b2   :  { %v1131_v53 = vrot.slane %v1093_v3, %v5565_v33  ;;  %v1138_v61 = vrot.slane %v1094_v24, %v5565_v33 }
 0x1bf   :  { %v926_v23 = vpop.f32.mrb[12].mxu1 }
 0x1c0   :  { %v928_v8 = vpop.f32.mrb[13].mxu1 }
 0x1c1   :  { %v959_v26 = vcombine.low %v926_v23, %v928_v8  ;;  %v960_v35 = vcombine.high %v926_v23, %v928_v8 }
 0x1c3   :  { %v1009_v34 = vrot.slane %v959_v26, %v5565_v33  ;;  %v1016_v9 = vrot.slane %v960_v35, %v5565_v33  ;;  %v932_v36 = vpop.f32.mrb[14].mxu1  ;;  %v1174_v35 = vrot.slane %v1155_v13, %v5565_v33  ;;  %v176_v13 = vld [vmem:[#allocation8] sm:$0xff] }
 0x1c4   :  { %v934_v10 = vpop.f32.mrb[15].mxu1 }
 0x1c5   :  { %v1021_v42 = vcombine.low %v995_v28, %v1009_v34  ;;  %v1022_v43 = vcombine.high %v995_v28, %v1009_v34  ;;  %v1023_v45 = vcombine.low %v1002_v29, %v1016_v9  ;;  %v1024_v46 = vcombine.high %v1002_v29, %v1016_v9 }
 0x1c6   :  { %v1095_v54 = vcombine.low %v932_v36, %v934_v10  ;;  %v1096_v57 = vcombine.high %v932_v36, %v934_v10  ;;  %v1188_v28 = vrot.slane %v1156_v14, %v5565_v33  ;;  %v1476_v14 = vrot.slane %v176_v13, %v5565_v33 }
 0x1c7   :  { %v1073_v50 = vrot.slane %v1022_v43, %v5565_v33  ;;  %v1059_v60 = vrot.slane %v1021_v42, %v5565_v33  ;;  %v1066_v49 = vrot.slane %v1023_v45, %v5565_v33  ;;  %v1080_v52 = vrot.slane %v1024_v46, %v5565_v33 }
 0x1c8   :  { %v1145_v63 = vrot.slane %v1095_v54, %v5565_v33  ;;  %v1152_v1 = vrot.slane %v1096_v57, %v5565_v33  ;;  %v1492_v42 = vrot.slane %v1476_v14, %v5565_v33  ;;  %v5644_v43 = vsub.s32 0, %v5562_v31 }
 0x1c9   :  { %v1085_v4 = vcombine.low %v1045_v37, %v1073_v50  ;;  %v1081_v5 = vcombine.low %v1031_v11, %v1059_v60  ;;  %v1082_v7 = vcombine.high %v1031_v11, %v1059_v60  ;;  %v1086_v6 = vcombine.high %v1045_v37, %v1073_v50 }
 0x1ca   :  { %v1157_v15 = vcombine.low %v1131_v53, %v1145_v63  ;;  %v1158_v16 = vcombine.high %v1131_v53, %v1145_v63  ;;  %v1159_v17 = vcombine.low %v1138_v61, %v1152_v1  ;;  %v1160_v18 = vcombine.high %v1138_v61, %v1152_v1  ;;  %v177_v61 = vld [vmem:[#allocation8 + $0x8] sm:$0xff] }
 0x1cb   :  { %3915 = vmatprep.mubr.f32.mxu0 %v1081_v5  ;;  %v1083_v19 = vcombine.low %v1038_v39, %v1066_v49  ;;  %v1087_v20 = vcombine.low %v5591_v40, %v1080_v52  ;;  %v1084_v21 = vcombine.high %v1038_v39, %v1066_v49  ;;  %v1088_v3 = vcombine.high %v5591_v40, %v1080_v52 }
 0x1cc   :  { %v1209_v24 = vrot.slane %v1158_v16, %v5565_v33  ;;  %3916 = vmatmul.mubr.f32.vlgmr.msra.gmra.mrb[8].mxu0 %v1085_v4  ;;  %v1195_v23 = vrot.slane %v1157_v15, %v5565_v33  ;;  %v1202_v8 = vrot.slane %v1159_v17, %v5565_v33  ;;  %v1216_v26 = vrot.slane %v1160_v18, %v5565_v33 }
 0x1cd   :  { %3918 = vmatprep.mubr.f32.mxu0 %v1082_v7  ;;  %4499 = vmatpush3.bf16.msra.mxu0 %v5496_v22  ;;  %v1469_v40 = vcombine.high %v176_v13, %v176_v13  ;;  %v1484_v45 = vcombine.high %v1476_v14, %v1476_v14  ;;  %v1570_v54 = vrot.slane %v1492_v42, %v5644_v43 }
 0x1ce   :  { %v1221_v29 = vcombine.low %v1181_v48, %v1209_v24  ;;  %v1217_v34 = vcombine.low %v1167_v58, %v1195_v23  ;;  %v1218_v9 = vcombine.high %v1167_v58, %v1195_v23  ;;  %v1222_v36 = vcombine.high %v1181_v48, %v1209_v24  ;;  %4501 = vmatprep.subr.bf16.mxu0 %v5504_v27 }
 0x1cf   :  { %v1219_v37 = vcombine.low %v1174_v35, %v1202_v8  ;;  %v1223_v10 = vcombine.low %v1188_v28, %v1216_v26  ;;  %v1220_v11 = vcombine.high %v1174_v35, %v1202_v8  ;;  %v1224_v39 = vcombine.high %v1188_v28, %v1216_v26 }
 0x1d0   :  { %3959 = vmatprep.mubr.f32.mxu1 %v1217_v34  ;;  %3919 = vmatmul.mubr.f32.gmra.mrb[10].mxu0 %v1086_v6  ;;  %v1483_v46 = vrot.slane %v1469_v40, %v5565_v33  ;;  %v1506_v57 = vrot.slane %v1484_v45, %v5565_v33  ;;  %v1514_v58 = vcombine.high %v1492_v42, %v1492_v42 }
 0x1d1   :  { %3960 = vmatmul.mubr.f32.vlgmr.msra.gmra.mrb[16].mxu1 %v1221_v29  ;;  %3921 = vmatprep.mubr.f32.mxu0 %v1083_v19  ;;  %v1525_v17 = vrot.slane %v177_v61, %v5565_v33 }
 0x1d2   :  { %3962 = vmatprep.mubr.f32.mxu1 %v1218_v9  ;;  %4503 = vmatpush3.bf16.msra.mxu0 %v5504_v27  ;;  %v1516_v49 = vcombine.high %v1506_v57, %v1506_v57  ;;  %v1499_v52 = vrot.slane %v1483_v46, %v5565_v33  ;;  %v1485_v53 = vcombine.high %v1483_v46, %v1483_v46 }
 0x1d3   :  { %4505 = vmatprep.subr.bf16.mxu0 %v5509_v32  ;;  %4531 = vmatpush3.bf16.msra.mxu1 %v5500_v25  ;;  %v1574_v4 = vrot.slane %v1506_v57, %v5644_v43  ;;  %v1578_v5 = vrot.slane %v1514_v58, %v5644_v43  ;;  %v1533_v34 = vcombine.high %v1525_v17, %v1525_v17 }
 0x1d4   :  { %3922 = vmatmul.mubr.f32.gmra.mrb[12].mxu0 %v1087_v20  ;;  %4533 = vmatprep.subr.bf16.mxu1 %v5506_v30  ;;  %v1582_v18 = vrot.slane %v1516_v49, %v5644_v43  ;;  %v1586_v19 = vrot.slane %v1499_v52, %v5644_v43  ;;  %v1513_v20 = vrot.slane %v1485_v53, %v5565_v33 }
 0x1d5   :  { %3963 = vmatmul.mubr.f32.gmra.mrb[18].mxu1 %v1222_v36  ;;  %3924 = vmatprep.mubr.f32.mxu0 %v1084_v21  ;;  %v1515_v8 = vcombine.high %v1499_v52, %v1499_v52 }
 0x1d6   :  { %3965 = vmatprep.mubr.f32.mxu1 %v1219_v37  ;;  %4507 = vmatpush3.bf16.msra.mxu0 %v5509_v32  ;;  %v1590_v9 = vrot.slane %v1513_v20, %v5644_v43  ;;  %v1517_v36 = vcombine.high %v1513_v20, %v1513_v20  ;;  %v1541_v37 = vrot.slane %v1525_v17, %v5565_v33 }
 0x1d7   :  { %4509 = vmatprep.subr.bf16.mxu0 %v5520_v38  ;;  %4535 = vmatpush3.bf16.msra.mxu1 %v5506_v30  ;;  %v1594_v40 = vrot.slane %v1515_v8, %v5644_v43 }
 0x1d8   :  { %3925 = vmatmul.mubr.f32.gmra.mrb[14].mxu0 %v1088_v3  ;;  %4537 = vmatprep.subr.bf16.mxu1 %v5516_v12  ;;  %v1598_v57 = vrot.slane %v1517_v36, %v5644_v43  ;;  %v1602_v58 = vrot.slane %v1541_v37, %v5644_v43 }
 0x1d9   :  { %3966 = vmatmul.mubr.f32.gmra.mrb[20].mxu1 %v1223_v10  ;;  %v1518_v10 = vcombine.high %v177_v61, %v177_v61 }
 0x1da   :  { %3968 = vmatprep.mubr.f32.mxu1 %v1220_v11  ;;  %4511 = vmatpush3.bf16.msra.mxu0 %v5520_v38 }
 0x1db   :  { %4513 = vmatprep.subr.bf16.mxu0 %v5528_v44  ;;  %4539 = vmatpush3.bf16.msra.mxu1 %v5516_v12 }
 0x1dc   :  { %4541 = vmatprep.subr.bf16.mxu1 %v5524_v41 }
 0x1dd   :  { %3969 = vmatmul.mubr.f32.gmra.mrb[22].mxu1 %v1224_v39 }
 0x1de   :  { %4515 = vmatpush3.bf16.msra.mxu0 %v5528_v44 }
 0x1df   :  { %4517 = vmatprep.subr.bf16.mxu0 %v5536_v51  ;;  %4543 = vmatpush3.bf16.msra.mxu1 %v5524_v41 }
 0x1e0   :  { %4545 = vmatprep.subr.bf16.mxu1 %v5532_v47 }
 0x1e2   :  { %4519 = vmatpush3.bf16.msra.mxu0 %v5536_v51 }
 0x1e3   :  { %4521 = vmatprep.subr.bf16.mxu0 %v5540_v56  ;;  %4547 = vmatpush3.bf16.msra.mxu1 %v5532_v47 }
 0x1e4   :  { %4549 = vmatprep.subr.bf16.mxu1 %v5538_v55 }
 0x1e6   :  { %4523 = vmatpush3.bf16.msra.mxu0 %v5540_v56 }
 0x1e7   :  { %4525 = vmatprep.subr.bf16.mxu0 %v5552_v62  ;;  %4551 = vmatpush3.bf16.msra.mxu1 %v5538_v55 }
 0x1e8   :  { %4553 = vmatprep.subr.bf16.mxu1 %v5548_v59 }
 0x1ea   :  { %4527 = vmatpush3.bf16.msra.mxu0 %v5552_v62 }
 0x1eb   :  { %4555 = vmatpush3.bf16.msra.mxu1 %v5548_v59 }
 0x1ec   :  { %4557 = vmatprep.subr.bf16.mxu1 %v5556_v2 }
 0x1ef   :  { %4559 = vmatpush3.bf16.msra.mxu1 %v5556_v2 }
 0x29f   :  { %v3917_v48 = vpop.f32.mrb[8].mxu0 }
 0x2a0   :  { %v1307_v50 = vpop.f32.mrb[9].mxu0  ;;  %v1452_v63 = vmul.f32 0.25, %v3917_v48 }
 0x2a1   :  { %v1451_v60 = vmul.f32 0.25, %v1307_v50  ;;  %v1563_v50 = vcombine.high %v1541_v37, %v1541_v37 }
 0x2a2   :  { %v5659_v24 = vadd.f32 %v1574_v4, %v1452_v63 }
 0x2a3   :  { %v3920_v1 = vpop.f32.mrb[10].mxu0  ;;  %v5650_v31 = vadd.f32 %v1570_v54, %v1451_v60  ;;  %v1555_v54 = vrot.slane %v1533_v34, %v5565_v33  ;;  %v1532_v60 = vrot.slane %v1518_v10, %v5565_v33 }
 0x2a4   :  { %v3961_v7 = vpop.f32.mrb[16].mxu1  ;;  %v1317_v6 = vpop.f32.mrb[11].mxu0  ;;  %v1454_v21 = vmul.f32 0.25, %v3920_v1 }
 0x2a5   :  { %v1453_v15 = vmul.f32 0.25, %v1317_v6  ;;  %v1412_v16 = vpop.f32.mrb[17].mxu1  ;;  %1663 = vmax.xlane.f32.xlu0 %v5650_v31  ;;  %v1606_v4 = vrot.slane %v1555_v54, %v5644_v43  ;;  %v1565_v6 = vcombine.high %v1555_v54, %v1555_v54  ;;  %v1534_v17 = vcombine.high %v1532_v60, %v1532_v60 }
 0x2a6   :  { %v5667_v13 = vadd.f32 %v1582_v18, %v1454_v21  ;;  %v1459_v49 = vmul.f32 0.25, %v1412_v16  ;;  %v1460_v16 = vmul.f32 0.25, %v3961_v7 }
 0x2a7   :  { %v3923_v3 = vpop.f32.mrb[12].mxu0  ;;  %v5661_v23 = vadd.f32 %v1578_v5, %v1453_v15  ;;  %v1610_v5 = vrot.slane %v1563_v50, %v5644_v43  ;;  %v1548_v15 = vrot.slane %v1532_v60, %v5565_v33  ;;  %v1614_v21 = vrot.slane %v1565_v6, %v5644_v43 }
 0x2a8   :  { %v3964_v26 = vpop.f32.mrb[18].mxu1  ;;  %v1327_v35 = vpop.f32.mrb[13].mxu0  ;;  %v1456_v11 = vmul.f32 0.25, %v3923_v3  ;;  %v5689_v20 = vadd.f32 %v1602_v58, %v1459_v49  ;;  %v1562_v8 = vrot.slane %v1534_v17, %v5565_v33 }
 0x2a9   :  { %v1455_v28 = vmul.f32 0.25, %v1327_v35  ;;  %v1422_v29 = vpop.f32.mrb[19].mxu1  ;;  %1665 = vmax.xlane.f32.xlu0 %v5659_v24  ;;  %1667 = vmax.xlane.f32.xlu1 %v5661_v23  ;;  %v1618_v3 = vrot.slane %v1548_v15, %v5644_v43  ;;  %v1564_v35 = vcombine.high %v1548_v15, %v1548_v15 }
 0x2aa   :  { %v5678_v53 = vadd.f32 %v1590_v9, %v1456_v11  ;;  %v1461_v18 = vmul.f32 0.25, %v1422_v29  ;;  %v5696_v9 = vadd.f32 %v1606_v4, %v1460_v16  ;;  %v1622_v29 = vrot.slane %v1562_v8, %v5644_v43 }
 0x2ab   :  { %v3926_v39 = vpop.f32.mrb[14].mxu0  ;;  %v5669_v14 = vadd.f32 %v1586_v19, %v1455_v28  ;;  %v1462_v28 = vmul.f32 0.25, %v3964_v26  ;;  %v1626_v36 = vrot.slane %v1564_v35, %v5644_v43  ;;  %v1566_v37 = vcombine.high %v1562_v8, %v1562_v8 }
 0x2ac   :  { %v3967_v42 = vpop.f32.mrb[20].mxu1  ;;  %v1337_v45 = vpop.f32.mrb[15].mxu0  ;;  %v1458_v52 = vmul.f32 0.25, %v3926_v39  ;;  %v5698_v7 = vadd.f32 %v1610_v5, %v1461_v18 }
 0x2ad   :  { %v1457_v46 = vmul.f32 0.25, %v1337_v45  ;;  %v1432_v48 = vpop.f32.mrb[21].mxu1  ;;  %1669 = vmax.xlane.f32.xlu1 %v5667_v13  ;;  %1671 = vmax.xlane.f32.xlu0 %v5669_v14  ;;  %v1464_v10 = vmul.f32 0.25, %v3967_v42  ;;  %v5704_v39 = vadd.f32 %v1614_v21, %v1462_v28 }
 0x2ae   :  { %v5687_v19 = vadd.f32 %v1598_v57, %v1458_v52  ;;  %v1463_v34 = vmul.f32 0.25, %v1432_v48  ;;  %v1630_v48 = vrot.slane %v1566_v37, %v5644_v43 }
 0x2af   :  { %v5680_v61 = vadd.f32 %v1594_v40, %v1457_v46  ;;  %v5710_v45 = vadd.f32 %v1622_v29, %v1464_v10 }
 0x2b0   :  { %v3970_v63 = vpop.f32.mrb[22].mxu1  ;;  %v5706_v40 = vadd.f32 %v1618_v3, %v1463_v34 }
 0x2b1   :  { %v1442_v1 = vpop.f32.mrb[23].mxu1  ;;  %1673 = vmax.xlane.f32.xlu1 %v5678_v53  ;;  %1675 = vmax.xlane.f32.xlu0 %v5680_v61  ;;  %v1466_v26 = vmul.f32 0.25, %v3970_v63 }
 0x2b2   :  { %v1465_v11 = vmul.f32 0.25, %v1442_v1 }
 0x2b3   :  { %v5717_v42 = vadd.f32 %v1630_v48, %v1466_v26 }
 0x2b4   :  { %v5712_v46 = vadd.f32 %v1626_v36, %v1465_v11 }
 0x2b5   :  { %1677 = vmax.xlane.f32.xlu1 %v5687_v19  ;;  %1679 = vmax.xlane.f32.xlu0 %v5689_v20 }
 0x2b9   :  { %1681 = vmax.xlane.f32.xlu1 %v5696_v9  ;;  %1683 = vmax.xlane.f32.xlu0 %v5698_v7 }
 0x2bd   :  { %1685 = vmax.xlane.f32.xlu1 %v5704_v39  ;;  %1687 = vmax.xlane.f32.xlu0 %v5706_v40 }
 0x2c1   :  { %1689 = vmax.xlane.f32.xlu1 %v5710_v45  ;;  %1691 = vmax.xlane.f32.xlu0 %v5712_v46 }
 0x2c5   :  { %1693 = vmax.xlane.f32.xlu1 %v5717_v42 }
 0x332   :  { %v1664_v54 = vpop.xlane.xlu0 %1663 }
 0x333   :  { %v1695_v57 = vsub.f32 %v5650_v31, %v1664_v54 }
 0x335   :  { %v1711_v58 = vmul.f32 1.442695, %v1695_v57 }
 0x336   :  { %v1666_v50 = vpop.xlane.xlu0 %1665  ;;  %v1668_v60 = vpop.xlane.xlu1 %1667 }
 0x337   :  { %4931 = vpow2.f32 %v1711_v58  ;;  %v1696_v49 = vsub.f32 %v5659_v24, %v1666_v50  ;;  %v1697_v52 = vsub.f32 %v5661_v23, %v1668_v60 }
 0x339   :  { %v1713_v43 = vmul.f32 1.442695, %v1696_v49  ;;  %v1715_v63 = vmul.f32 1.442695, %v1697_v52 }
 0x33a   :  { %v1670_v1 = vpop.xlane.xlu1 %1669  ;;  %v1672_v4 = vpop.xlane.xlu0 %1671 }
 0x33b   :  { %4933 = vpow2.f32 %v1713_v43  ;;  %v1698_v5 = vsub.f32 %v5667_v13, %v1670_v1  ;;  %v1699_v6 = vsub.f32 %v5669_v14, %v1672_v4 }
 0x33c   :  { %4935 = vpow2.f32 %v1715_v63 }
 0x33d   :  { %v1717_v15 = vmul.f32 1.442695, %v1698_v5  ;;  %v1719_v31 = vmul.f32 1.442695, %v1699_v6 }
 0x33e   :  { %v1674_v17 = vpop.xlane.xlu1 %1673  ;;  %v1676_v16 = vpop.xlane.xlu0 %1675 }
 0x33f   :  { %4937 = vpow2.f32 %v1717_v15  ;;  %v1700_v18 = vsub.f32 %v5678_v53, %v1674_v17  ;;  %v1701_v24 = vsub.f32 %v5680_v61, %v1676_v16 }
 0x340   :  { %4939 = vpow2.f32 %v1719_v31 }
 0x341   :  { %v5727_v23 = vpop.eup %4931  ;;  %v1721_v21 = vmul.f32 1.442695, %v1700_v18  ;;  %v1723_v3 = vmul.f32 1.442695, %v1701_v24  ;;  %v2033_v24 = vld [vmem:[#allocation13 + $0x80] sm:$0xff] }
 0x342   :  { %v1678_v8 = vpop.xlane.xlu1 %1677  ;;  %1743 = vadd.xlane.f32.xlu0 %v5727_v23  ;;  %v1680_v13 = vpop.xlane.xlu0 %1679 }
 0x343   :  { %4941 = vpow2.f32 %v1721_v21  ;;  %v1702_v14 = vsub.f32 %v5687_v19, %v1678_v8  ;;  %v1703_v35 = vsub.f32 %v5689_v20, %v1680_v13  ;;  %v2034_v21 = vld [vmem:[#allocation13 + $0x88] sm:$0xff] }
 0x344   :  { %4943 = vpow2.f32 %v1723_v3  ;;  %v2065_v3 = vld [vmem:[#allocation13 + $0x180] sm:$0xff]  ;;  %v4560_v8 = vpack.c.bf16 %v2034_v21, %v2033_v24  ;;  %v2066_v13 = vld [vmem:[#allocation13 + $0x188] sm:$0xff] }
 0x345   :  { %v5732_v28 = vpop.eup %4933  ;;  %v1725_v53 = vmul.f32 1.442695, %v1702_v14  ;;  %v1727_v34 = vmul.f32 1.442695, %v1703_v35  ;;  %v4592_v14 = vpack.c.bf16 %v2066_v13, %v2065_v3 }
 0x346   :  { %v5734_v61 = vpop.eup %4935  ;;  %1745 = vadd.xlane.f32.xlu1 %v5732_v28  ;;  %v1682_v29 = vpop.xlane.xlu1 %1681  ;;  %4561 = vmatprep.subr.bf16.mxu0 %v4560_v8 }
 0x347   :  { %v1684_v36 = vpop.xlane.xlu0 %1683  ;;  %4945 = vpow2.f32 %v1725_v53  ;;  %v1704_v37 = vsub.f32 %v5696_v9, %v1682_v29  ;;  %1747 = vadd.xlane.f32.xlu0 %v5734_v61  ;;  %4593 = vmatprep.subr.bf16.mxu1 %v4592_v14 }
 0x348   :  { %v1705_v19 = vsub.f32 %v5698_v7, %v1684_v36  ;;  %4947 = vpow2.f32 %v1727_v34 }
 0x349   :  { %v5740_v20 = vpop.eup %4937  ;;  %v1729_v10 = vmul.f32 1.442695, %v1704_v37 }
 0x34a   :  { %v1731_v11 = vmul.f32 1.442695, %v1705_v19  ;;  %v5742_v26 = vpop.eup %4939  ;;  %1749 = vadd.xlane.f32.xlu1 %v5740_v20  ;;  %v1686_v48 = vpop.xlane.xlu1 %1685 }
 0x34b   :  { %v1688_v54 = vpop.xlane.xlu0 %1687  ;;  %4949 = vpow2.f32 %v1729_v10  ;;  %v1706_v57 = vsub.f32 %v5704_v39, %v1686_v48  ;;  %1751 = vadd.xlane.f32.xlu0 %v5742_v26  ;;  %v2018_v48 = vld [vmem:[#allocation13 + $0x8] sm:$0xff] }
 0x34c   :  { %v1707_v9 = vsub.f32 %v5706_v40, %v1688_v54  ;;  %4951 = vpow2.f32 %v1731_v11  ;;  %v2017_v11 = vld [vmem:[#allocation13] sm:$0xff] }
 0x34d   :  { %v5748_v7 = vpop.eup %4941  ;;  %v1733_v58 = vmul.f32 1.442695, %v1706_v57  ;;  %v2035_v57 = vld [vmem:[#allocation13 + $0x90] sm:$0xff] }
 0x34e   :  { %v1735_v50 = vmul.f32 1.442695, %v1707_v9  ;;  %v5750_v60 = vpop.eup %4943  ;;  %1753 = vadd.xlane.f32.xlu1 %v5748_v7  ;;  %v1690_v49 = vpop.xlane.xlu1 %1689  ;;  %v2036_v9 = vld [vmem:[#allocation13 + $0x98] sm:$0xff] }
 0x34f   :  { %v1692_v52 = vpop.xlane.xlu0 %1691  ;;  %4953 = vpow2.f32 %v1733_v58  ;;  %v1708_v43 = vsub.f32 %v5710_v45, %v1690_v49  ;;  %1755 = vadd.xlane.f32.xlu0 %v5750_v60 }
 0x350   :  { %v1709_v39 = vsub.f32 %v5712_v46, %v1692_v52  ;;  %4955 = vpow2.f32 %v1735_v50  ;;  %v4562_v50 = vpack.c.bf16 %v2018_v48, %v2017_v11  ;;  %v2067_v48 = vld [vmem:[#allocation13 + $0x190] sm:$0xff] }
 0x351   :  { %v5756_v40 = vpop.eup %4945  ;;  %v1737_v63 = vmul.f32 1.442695, %v1708_v43 }
 0x352   :  { %v1739_v1 = vmul.f32 1.442695, %v1709_v39  ;;  %v5758_v4 = vpop.eup %4947  ;;  %1757 = vadd.xlane.f32.xlu1 %v5756_v40  ;;  %v1694_v5 = vpop.xlane.xlu1 %1693  ;;  %v4564_v39 = vpack.c.bf16 %v2036_v9, %v2035_v57 }
 0x353   :  { %4957 = vpow2.f32 %v1737_v63  ;;  %v1710_v6 = vsub.f32 %v5717_v42, %v1694_v5  ;;  %1759 = vadd.xlane.f32.xlu0 %v5758_v4  ;;  %v2019_v63 = vld [vmem:[#allocation13 + $0x10] sm:$0xff] }
 0x354   :  { %4959 = vpow2.f32 %v1739_v1  ;;  %v2020_v1 = vld [vmem:[#allocation13 + $0x18] sm:$0xff] }
 0x355   :  { %v5763_v45 = vpop.eup %4949  ;;  %v1741_v15 = vmul.f32 1.442695, %v1710_v6 }
 0x356   :  { %v5765_v46 = vpop.eup %4951  ;;  %1761 = vadd.xlane.f32.xlu1 %v5763_v45 }
 0x357   :  { %4961 = vpow2.f32 %v1741_v15  ;;  %1763 = vadd.xlane.f32.xlu0 %v5765_v46  ;;  %v4566_v15 = vpack.c.bf16 %v2020_v1, %v2019_v63 }
 0x359   :  { %v5769_v31 = vpop.eup %4953 }
 0x35a   :  { %v5771_v17 = vpop.eup %4955  ;;  %1765 = vadd.xlane.f32.xlu1 %v5769_v31 }
 0x35b   :  { %1767 = vadd.xlane.f32.xlu0 %v5771_v17 }
 0x35d   :  { %v5775_v42 = vpop.eup %4957 }
 0x35e   :  { %v5777_v16 = vpop.eup %4959  ;;  %1769 = vadd.xlane.f32.xlu1 %v5775_v42 }
 0x35f   :  { %1771 = vadd.xlane.f32.xlu0 %v5777_v16 }
 0x361   :  { %v5781_v18 = vpop.eup %4961 }
 0x362   :  { %1773 = vadd.xlane.f32.xlu1 %v5781_v18 }
 0x3cf   :  { %v1744_v35 = vpop.xlane.xlu0 %1743 }
 0x3d0   :  { %4963 = vrcp.f32 %v1744_v35 }
 0x3d3   :  { %v1746_v53 = vpop.xlane.xlu1 %1745 }
 0x3d4   :  { %4965 = vrcp.f32 %v1746_v53  ;;  %v1748_v34 = vpop.xlane.xlu0 %1747 }
 0x3d5   :  { %4967 = vrcp.f32 %v1748_v34 }
 0x3d7   :  { %v1750_v29 = vpop.xlane.xlu1 %1749 }
 0x3d8   :  { %4969 = vrcp.f32 %v1750_v29  ;;  %v1752_v36 = vpop.xlane.xlu0 %1751 }
 0x3d9   :  { %4971 = vrcp.f32 %v1752_v36 }
 0x3da   :  { %v4964_v37 = vpop.eup %4963 }
 0x3db   :  { %v1754_v19 = vpop.xlane.xlu1 %1753  ;;  %v1791_v10 = vmul.f32 %v4964_v37, %v5727_v23  ;;  %v2049_v37 = vld [vmem:[#allocation13 + $0x100] sm:$0xff] }
 0x3dc   :  { %4973 = vrcp.f32 %v1754_v19  ;;  %v1756_v54 = vpop.xlane.xlu0 %1755  ;;  %v2050_v19 = vld [vmem:[#allocation13 + $0x108] sm:$0xff] }
 0x3dd   :  { %4975 = vrcp.f32 %v1756_v54  ;;  %4003 = vmatprep.mubr.f32.mxu0 %v1791_v10 }
 0x3de   :  { %v4966_v58 = vpop.eup %4965 }
 0x3df   :  { %v4968_v49 = vpop.eup %4967  ;;  %v1792_v52 = vmul.f32 %v4966_v58, %v5732_v28  ;;  %v1758_v43 = vpop.xlane.xlu1 %1757 }
 0x3e0   :  { %4977 = vrcp.f32 %v1758_v43  ;;  %v1760_v5 = vpop.xlane.xlu0 %1759  ;;  %v1793_v23 = vmul.f32 %v4968_v49, %v5734_v61  ;;  %v2051_v49 = vld [vmem:[#allocation13 + $0x110] sm:$0xff] }
 0x3e1   :  { %4979 = vrcp.f32 %v1760_v5  ;;  %4004 = vmatmul.mubr.f32.vlgmr.msra.gmra.mrb[16].mxu0 %v1792_v52 }
 0x3e2   :  { %v4970_v6 = vpop.eup %4969  ;;  %4006 = vmatprep.mubr.f32.mxu0 %v1793_v23  ;;  %4563 = vmatpush3.bf16.msra.mxu0 %v4562_v50 }
 0x3e3   :  { %v4972_v24 = vpop.eup %4971  ;;  %v1762_v21 = vpop.xlane.xlu1 %1761  ;;  %v1794_v3 = vmul.f32 %v4970_v6, %v5740_v20  ;;  %4565 = vmatprep.subr.bf16.mxu0 %v4564_v39 }
 0x3e4   :  { %4981 = vrcp.f32 %v1762_v21  ;;  %v1764_v28 = vpop.xlane.xlu0 %1763  ;;  %v1795_v8 = vmul.f32 %v4972_v24, %v5742_v26  ;;  %v2037_v24 = vld [vmem:[#allocation13 + $0xa0] sm:$0xff] }
 0x3e5   :  { %4983 = vrcp.f32 %v1764_v28  ;;  %4007 = vmatmul.mubr.f32.gmra.mrb[18].mxu0 %v1794_v3  ;;  %v2069_v21 = vld [vmem:[#allocation13 + $0x1a0] sm:$0xff] }
 0x3e6   :  { %v4974_v13 = vpop.eup %4973  ;;  %4009 = vmatprep.mubr.f32.mxu0 %v1795_v8  ;;  %4567 = vmatpush3.bf16.msra.mxu0 %v4566_v15  ;;  %v2021_v28 = vld [vmem:[#allocation13 + $0x20] sm:$0xff]  ;;  %v2022_v8 = vld [vmem:[#allocation13 + $0x28] sm:$0xff] }
 0x3e7   :  { %v4976_v61 = vpop.eup %4975  ;;  %v1766_v14 = vpop.xlane.xlu1 %1765  ;;  %v1796_v35 = vmul.f32 %v4974_v13, %v5748_v7  ;;  %v2068_v7 = vld [vmem:[#allocation13 + $0x198] sm:$0xff] }
 0x3e8   :  { %4985 = vrcp.f32 %v1766_v14  ;;  %v1768_v53 = vpop.xlane.xlu0 %1767  ;;  %v1797_v34 = vmul.f32 %v4976_v61, %v5750_v60  ;;  %v4594_v60 = vpack.c.bf16 %v2050_v19, %v2049_v37  ;;  %v4596_v50 = vpack.c.bf16 %v2068_v7, %v2067_v48  ;;  %v2053_v14 = vld [vmem:[#allocation13 + $0x120] sm:$0xff]  ;;  %v2055_v19 = vld [vmem:[#allocation13 + $0x130] sm:$0xff]  ;;  %v2042_v7 = vld [vmem:[#allocation13 + $0xc8] sm:$0xff] }
 0x3e9   :  { %4987 = vrcp.f32 %v1768_v53  ;;  %4010 = vmatmul.mubr.f32.gmra.mrb[20].mxu0 %v1796_v35  ;;  %v4570_v61 = vpack.c.bf16 %v2022_v8, %v2021_v28  ;;  %v2054_v35 = vld [vmem:[#allocation13 + $0x128] sm:$0xff]  ;;  %v2040_v53 = vld [vmem:[#allocation13 + $0xb8] sm:$0xff]  ;;  %v2041_v48 = vld [vmem:[#allocation13 + $0xc0] sm:$0xff] }
 0x3ea   :  { %v4978_v20 = vpop.eup %4977  ;;  %4012 = vmatprep.mubr.f32.mxu0 %v1797_v34  ;;  %v2071_v34 = vld [vmem:[#allocation13 + $0x1b0] sm:$0xff]  ;;  %v2078_v8 = vld [vmem:[#allocation13 + $0x1e8] sm:$0xff] }
 0x3eb   :  { %v4980_v29 = vpop.eup %4979  ;;  %v1770_v36 = vpop.xlane.xlu1 %1769  ;;  %v1798_v26 = vmul.f32 %v4978_v20, %v5756_v40  ;;  %v2052_v40 = vld [vmem:[#allocation13 + $0x118] sm:$0xff] }
 0x3ec   :  { %4989 = vrcp.f32 %v1770_v36  ;;  %v1772_v10 = vpop.xlane.xlu0 %1771  ;;  %v1799_v11 = vmul.f32 %v4980_v29, %v5758_v4  ;;  %v4598_v4 = vpack.c.bf16 %v2052_v40, %v2051_v49  ;;  %v2072_v20 = vld [vmem:[#allocation13 + $0x1b8] sm:$0xff]  ;;  %v2023_v29 = vld [vmem:[#allocation13 + $0x30] sm:$0xff]  ;;  %v2057_v40 = vld [vmem:[#allocation13 + $0x140] sm:$0xff] }
 0x3ed   :  { %4991 = vrcp.f32 %v1772_v10  ;;  %4013 = vmatmul.mubr.f32.gmra.mrb[22].mxu0 %v1798_v26  ;;  %v2024_v36 = vld [vmem:[#allocation13 + $0x38] sm:$0xff]  ;;  %v4604_v26 = vpack.c.bf16 %v2072_v20, %v2071_v34  ;;  %v2047_v34 = vld [vmem:[#allocation13 + $0xf0] sm:$0xff] }
 0x3ee   :  { %v4982_v54 = vpop.eup %4981  ;;  %4047 = vmatprep.mubr.f32.mxu1 %v1799_v11  ;;  %v4574_v37 = vpack.c.bf16 %v2024_v36, %v2023_v29  ;;  %v2056_v10 = vld [vmem:[#allocation13 + $0x138] sm:$0xff]  ;;  %v2079_v20 = vld [vmem:[#allocation13 + $0x1f0] sm:$0xff] }
 0x3ef   :  { %v4984_v57 = vpop.eup %4983  ;;  %v1800_v9 = vmul.f32 %v4982_v54, %v5763_v45  ;;  %v1774_v58 = vpop.xlane.xlu1 %1773  ;;  %v4606_v11 = vpack.c.bf16 %v2056_v10, %v2055_v19  ;;  %v2073_v54 = vld [vmem:[#allocation13 + $0x1c0] sm:$0xff]  ;;  %v2080_v36 = vld [vmem:[#allocation13 + $0x1f8] sm:$0xff] }
 0x3f0   :  { %4993 = vrcp.f32 %v1774_v58  ;;  %v1801_v52 = vmul.f32 %v4984_v57, %v5765_v46  ;;  %v2074_v57 = vld [vmem:[#allocation13 + $0x1c8] sm:$0xff]  ;;  %v4620_v19 = vpack.c.bf16 %v2080_v36, %v2079_v20 }
 0x3f1   :  { %4048 = vmatmul.mubr.f32.vlgmr.msra.gmra.mrb[24].mxu1 %v1800_v9  ;;  %v2025_v9 = vld [vmem:[#allocation13 + $0x40] sm:$0xff]  ;;  %v2026_v58 = vld [vmem:[#allocation13 + $0x48] sm:$0xff] }
 0x3f2   :  { %v4986_v43 = vpop.eup %4985  ;;  %4050 = vmatprep.mubr.f32.mxu1 %v1801_v52  ;;  %4595 = vmatpush3.bf16.msra.mxu1 %v4594_v60  ;;  %v4576_v60 = vpack.c.bf16 %v2042_v7, %v2041_v48  ;;  %v4578_v49 = vpack.c.bf16 %v2026_v58, %v2025_v9  ;;  %v2058_v52 = vld [vmem:[#allocation13 + $0x148] sm:$0xff]  ;;  %v2064_v48 = vld [vmem:[#allocation13 + $0x178] sm:$0xff] }
 0x3f3   :  { %v4988_v39 = vpop.eup %4987  ;;  %v1802_v63 = vmul.f32 %v4986_v43, %v5769_v31  ;;  %4597 = vmatprep.subr.bf16.mxu1 %v4596_v50  ;;  %v2038_v31 = vld [vmem:[#allocation13 + $0xa8] sm:$0xff]  ;;  %v4608_v50 = vpack.c.bf16 %v2074_v57, %v2073_v54  ;;  %v4610_v43 = vpack.c.bf16 %v2058_v52, %v2057_v40  ;;  %v2097_v54 = vld [vmem:[#allocation13 + $0x280] sm:$0xff] }
 0x3f4   :  { %v1803_v1 = vmul.f32 %v4988_v39, %v5771_v17  ;;  %v4568_v3 = vpack.c.bf16 %v2038_v31, %v2037_v24  ;;  %v2070_v17 = vld [vmem:[#allocation13 + $0x1a8] sm:$0xff]  ;;  %v2044_v39 = vld [vmem:[#allocation13 + $0xd8] sm:$0xff]  ;;  %v2129_v57 = vld [vmem:[#allocation13 + $0x380] sm:$0xff] }
 0x3f5   :  { %4051 = vmatmul.mubr.f32.gmra.mrb[26].mxu1 %v1802_v63  ;;  %v4600_v13 = vpack.c.bf16 %v2070_v17, %v2069_v21  ;;  %v2075_v63 = vld [vmem:[#allocation13 + $0x1d0] sm:$0xff]  ;;  %v2060_v24 = vld [vmem:[#allocation13 + $0x158] sm:$0xff]  ;;  %v2045_v21 = vld [vmem:[#allocation13 + $0xe0] sm:$0xff] }
 0x3f6   :  { %v4990_v45 = vpop.eup %4989  ;;  %4053 = vmatprep.mubr.f32.mxu1 %v1803_v1  ;;  %4599 = vmatpush3.bf16.msra.mxu1 %v4598_v4  ;;  %v2043_v4 = vld [vmem:[#allocation13 + $0xd0] sm:$0xff]  ;;  %v2077_v17 = vld [vmem:[#allocation13 + $0x1e0] sm:$0xff]  ;;  %v2130_v58 = vld [vmem:[#allocation13 + $0x388] sm:$0xff] }
 0x3f7   :  { %v4992_v5 = vpop.eup %4991  ;;  %v1804_v23 = vmul.f32 %v4990_v45, %v5775_v42  ;;  %4569 = vmatprep.subr.bf16.mxu0 %v4568_v3  ;;  %v4602_v42 = vpack.c.bf16 %v2054_v35, %v2053_v14  ;;  %4601 = vmatprep.subr.bf16.mxu1 %v4600_v13  ;;  %v4580_v1 = vpack.c.bf16 %v2044_v39, %v2043_v4  ;;  %v2076_v45 = vld [vmem:[#allocation13 + $0x1d8] sm:$0xff]  ;;  %v2046_v3 = vld [vmem:[#allocation13 + $0xe8] sm:$0xff]  ;;  %v2029_v13 = vld [vmem:[#allocation13 + $0x60] sm:$0xff] }
 0x3f8   :  { %v1805_v46 = vmul.f32 %v4992_v5, %v5777_v16  ;;  %4571 = vmatpush3.bf16.msra.mxu0 %v4570_v61  ;;  %v2039_v16 = vld [vmem:[#allocation13 + $0xb0] sm:$0xff]  ;;  %v4584_v28 = vpack.c.bf16 %v2046_v3, %v2045_v21  ;;  %v2030_v61 = vld [vmem:[#allocation13 + $0x68] sm:$0xff]  ;;  %v4616_v14 = vpack.c.bf16 %v2078_v8, %v2077_v17 }
 0x3f9   :  { %4054 = vmatmul.mubr.f32.gmra.mrb[28].mxu1 %v1804_v23  ;;  %v2027_v5 = vld [vmem:[#allocation13 + $0x50] sm:$0xff]  ;;  %v2028_v23 = vld [vmem:[#allocation13 + $0x58] sm:$0xff]  ;;  %v4586_v35 = vpack.c.bf16 %v2030_v61, %v2029_v13 }
 0x3fa   :  { %v4994_v6 = vpop.eup %4993  ;;  %4056 = vmatprep.mubr.f32.mxu1 %v1805_v46  ;;  %4603 = vmatpush3.bf16.msra.mxu1 %v4602_v42  ;;  %v4612_v46 = vpack.c.bf16 %v2076_v45, %v2075_v63  ;;  %v2061_v42 = vld [vmem:[#allocation13 + $0x160] sm:$0xff] }
 0x3fb   :  { %v1806_v15 = vmul.f32 %v4994_v6, %v5781_v18  ;;  %v4572_v18 = vpack.c.bf16 %v2040_v53, %v2039_v16  ;;  %4605 = vmatprep.subr.bf16.mxu1 %v4604_v26  ;;  %v4582_v6 = vpack.c.bf16 %v2028_v23, %v2027_v5  ;;  %v2062_v16 = vld [vmem:[#allocation13 + $0x168] sm:$0xff]  ;;  %v2031_v26 = vld [vmem:[#allocation13 + $0x70] sm:$0xff] }
 0x3fc   :  { %v4618_v53 = vpack.c.bf16 %v2062_v16, %v2061_v42  ;;  %v5806_v42 = vld [vmem:[#allocation13 + $0x208] sm:$0xff] }
 0x3fd   :  { %4057 = vmatmul.mubr.f32.gmra.mrb[30].mxu1 %v1806_v15  ;;  %4573 = vmatprep.subr.bf16.mxu0 %v4572_v18  ;;  %v2059_v15 = vld [vmem:[#allocation13 + $0x150] sm:$0xff]  ;;  %v2048_v18 = vld [vmem:[#allocation13 + $0xf8] sm:$0xff] }
 0x3fe   :  { %4575 = vmatpush3.bf16.msra.mxu0 %v4574_v37  ;;  %4607 = vmatpush3.bf16.msra.mxu1 %v4606_v11  ;;  %v4614_v31 = vpack.c.bf16 %v2060_v24, %v2059_v15  ;;  %v4588_v29 = vpack.c.bf16 %v2048_v18, %v2047_v34  ;;  %v2032_v37 = vld [vmem:[#allocation13 + $0x78] sm:$0xff]  ;;  %v2063_v11 = vld [vmem:[#allocation13 + $0x170] sm:$0xff] }
 0x3ff   :  { %4577 = vmatprep.subr.bf16.mxu0 %v4576_v60  ;;  %4609 = vmatprep.subr.bf16.mxu1 %v4608_v50  ;;  %v4590_v10 = vpack.c.bf16 %v2032_v37, %v2031_v26  ;;  %v4622_v7 = vpack.c.bf16 %v2064_v48, %v2063_v11  ;;  %v2098_v60 = vld [vmem:[#allocation13 + $0x288] sm:$0xff]  ;;  %v4656_v50 = vpack.c.bf16 %v2130_v58, %v2129_v57  ;;  %v5814_v26 = vld [vmem:[#allocation13 + $0x300] sm:$0xff] }
 0x400   :  { %v4624_v9 = vpack.c.bf16 %v2098_v60, %v2097_v54  ;;  %v2114_v48 = vld [vmem:[#allocation13 + $0x308] sm:$0xff]  ;;  %v2100_v54 = vld [vmem:[#allocation13 + $0x298] sm:$0xff] }
 0x402   :  { %4579 = vmatpush3.bf16.msra.mxu0 %v4578_v49  ;;  %4611 = vmatpush3.bf16.msra.mxu1 %v4610_v43 }
 0x403   :  { %4581 = vmatprep.subr.bf16.mxu0 %v4580_v1  ;;  %4613 = vmatprep.subr.bf16.mxu1 %v4612_v46 }
 0x406   :  { %4583 = vmatpush3.bf16.msra.mxu0 %v4582_v6  ;;  %4615 = vmatpush3.bf16.msra.mxu1 %v4614_v31 }
 0x407   :  { %4585 = vmatprep.subr.bf16.mxu0 %v4584_v28  ;;  %4617 = vmatprep.subr.bf16.mxu1 %v4616_v14 }
 0x40a   :  { %4587 = vmatpush3.bf16.msra.mxu0 %v4586_v35  ;;  %4619 = vmatpush3.bf16.msra.mxu1 %v4618_v53  ;;  %v5804_v35 = vld [vmem:[#allocation13 + $0x200] sm:$0xff] }
 0x40b   :  { %4589 = vmatprep.subr.bf16.mxu0 %v4588_v29  ;;  %4621 = vmatprep.subr.bf16.mxu1 %v4620_v19  ;;  %v4626_v36 = vpack.c.bf16 %v5806_v42, %v5804_v35  ;;  %v2115_v35 = vld [vmem:[#allocation13 + $0x310] sm:$0xff] }
 0x40e   :  { %4591 = vmatpush3.bf16.msra.mxu0 %v4590_v10  ;;  %4623 = vmatpush3.bf16.msra.mxu1 %v4622_v7  ;;  %v2099_v7 = vld [vmem:[#allocation13 + $0x290] sm:$0xff] }
 0x40f   :  { %4625 = vmatprep.subr.bf16.mxu0 %v4624_v9  ;;  %4657 = vmatprep.subr.bf16.mxu1 %v4656_v50 }
 0x4b4   :  { %v4005_v49 = vpop.f32.mrb[16].mxu0 }
 0x4b5   :  { %v1873_v40 = vpop.f32.mrb[17].mxu0 }
 0x4b6   :  { %v2168_v52 = vcombine.low %v1873_v40, %v4005_v49  ;;  %v2169_v43 = vcombine.high %v1873_v40, %v4005_v49 }
 0x4b8   :  { %v4008_v4 = vpop.f32.mrb[18].mxu0  ;;  %v2182_v45 = vrot.slane %v2168_v52, %v5565_v33  ;;  %v2189_v5 = vrot.slane %v2169_v43, %v5565_v33 }
 0x4b9   :  { %v1883_v39 = vpop.f32.mrb[19].mxu0 }
 0x4ba   :  { %v2170_v63 = vcombine.low %v1883_v39, %v4008_v4  ;;  %v2171_v1 = vcombine.high %v1883_v39, %v4008_v4 }
 0x4bc   :  { %v2196_v23 = vrot.slane %v2170_v63, %v5565_v33  ;;  %v2203_v46 = vrot.slane %v2171_v1, %v5565_v33  ;;  %v4011_v6 = vpop.f32.mrb[20].mxu0  ;;  %v4658_v63 = vpack.c.bf16 %v2114_v48, %v5814_v26  ;;  %v4628_v1 = vpack.c.bf16 %v2100_v54, %v2099_v7  ;;  %v2101_v26 = vld [vmem:[#allocation13 + $0x2a0] sm:$0xff]  ;;  %v2134_v7 = vld [vmem:[#allocation13 + $0x3a8] sm:$0xff] }
 0x4bd   :  { %v1893_v15 = vpop.f32.mrb[21].mxu0  ;;  %v2133_v48 = vld [vmem:[#allocation13 + $0x3a0] sm:$0xff] }
 0x4be   :  { %v2232_v24 = vcombine.low %v2182_v45, %v2196_v23  ;;  %v2233_v31 = vcombine.high %v2182_v45, %v2196_v23  ;;  %v2234_v21 = vcombine.low %v2189_v5, %v2203_v46  ;;  %v2235_v3 = vcombine.high %v2189_v5, %v2203_v46  ;;  %v2131_v45 = vld [vmem:[#allocation13 + $0x390] sm:$0xff]  ;;  %v2132_v5 = vld [vmem:[#allocation13 + $0x398] sm:$0xff] }
 0x4bf   :  { %v2172_v17 = vcombine.low %v1893_v15, %v4011_v6  ;;  %v2173_v28 = vcombine.high %v1893_v15, %v4011_v6 }
 0x4c0   :  { %v4014_v8 = vpop.f32.mrb[22].mxu0  ;;  %v2246_v60 = vrot.slane %v2232_v24, %v5565_v33  ;;  %v5818_v57 = vrot.slane %v2234_v21, %v5565_v33  ;;  %v2260_v39 = vrot.slane %v2233_v31, %v5565_v33  ;;  %v5831_v23 = vrot.slane %v2235_v3, %v5565_v33 }
 0x4c1   :  { %v1903_v13 = vpop.f32.mrb[23].mxu0  ;;  %v2210_v16 = vrot.slane %v2172_v17, %v5565_v33  ;;  %v2217_v53 = vrot.slane %v2173_v28, %v5565_v33  ;;  %v4660_v3 = vpack.c.bf16 %v2132_v5, %v2131_v45  ;;  %v2118_v5 = vld [vmem:[#allocation13 + $0x328] sm:$0xff] }
 0x4c2   :  { %v2174_v61 = vcombine.low %v1903_v13, %v4014_v8  ;;  %v2175_v14 = vcombine.high %v1903_v13, %v4014_v8  ;;  %v2083_v8 = vld [vmem:[#allocation13 + $0x210] sm:$0xff]  ;;  %v2084_v13 = vld [vmem:[#allocation13 + $0x218] sm:$0xff] }
 0x4c4   :  { %v2224_v34 = vrot.slane %v2174_v61, %v5565_v33  ;;  %v2231_v18 = vrot.slane %v2175_v14, %v5565_v33  ;;  %v4049_v20 = vpop.f32.mrb[24].mxu1 }
 0x4c5   :  { %v1978_v29 = vpop.f32.mrb[25].mxu1 }
 0x4c6   :  { %v2236_v37 = vcombine.low %v2210_v16, %v2224_v34  ;;  %v2237_v19 = vcombine.high %v2210_v16, %v2224_v34  ;;  %v2238_v10 = vcombine.low %v2217_v53, %v2231_v18  ;;  %v2239_v11 = vcombine.high %v2217_v53, %v2231_v18 }
 0x4c7   :  { %v2304_v9 = vcombine.low %v1978_v29, %v4049_v20  ;;  %v2305_v58 = vcombine.high %v1978_v29, %v4049_v20  ;;  %v2116_v29 = vld [vmem:[#allocation13 + $0x318] sm:$0xff] }
 0x4c8   :  { %v2274_v50 = vrot.slane %v2236_v37, %v5565_v33  ;;  %v5822_v49 = vrot.slane %v2238_v10, %v5565_v33  ;;  %v4052_v40 = vpop.f32.mrb[26].mxu1  ;;  %v2288_v52 = vrot.slane %v2237_v19, %v5565_v33  ;;  %v5826_v43 = vrot.slane %v2239_v11, %v5565_v33  ;;  %v2102_v37 = vld [vmem:[#allocation13 + $0x2a8] sm:$0xff] }
 0x4c9   :  { %v1988_v4 = vpop.f32.mrb[27].mxu1  ;;  %v5838_v61 = vrot.slane %v2304_v9, %v5565_v33  ;;  %v5845_v53 = vrot.slane %v2305_v58, %v5565_v33  ;;  %v4630_v11 = vpack.c.bf16 %v2084_v13, %v2083_v8  ;;  %v4632_v45 = vpack.c.bf16 %v2102_v37, %v2101_v26  ;;  %v2087_v8 = vld [vmem:[#allocation13 + $0x230] sm:$0xff] }
 0x4ca   :  { %v2296_v46 = vcombine.low %v2246_v60, %v2274_v50  ;;  %v2297_v6 = vcombine.high %v2246_v60, %v2274_v50  ;;  %v2298_v15 = vcombine.low %v5818_v57, %v5822_v49  ;;  %v2299_v24 = vcombine.high %v5818_v57, %v5822_v49  ;;  %v2085_v50 = vld [vmem:[#allocation13 + $0x220] sm:$0xff]  ;;  %v2761_v49 = vld [vmem:[#allocation14 + $0x28] sm:$0xff] }
 0x4cb   :  { %v2306_v21 = vcombine.low %v1988_v4, %v4052_v40  ;;  %v2307_v17 = vcombine.high %v1988_v4, %v4052_v40  ;;  %v2300_v28 = vcombine.low %v2260_v39, %v2288_v52  ;;  %v2301_v31 = vcombine.high %v2260_v39, %v2288_v52  ;;  %v2086_v40 = vld [vmem:[#allocation13 + $0x228] sm:$0xff]  ;;  %v2117_v52 = vld [vmem:[#allocation13 + $0x320] sm:$0xff] }
 0x4cc   :  { %v4055_v14 = vpop.f32.mrb[28].mxu1  ;;  %v2302_v42 = vcombine.low %v5831_v23, %v5826_v43  ;;  %v2303_v16 = vcombine.high %v5831_v23, %v5826_v43  ;;  %v4662_v39 = vpack.c.bf16 %v2116_v29, %v2115_v35  ;;  %v4666_v35 = vpack.c.bf16 %v2118_v5, %v2117_v52  ;;  %v2105_v29 = vld [vmem:[#allocation13 + $0x2c0] sm:$0xff]  ;;  %v2127_v43 = vld [vmem:[#allocation13 + $0x370] sm:$0xff]  ;;  %v2128_v23 = vld [vmem:[#allocation13 + $0x378] sm:$0xff] }
 0x4cd   :  { %v5848_v34 = vrot.slane %v2306_v21, %v5565_v33  ;;  %v5851_v18 = vrot.slane %v2307_v17, %v5565_v33  ;;  %2520 = vmatprep.mubr.f32.mxu0 %v2300_v28  ;;  %2595 = vmatprep.mubr.f32.mxu1 %v2301_v31  ;;  %v1998_v20 = vpop.f32.mrb[29].mxu1  ;;  %v4664_v17 = vpack.c.bf16 %v2134_v7, %v2133_v48  ;;  %v2135_v28 = vld [vmem:[#allocation13 + $0x3b0] sm:$0xff]  ;;  %v2136_v31 = vld [vmem:[#allocation13 + $0x3b8] sm:$0xff]  ;;  %v2106_v48 = vld [vmem:[#allocation13 + $0x2c8] sm:$0xff] }
 0x4ce   :  { %v2308_v19 = vcombine.low %v1998_v20, %v4055_v14  ;;  %v2309_v10 = vcombine.high %v1998_v20, %v4055_v14  ;;  %2521 = vmatmul.mubr.f32.vlgmr.msra.gmra.mrb[24].mxu0 %v2296_v46  ;;  %2596 = vmatmul.mubr.f32.vlgmr.msra.gmra.mrb[32].mxu1 %v2297_v6  ;;  %v2103_v46 = vld [vmem:[#allocation13 + $0x2b0] sm:$0xff]  ;;  %v2104_v6 = vld [vmem:[#allocation13 + $0x2b8] sm:$0xff]  ;;  %v2137_v7 = vld [vmem:[#allocation13 + $0x3c0] sm:$0xff] }
 0x4cf   :  { %v2368_v54 = vcombine.low %v5838_v61, %v5848_v34  ;;  %v2369_v60 = vcombine.high %v5838_v61, %v5848_v34  ;;  %v2370_v9 = vcombine.low %v5845_v53, %v5851_v18  ;;  %v2371_v58 = vcombine.high %v5845_v53, %v5851_v18  ;;  %4627 = vmatpush3.bf16.msra.mxu0 %v4626_v36  ;;  %v2088_v36 = vld [vmem:[#allocation13 + $0x238] sm:$0xff]  ;;  %v2119_v14 = vld [vmem:[#allocation13 + $0x330] sm:$0xff]  ;;  %v2089_v5 = vld [vmem:[#allocation13 + $0x240] sm:$0xff] }
 0x4d0   :  { %4659 = vmatpush3.bf16.msra.mxu1 %v4658_v63  ;;  %v4058_v4 = vpop.f32.mrb[30].mxu1  ;;  %4629 = vmatprep.subr.bf16.mxu0 %v4628_v1  ;;  %v2120_v34 = vld [vmem:[#allocation13 + $0x338] sm:$0xff]  ;;  %v2346_v63 = vrot.slane %v2308_v19, %v5565_v33  ;;  %v4634_v1 = vpack.c.bf16 %v2086_v40, %v2085_v50  ;;  %v4636_v20 = vpack.c.bf16 %v2104_v6, %v2103_v46  ;;  %v2090_v46 = vld [vmem:[#allocation13 + $0x248] sm:$0xff]  ;;  %v2760_v57 = vld [vmem:[#allocation14 + $0x20] sm:$0xff] }
 0x4d1   :  { %4661 = vmatprep.subr.bf16.mxu1 %v4660_v3  ;;  %v2008_v21 = vpop.f32.mrb[31].mxu1  ;;  %v2353_v26 = vrot.slane %v2309_v10, %v5565_v33  ;;  %v4638_v0 = vpack.c.bf16 %v2088_v36, %v2087_v8  ;;  %v4670_v19 = vpack.c.bf16 %v2120_v34, %v2119_v14  ;;  %v2396_v10 = vrot.slane %v2369_v60, %v5565_v33  ;;  %v2121_v8 = vld [vmem:[#allocation13 + $0x340] sm:$0xff] }
 0x4d2   :  { %v2310_v13 = vcombine.low %v2008_v21, %v4058_v4  ;;  %v2311_v61 = vcombine.high %v2008_v21, %v4058_v4  ;;  %v2138_v4 = vld [vmem:[#allocation13 + $0x3c8] sm:$0xff]  ;;  %v4668_v21 = vpack.c.bf16 %v2136_v31, %v2135_v28  ;;  %v4640_v6 = vpack.c.bf16 %v2106_v48, %v2105_v29  ;;  %v2139_v29 = vld [vmem:[#allocation13 + $0x3d0] sm:$0xff] }
 0x4d3   :  { %4631 = vmatpush3.bf16.msra.mxu0 %v4630_v11  ;;  %v4642_v31 = vpack.c.bf16 %v2090_v46, %v2089_v5  ;;  %v5873_v36 = vrot.slane %v2371_v58, %v5565_v33  ;;  %v2093_v46 = vld [vmem:[#allocation13 + $0x260] sm:$0xff] }
 0x4d4   :  { %v2360_v3 = vrot.slane %v2310_v13, %v5565_v33  ;;  %v2367_v37 = vrot.slane %v2311_v61, %v5565_v33  ;;  %4663 = vmatpush3.bf16.msra.mxu1 %v4662_v39  ;;  %4633 = vmatprep.subr.bf16.mxu0 %v4632_v45  ;;  %v4672_v13 = vpack.c.bf16 %v2138_v4, %v2137_v7  ;;  %v2122_v61 = vld [vmem:[#allocation13 + $0x348] sm:$0xff]  ;;  %v2124_v7 = vld [vmem:[#allocation13 + $0x358] sm:$0xff]  ;;  %v2109_v4 = vld [vmem:[#allocation13 + $0x2e0] sm:$0xff] }
 0x4d5   :  { %4665 = vmatprep.subr.bf16.mxu1 %v4664_v17  ;;  %v2382_v39 = vrot.slane %v2368_v54, %v5565_v33  ;;  %v5879_v54 = vrot.slane %v2370_v9, %v5565_v33  ;;  %v4674_v9 = vpack.c.bf16 %v2122_v61, %v2121_v8 }
 0x4d6   :  { %v2372_v11 = vcombine.low %v2346_v63, %v2360_v3  ;;  %v2373_v50 = vcombine.high %v2346_v63, %v2360_v3  ;;  %v2374_v40 = vcombine.low %v2353_v26, %v2367_v37  ;;  %v2375_v52 = vcombine.high %v2353_v26, %v2367_v37  ;;  %v2140_v26 = vld [vmem:[#allocation13 + $0x3d8] sm:$0xff]  ;;  %v2091_v3 = vld [vmem:[#allocation13 + $0x250] sm:$0xff] }
 0x4d7   :  { %4635 = vmatpush3.bf16.msra.mxu0 %v4634_v1  ;;  %v2092_v37 = vld [vmem:[#allocation13 + $0x258] sm:$0xff] }
 0x4d8   :  { %4667 = vmatpush3.bf16.msra.mxu1 %v4666_v35  ;;  %4637 = vmatprep.subr.bf16.mxu0 %v4636_v20  ;;  %v2424_v45 = vrot.slane %v2373_v50, %v5565_v33  ;;  %v2410_v17 = vrot.slane %v2372_v11, %v5565_v33  ;;  %v5870_v28 = vrot.slane %v2375_v52, %v5565_v33  ;;  %v2107_v35 = vld [vmem:[#allocation13 + $0x2d0] sm:$0xff]  ;;  %v2108_v20 = vld [vmem:[#allocation13 + $0x2d8] sm:$0xff]  ;;  %v2141_v50 = vld [vmem:[#allocation13 + $0x3e0] sm:$0xff] }
 0x4d9   :  { %4669 = vmatprep.subr.bf16.mxu1 %v4668_v21  ;;  %v5882_v60 = vrot.slane %v2374_v40, %v5565_v33  ;;  %v4644_v48 = vpack.c.bf16 %v2108_v20, %v2107_v35  ;;  %v2110_v21 = vld [vmem:[#allocation13 + $0x2e8] sm:$0xff]  ;;  %v4676_v11 = vpack.c.bf16 %v2140_v26, %v2139_v29  ;;  %v4646_v52 = vpack.c.bf16 %v2092_v37, %v2091_v3  ;;  %v2758_v29 = vld [vmem:[#allocation14 + $0x10] sm:$0xff]  ;;  %v2759_v26 = vld [vmem:[#allocation14 + $0x18] sm:$0xff] }
 0x4da   :  { %v2436_v14 = vcombine.low %v2396_v10, %v2424_v45  ;;  %v2437_v34 = vcombine.high %v2396_v10, %v2424_v45  ;;  %v2432_v63 = vcombine.low %v2382_v39, %v2410_v17  ;;  %v2433_v1 = vcombine.high %v2382_v39, %v2410_v17  ;;  %v2142_v40 = vld [vmem:[#allocation13 + $0x3e8] sm:$0xff]  ;;  %v2111_v45 = vld [vmem:[#allocation13 + $0x2f0] sm:$0xff]  ;;  %v2112_v17 = vld [vmem:[#allocation13 + $0x2f8] sm:$0xff] }
 0x4db   :  { %4639 = vmatpush3.bf16.msra.mxu0 %v4638_v0  ;;  %v2438_v58 = vcombine.low %v5873_v36, %v5870_v28  ;;  %v2439_v53 = vcombine.high %v5873_v36, %v5870_v28  ;;  %v2434_v18 = vcombine.low %v5879_v54, %v5882_v60  ;;  %v2435_v33 = vcombine.high %v5879_v54, %v5882_v60  ;;  %v2123_v0 = vld [vmem:[#allocation13 + $0x350] sm:$0xff]  ;;  %v2094_v10 = vld [vmem:[#allocation13 + $0x268] sm:$0xff]  ;;  %v2096_v54 = vld [vmem:[#allocation13 + $0x278] sm:$0xff] }
 0x4dc   :  { %4671 = vmatpush3.bf16.msra.mxu1 %v4670_v19  ;;  %2525 = vmatprep.mubr.f32.mxu0 %v2436_v14  ;;  %v4678_v19 = vpack.c.bf16 %v2124_v7, %v2123_v0  ;;  %v4648_v5 = vpack.c.bf16 %v2110_v21, %v2109_v4  ;;  %v2126_v39 = vld [vmem:[#allocation13 + $0x368] sm:$0xff]  ;;  %v2143_v28 = vld [vmem:[#allocation13 + $0x3f0] sm:$0xff]  ;;  %v4650_v8 = vpack.c.bf16 %v2094_v10, %v2093_v46  ;;  %v2859_v0 = vld [vmem:[#allocation14 + $0x98] sm:$0xff] }
 0x4dd   :  { %2600 = vmatprep.mubr.f32.mxu1 %v2437_v34  ;;  %4641 = vmatprep.subr.bf16.mxu0 %v4640_v6  ;;  %v2125_v6 = vld [vmem:[#allocation13 + $0x360] sm:$0xff]  ;;  %v4652_v61 = vpack.c.bf16 %v2112_v17, %v2111_v45  ;;  %v2095_v36 = vld [vmem:[#allocation13 + $0x270] sm:$0xff]  ;;  %v4686_v14 = vpack.c.bf16 %v2128_v23, %v2127_v43  ;;  %v2857_v20 = vld [vmem:[#allocation14 + $0x88] sm:$0xff]  ;;  %v4692_v3 = vpack.c.bf16 %v2759_v26, %v2758_v29 }
 0x4de   :  { %4673 = vmatprep.subr.bf16.mxu1 %v4672_v13  ;;  %2526 = vmatmul.mubr.f32.gmra.mrb[26].mxu0 %v2432_v63  ;;  %v4680_v13 = vpack.c.bf16 %v2142_v40, %v2141_v50  ;;  %v2756_v34 = vld [vmem:[#allocation14] sm:$0xff]  ;;  %v2757_v63 = vld [vmem:[#allocation14 + $0x8] sm:$0xff]  ;;  %v2858_v37 = vld [vmem:[#allocation14 + $0x90] sm:$0xff] }
 0x4df   :  { %2601 = vmatmul.mubr.f32.gmra.mrb[34].mxu1 %v2433_v1  ;;  %4643 = vmatpush3.bf16.msra.mxu0 %v4642_v31  ;;  %v2144_v31 = vld [vmem:[#allocation13 + $0x3f8] sm:$0xff]  ;;  %v2856_v1 = vld [vmem:[#allocation14 + $0x80] sm:$0xff]  ;;  %v4688_v35 = vpack.c.bf16 %v2757_v63, %v2756_v34  ;;  %v2862_v4 = vld [vmem:[#allocation14 + $0xb0] sm:$0xff] }
 0x4e0   :  { %4675 = vmatpush3.bf16.msra.mxu1 %v4674_v9  ;;  %2670 = vmatprep.mubr.f32.mxu0 %v2302_v42  ;;  %v4682_v42 = vpack.c.bf16 %v2126_v39, %v2125_v6  ;;  %v4684_v60 = vpack.c.bf16 %v2144_v31, %v2143_v28  ;;  %v4720_v9 = vpack.c.bf16 %v2857_v20, %v2856_v1  ;;  %v2863_v21 = vld [vmem:[#allocation14 + $0xb8] sm:$0xff]  ;;  %v2765_v40 = vld [vmem:[#allocation14 + $0x48] sm:$0xff]  ;;  %v2766_v10 = vld [vmem:[#allocation14 + $0x50] sm:$0xff] }
 0x4e1   :  { %2745 = vmatprep.mubr.f32.mxu1 %v2303_v16  ;;  %4645 = vmatprep.subr.bf16.mxu0 %v4644_v48  ;;  %v4654_v16 = vpack.c.bf16 %v2096_v54, %v2095_v36  ;;  %v2763_v48 = vld [vmem:[#allocation14 + $0x38] sm:$0xff]  ;;  %v4732_v50 = vpack.c.bf16 %v2863_v21, %v2862_v4  ;;  %v2866_v39 = vld [vmem:[#allocation14 + $0xd0] sm:$0xff]  ;;  %v2768_v28 = vld [vmem:[#allocation14 + $0x60] sm:$0xff] }
 0x4e2   :  { %4677 = vmatprep.subr.bf16.mxu1 %v4676_v11  ;;  %v2764_v11 = vld [vmem:[#allocation14 + $0x40] sm:$0xff]  ;;  %v2767_v6 = vld [vmem:[#allocation14 + $0x58] sm:$0xff]  ;;  %v2769_v31 = vld [vmem:[#allocation14 + $0x68] sm:$0xff] }
 0x4e3   :  { %4647 = vmatpush3.bf16.msra.mxu0 %v4646_v52  ;;  %v2864_v52 = vld [vmem:[#allocation14 + $0xc0] sm:$0xff]  ;;  %v2867_v45 = vld [vmem:[#allocation14 + $0xd8] sm:$0xff]  ;;  %v2770_v54 = vld [vmem:[#allocation14 + $0x70] sm:$0xff] }
 0x4e4   :  { %4679 = vmatpush3.bf16.msra.mxu1 %v4678_v19  ;;  %4649 = vmatprep.subr.bf16.mxu0 %v4648_v5  ;;  %v2865_v19 = vld [vmem:[#allocation14 + $0xc8] sm:$0xff]  ;;  %v4704_v5 = vpack.c.bf16 %v2765_v40, %v2764_v11  ;;  %v4740_v17 = vpack.c.bf16 %v2867_v45, %v2866_v39  ;;  %v2870_v23 = vld [vmem:[#allocation14 + $0xf0] sm:$0xff]  ;;  %v2956_v34 = vld [vmem:[#allocation14 + $0x100] sm:$0xff] }
 0x4e5   :  { %4681 = vmatprep.subr.bf16.mxu1 %v4680_v13  ;;  %v4736_v46 = vpack.c.bf16 %v2865_v19, %v2864_v52  ;;  %v4708_v13 = vpack.c.bf16 %v2767_v6, %v2766_v10  ;;  %v2957_v63 = vld [vmem:[#allocation14 + $0x108] sm:$0xff]  ;;  %v3496_v29 = vld [vmem:[%s5977_s8] ss:$0 sm:$0xff] }
 0x4e6   :  { %v4752_v1 = vpack.c.bf16 %v2957_v63, %v2956_v34  ;;  %v2958_v45 = vld [vmem:[#allocation14 + $0x110] sm:$0xff]  ;;  %v2967_v63 = vld [vmem:[#allocation14 + $0x158] sm:$0xff] }
 0x4e7   :  { %4651 = vmatpush3.bf16.msra.mxu0 %v4650_v8  ;;  %v4712_v8 = vpack.c.bf16 %v2769_v31, %v2768_v28  ;;  %v2966_v34 = vld [vmem:[#allocation14 + $0x150] sm:$0xff] }
 0x4e8   :  { %4683 = vmatpush3.bf16.msra.mxu1 %v4682_v42  ;;  %4653 = vmatprep.subr.bf16.mxu0 %v4652_v61  ;;  %v2868_v42 = vld [vmem:[#allocation14 + $0xe0] sm:$0xff]  ;;  %v2869_v61 = vld [vmem:[#allocation14 + $0xe8] sm:$0xff] }
 0x4e9   :  { %4685 = vmatprep.subr.bf16.mxu1 %v4684_v60  ;;  %v4744_v36 = vpack.c.bf16 %v2869_v61, %v2868_v42  ;;  %v2771_v60 = vld [vmem:[#allocation14 + $0x78] sm:$0xff]  ;;  %v2960_v42 = vld [vmem:[#allocation14 + $0x120] sm:$0xff]  ;;  %v2961_v61 = vld [vmem:[#allocation14 + $0x128] sm:$0xff] }
 0x4ea   :  { %v4716_v43 = vpack.c.bf16 %v2771_v60, %v2770_v54  ;;  %v2962_v54 = vld [vmem:[#allocation14 + $0x130] sm:$0xff]  ;;  %v2963_v60 = vld [vmem:[#allocation14 + $0x138] sm:$0xff] }
 0x4eb   :  { %4655 = vmatpush3.bf16.msra.mxu0 %v4654_v16  ;;  %v2871_v16 = vld [vmem:[#allocation14 + $0xf8] sm:$0xff] }
 0x4ec   :  { %4687 = vmatpush3.bf16.msra.mxu1 %v4686_v14  ;;  %4689 = vmatprep.subr.bf16.mxu0 %v4688_v35  ;;  %v4748_v14 = vpack.c.bf16 %v2871_v16, %v2870_v23  ;;  %v2964_v23 = vld [vmem:[#allocation14 + $0x140] sm:$0xff]  ;;  %v2965_v16 = vld [vmem:[#allocation14 + $0x148] sm:$0xff] }
 0x4ed   :  { %4721 = vmatprep.subr.bf16.mxu1 %v4720_v9 }
 0x4ee   :  { %2671 = vmatmul.mubr.f32.vlgmr.msra.gmra.mrb[28].mxu0 %v2298_v15  ;;  %v4724_v15 = vpack.c.bf16 %v2859_v0, %v2858_v37 }
 0x4ef   :  { %2746 = vmatmul.mubr.f32.vlgmr.msra.gmra.mrb[36].mxu1 %v2299_v24  ;;  %2675 = vmatprep.mubr.f32.mxu0 %v2438_v58  ;;  %v4696_v24 = vpack.c.bf16 %v2761_v49, %v2760_v57  ;;  %v2860_v58 = vld [vmem:[#allocation14 + $0xa0] sm:$0xff] }
 0x4f0   :  { %2750 = vmatprep.mubr.f32.mxu1 %v2439_v53  ;;  %4691 = vmatpush3.bf16.msra.mxu0 %v4688_v35  ;;  %v2861_v53 = vld [vmem:[#allocation14 + $0xa8] sm:$0xff] }
 0x4f1   :  { %4723 = vmatpush3.bf16.msra.mxu1 %v4720_v9  ;;  %4693 = vmatprep.subr.bf16.mxu0 %v4692_v3 }
 0x4f2   :  { %2676 = vmatmul.mubr.f32.gmra.mrb[30].mxu0 %v2434_v18  ;;  %4725 = vmatprep.subr.bf16.mxu1 %v4724_v15  ;;  %v4728_v18 = vpack.c.bf16 %v2861_v53, %v2860_v58 }
 0x4f3   :  { %2751 = vmatmul.mubr.f32.gmra.mrb[38].mxu1 %v2435_v33  ;;  %v2762_v33 = vld [vmem:[#allocation14 + $0x30] sm:$0xff] }
 0x4f4   :  { %4695 = vmatpush3.bf16.msra.mxu0 %v4692_v3  ;;  %v4700_v7 = vpack.c.bf16 %v2763_v48, %v2762_v33 }
 0x4f5   :  { %4727 = vmatpush3.bf16.msra.mxu1 %v4724_v15  ;;  %4697 = vmatprep.subr.bf16.mxu0 %v4696_v24 }
 0x4f6   :  { %4729 = vmatprep.subr.bf16.mxu1 %v4728_v18 }
 0x4f8   :  { %4699 = vmatpush3.bf16.msra.mxu0 %v4696_v24 }
 0x4f9   :  { %4731 = vmatpush3.bf16.msra.mxu1 %v4728_v18  ;;  %4701 = vmatprep.subr.bf16.mxu0 %v4700_v7 }
 0x4fa   :  { %4733 = vmatprep.subr.bf16.mxu1 %v4732_v50 }
 0x4fc   :  { %4703 = vmatpush3.bf16.msra.mxu0 %v4700_v7 }
 0x4fd   :  { %4735 = vmatpush3.bf16.msra.mxu1 %v4732_v50  ;;  %4705 = vmatprep.subr.bf16.mxu0 %v4704_v5 }
 0x4fe   :  { %4737 = vmatprep.subr.bf16.mxu1 %v4736_v46 }
 0x500   :  { %4707 = vmatpush3.bf16.msra.mxu0 %v4704_v5 }
 0x501   :  { %4739 = vmatpush3.bf16.msra.mxu1 %v4736_v46  ;;  %4709 = vmatprep.subr.bf16.mxu0 %v4708_v13 }
 0x502   :  { %4741 = vmatprep.subr.bf16.mxu1 %v4740_v17 }
 0x504   :  { %4711 = vmatpush3.bf16.msra.mxu0 %v4708_v13 }
 0x505   :  { %4743 = vmatpush3.bf16.msra.mxu1 %v4740_v17  ;;  %4713 = vmatprep.subr.bf16.mxu0 %v4712_v8  ;;  %v2959_v17 = vld [vmem:[#allocation14 + $0x118] sm:$0xff] }
 0x506   :  { %4745 = vmatprep.subr.bf16.mxu1 %v4744_v36 }
 0x508   :  { %4715 = vmatpush3.bf16.msra.mxu0 %v4712_v8  ;;  %v4756_v8 = vpack.c.bf16 %v2959_v17, %v2958_v45  ;;  %v3200_v45 = vld [vmem:[#allocation14 + $0x200] sm:$0xff]  ;;  %v3201_v17 = vld [vmem:[#allocation14 + $0x208] sm:$0xff] }
 0x509   :  { %4747 = vmatpush3.bf16.msra.mxu1 %v4744_v36  ;;  %4717 = vmatprep.subr.bf16.mxu0 %v4716_v43  ;;  %v4760_v36 = vpack.c.bf16 %v2961_v61, %v2960_v42  ;;  %v3203_v42 = vld [vmem:[#allocation14 + $0x218] sm:$0xff] }
 0x50a   :  { %4749 = vmatprep.subr.bf16.mxu1 %v4748_v14 }
 0x50c   :  { %4719 = vmatpush3.bf16.msra.mxu0 %v4716_v43  ;;  %v4764_v43 = vpack.c.bf16 %v2963_v60, %v2962_v54  ;;  %v3205_v54 = vld [vmem:[#allocation14 + $0x228] sm:$0xff] }
 0x50d   :  { %4751 = vmatpush3.bf16.msra.mxu1 %v4748_v14  ;;  %4753 = vmatprep.subr.bf16.mxu0 %v4752_v1  ;;  %v4768_v14 = vpack.c.bf16 %v2965_v16, %v2964_v23  ;;  %v3207_v23 = vld [vmem:[#allocation14 + $0x238] sm:$0xff] }
 0x5a1   :  { %v3639_v35 = vpop.f32.mrb[24].mxu0  ;;  %v3677_v20 = vpop.f32.mrb[32].mxu1 }
 0x5a2   :  { %v3640_v26 = vpop.f32.mrb[25].mxu0  ;;  %v3678_v9 = vpop.f32.mrb[33].mxu1 }
 0x5a3   :  { %v3641_v3 = vadd.f32 %v3640_v26, %v3639_v35  ;;  %v3679_v37 = vadd.f32 %v3678_v9, %v3677_v20  ;;  %v4772_v35 = vpack.c.bf16 %v2967_v63, %v2966_v34  ;;  %v2969_v20 = vld [vmem:[#allocation14 + $0x168] sm:$0xff]  ;;  %v2970_v26 = vld [vmem:[#allocation14 + $0x170] sm:$0xff]  ;;  %v2971_v9 = vld [vmem:[#allocation14 + $0x178] sm:$0xff] }
 0x5a4   :  { %v3209_v34 = vld [vmem:[#allocation14 + $0x248] sm:$0xff] }
 0x5a5   :  { %v2523_v0 = vadd.f32 %v3641_v3, %v3496_v29  ;;  %v4780_v3 = vpack.c.bf16 %v2971_v9, %v2970_v26  ;;  %v3213_v26 = vld [vmem:[#allocation14 + $0x268] sm:$0xff] }
 0x5a7   :  { %v2598_v15 = vadd.f32 %v3679_v37, %v2523_v0  ;;  %v3098_v37 = vld [vmem:[#allocation14 + $0x180] sm:$0xff]  ;;  %v3099_v0 = vld [vmem:[#allocation14 + $0x188] sm:$0xff] }
 0x5b1   :  { %v3642_v57 = vpop.f32.mrb[26].mxu0 }
 0x5b2   :  { %v3680_v49 = vpop.f32.mrb[34].mxu1  ;;  %v3643_v24 = vpop.f32.mrb[27].mxu0 }
 0x5b3   :  { %v3644_v58 = vadd.f32 %v3643_v24, %v3642_v57  ;;  %v3681_v53 = vpop.f32.mrb[35].mxu1  ;;  %v3100_v57 = vld [vmem:[#allocation14 + $0x190] sm:$0xff] }
 0x5b4   :  { %v3682_v18 = vadd.f32 %v3681_v53, %v3680_v49  ;;  %v3101_v49 = vld [vmem:[#allocation14 + $0x198] sm:$0xff]  ;;  %v3103_v53 = vld [vmem:[#allocation14 + $0x1a8] sm:$0xff] }
 0x5b5   :  { %v2528_v33 = vadd.f32 %v3644_v58, %v3496_v29  ;;  %v4788_v24 = vpack.c.bf16 %v3101_v49, %v3100_v57  ;;  %v3102_v58 = vld [vmem:[#allocation14 + $0x1a0] sm:$0xff]  ;;  %v3502_v57 = vld [vmem:[%s5977_s8 + $0x3] ss:$0 sm:$0xff] }
 0x5b7   :  { %v2603_v48 = vadd.f32 %v3682_v18, %v2528_v33  ;;  %v4792_v18 = vpack.c.bf16 %v3103_v53, %v3102_v58  ;;  %v3104_v33 = vld [vmem:[#allocation14 + $0x1b0] sm:$0xff] }
 0x5c1   :  { %v3715_v7 = vpop.f32.mrb[28].mxu0 }
 0x5c2   :  { %v3753_v4 = vpop.f32.mrb[36].mxu1  ;;  %v3716_v21 = vpop.f32.mrb[29].mxu0 }
 0x5c3   :  { %v3717_v11 = vadd.f32 %v3716_v21, %v3715_v7  ;;  %v3754_v50 = vpop.f32.mrb[37].mxu1  ;;  %v3107_v21 = vld [vmem:[#allocation14 + $0x1c8] sm:$0xff] }
 0x5c4   :  { %v3755_v40 = vadd.f32 %v3754_v50, %v3753_v4  ;;  %v3106_v4 = vld [vmem:[#allocation14 + $0x1c0] sm:$0xff]  ;;  %v3108_v50 = vld [vmem:[#allocation14 + $0x1d0] sm:$0xff] }
 0x5c5   :  { %v2673_v52 = vadd.f32 %v3717_v11, %v2598_v15  ;;  %v3718_v19 = vpop.f32.mrb[30].mxu0  ;;  %v4784_v15 = vpack.c.bf16 %v3099_v0, %v3098_v37  ;;  %v4800_v11 = vpack.c.bf16 %v3107_v21, %v3106_v4 }
 0x5c6   :  { %v3756_v5 = vpop.f32.mrb[38].mxu1  ;;  %v3719_v46 = vpop.f32.mrb[31].mxu0 }
 0x5c7   :  { %v5907_v10 = vadd.f32 %v3755_v40, %v2673_v52  ;;  %v3720_v6 = vadd.f32 %v3719_v46, %v3718_v19  ;;  %v3757_v13 = vpop.f32.mrb[39].mxu1  ;;  %4785 = vmatprep.subr.bf16.mxu1 %v4784_v15  ;;  %v3109_v40 = vld [vmem:[#allocation14 + $0x1d8] sm:$0xff]  ;;  %v3110_v52 = vld [vmem:[#allocation14 + $0x1e0] sm:$0xff] }
 0x5c8   :  { %v3758_v39 = vadd.f32 %v3757_v13, %v3756_v5  ;;  %v4804_v19 = vpack.c.bf16 %v3109_v40, %v3108_v50  ;;  %v3111_v5 = vld [vmem:[#allocation14 + $0x1e8] sm:$0xff]  ;;  %v3113_v13 = vld [vmem:[#allocation14 + $0x1f8] sm:$0xff] }
 0x5c9   :  { %v2678_v28 = vadd.f32 %v3720_v6, %v2603_v48  ;;  %4091 = vmatprep.mubr.f32.mxu0 %v5907_v10  ;;  %4126 = vmatprep.mubr.f32.mxu1 %v5907_v10  ;;  %v3105_v48 = vld [vmem:[#allocation14 + $0x1b8] sm:$0xff]  ;;  %v4808_v46 = vpack.c.bf16 %v3111_v5, %v3110_v52  ;;  %v3112_v6 = vld [vmem:[#allocation14 + $0x1f0] sm:$0xff] }
 0x5ca   :  { %v4796_v7 = vpack.c.bf16 %v3105_v48, %v3104_v33 }
 0x5cb   :  { %v5911_v31 = vadd.f32 %v3758_v39, %v2678_v28  ;;  %v4812_v39 = vpack.c.bf16 %v3113_v13, %v3112_v6  ;;  %v3202_v28 = vld [vmem:[#allocation14 + $0x210] sm:$0xff] }
 0x5cc   :  { %v4820_v61 = vpack.c.bf16 %v3203_v42, %v3202_v28  ;;  %v3498_v13 = vld [vmem:[%s5977_s8 + $0x1] ss:$0 sm:$0xff] }
 0x5cd   :  { %4092 = vmatmul.mubr.f32.vlgmr.msra.gmra.mrb[32].mxu0 %v5911_v31  ;;  %4127 = vmatmul.mubr.f32.vlgmr.msra.gmra.mrb[40].mxu1 %v5911_v31 }
 0x5ce   :  { %4755 = vmatpush3.bf16.msra.mxu0 %v4752_v1  ;;  %4161 = vmatprep.mubr.f32.mxu0 %v5907_v10  ;;  %v2968_v1 = vld [vmem:[#allocation14 + $0x160] sm:$0xff] }
 0x5cf   :  { %4757 = vmatprep.subr.bf16.mxu0 %v4756_v8  ;;  %v4776_v29 = vpack.c.bf16 %v2969_v20, %v2968_v1  ;;  %4787 = vmatpush3.bf16.msra.mxu1 %v4784_v15  ;;  %v3211_v1 = vld [vmem:[#allocation14 + $0x258] sm:$0xff] }
 0x5d0   :  { %4789 = vmatprep.subr.bf16.mxu1 %v4788_v24 }
 0x5d2   :  { %4759 = vmatpush3.bf16.msra.mxu0 %v4756_v8  ;;  %v4816_v8 = vpack.c.bf16 %v3201_v17, %v3200_v45 }
 0x5d3   :  { %4761 = vmatprep.subr.bf16.mxu0 %v4760_v36  ;;  %4791 = vmatpush3.bf16.msra.mxu1 %v4788_v24  ;;  %v3500_v24 = vld [vmem:[%s5977_s8 + $0x2] ss:$0 sm:$0xff] }
 0x5d4   :  { %4793 = vmatprep.subr.bf16.mxu1 %v4792_v18 }
 0x5d6   :  { %4763 = vmatpush3.bf16.msra.mxu0 %v4760_v36  ;;  %v3204_v36 = vld [vmem:[#allocation14 + $0x220] sm:$0xff] }
 0x5d7   :  { %4765 = vmatprep.subr.bf16.mxu0 %v4764_v43  ;;  %4795 = vmatpush3.bf16.msra.mxu1 %v4792_v18  ;;  %v4824_v60 = vpack.c.bf16 %v3205_v54, %v3204_v36 }
 0x5d8   :  { %4797 = vmatprep.subr.bf16.mxu1 %v4796_v7 }
 0x5da   :  { %4767 = vmatpush3.bf16.msra.mxu0 %v4764_v43  ;;  %v3206_v43 = vld [vmem:[#allocation14 + $0x230] sm:$0xff] }
 0x5db   :  { %4769 = vmatprep.subr.bf16.mxu0 %v4768_v14  ;;  %4799 = vmatpush3.bf16.msra.mxu1 %v4796_v7  ;;  %v4828_v16 = vpack.c.bf16 %v3207_v23, %v3206_v43 }
 0x5dc   :  { %4801 = vmatprep.subr.bf16.mxu1 %v4800_v11 }
 0x5de   :  { %4771 = vmatpush3.bf16.msra.mxu0 %v4768_v14  ;;  %v3208_v14 = vld [vmem:[#allocation14 + $0x240] sm:$0xff] }
 0x5df   :  { %4773 = vmatprep.subr.bf16.mxu0 %v4772_v35  ;;  %4803 = vmatpush3.bf16.msra.mxu1 %v4800_v11  ;;  %v4832_v63 = vpack.c.bf16 %v3209_v34, %v3208_v14 }
 0x5e0   :  { %4805 = vmatprep.subr.bf16.mxu1 %v4804_v19 }
 0x5e2   :  { %4775 = vmatpush3.bf16.msra.mxu0 %v4772_v35  ;;  %v3210_v35 = vld [vmem:[#allocation14 + $0x250] sm:$0xff] }
 0x5e3   :  { %4777 = vmatprep.subr.bf16.mxu0 %v4776_v29  ;;  %4807 = vmatpush3.bf16.msra.mxu1 %v4804_v19  ;;  %v4836_v20 = vpack.c.bf16 %v3211_v1, %v3210_v35 }
 0x5e4   :  { %4809 = vmatprep.subr.bf16.mxu1 %v4808_v46 }
 0x5e6   :  { %4779 = vmatpush3.bf16.msra.mxu0 %v4776_v29  ;;  %v3212_v29 = vld [vmem:[#allocation14 + $0x260] sm:$0xff] }
 0x5e7   :  { %4781 = vmatprep.subr.bf16.mxu0 %v4780_v3  ;;  %4811 = vmatpush3.bf16.msra.mxu1 %v4808_v46  ;;  %v4840_v9 = vpack.c.bf16 %v3213_v26, %v3212_v29 }
 0x5e8   :  { %4813 = vmatprep.subr.bf16.mxu1 %v4812_v39 }
 0x5ea   :  { %4783 = vmatpush3.bf16.msra.mxu0 %v4780_v3 }
 0x5eb   :  { %4815 = vmatpush3.bf16.msra.mxu1 %v4812_v39  ;;  %4817 = vmatprep.subr.bf16.mxu0 %v4816_v8 }
 0x5ed   :  { %4162 = vmatmul.mubr.f32.vlgmr.msra.gmra.mrb[34].mxu0 %v5911_v31 }
 0x5ee   :  { %4819 = vmatpush3.bf16.msra.mxu0 %v4816_v8 }
 0x5ef   :  { %4821 = vmatprep.subr.bf16.mxu0 %v4820_v61 }
 0x5f2   :  { %4823 = vmatpush3.bf16.msra.mxu0 %v4820_v61 }
 0x5f3   :  { %4825 = vmatprep.subr.bf16.mxu0 %v4824_v60 }
 0x5f6   :  { %4827 = vmatpush3.bf16.msra.mxu0 %v4824_v60 }
 0x5f7   :  { %4829 = vmatprep.subr.bf16.mxu0 %v4828_v16 }
 0x5fa   :  { %4831 = vmatpush3.bf16.msra.mxu0 %v4828_v16 }
 0x5fb   :  { %4833 = vmatprep.subr.bf16.mxu0 %v4832_v63 }
 0x5fe   :  { %4835 = vmatpush3.bf16.msra.mxu0 %v4832_v63 }
 0x5ff   :  { %4837 = vmatprep.subr.bf16.mxu0 %v4836_v20 }
 0x602   :  { %4839 = vmatpush3.bf16.msra.mxu0 %v4836_v20 }
 0x603   :  { %4841 = vmatprep.subr.bf16.mxu0 %v4840_v9 }
 0x606   :  { %4843 = vmatpush3.bf16.msra.mxu0 %v4840_v9 }
 0x6a0   :  { %v4093_v3 = vpop.f32.mrb[32].mxu0  ;;  %v4128_v37 = vpop.f32.mrb[40].mxu1 }
 0x6a1   :  { %v2846_v0 = vpop.f32.mrb[33].mxu0  ;;  %v2946_v15 = vpop.f32.mrb[41].mxu1  ;;  %v2952_v48 = vadd.f32 %v4128_v37, %v3500_v24  ;;  %v2852_v28 = vadd.f32 %v4093_v3, %v3498_v13 }
 0x6a2   :  { %v2947_v4 = vadd.f32 %v3500_v24, %v2946_v15  ;;  %v2847_v42 = vadd.f32 %v3498_v13, %v2846_v0  ;;  %v3214_v15 = vld [vmem:[#allocation14 + $0x270] sm:$0xff]  ;;  %v5253_v24 = vmov 0.0|0.0  }
 0x6a3   :  { %v3504_v21 = vmul.f32 -1.442695, %v2952_v48  ;;  %4848 = vmatprep.subr.bf16.mxu1 %v5253_v24 }
 0x6a4   :  { %v3503_v11 = vmul.f32 -1.442695, %v2947_v4 }
 0x6c0   :  { %v4163_v49 = vpop.f32.mrb[34].mxu0 }
 0x6c1   :  { %v3052_v58 = vadd.f32 %v4163_v49, %v3502_v57  ;;  %v3046_v53 = vpop.f32.mrb[35].mxu0 }
 0x6c2   :  { %v3047_v18 = vadd.f32 %v3502_v57, %v3046_v53  ;;  %v3215_v57 = vld [vmem:[#allocation14 + $0x278] sm:$0xff] }
 0x6c3   :  { %v3506_v33 = vmul.f32 -1.442695, %v3052_v58  ;;  %v4844_v49 = vpack.c.bf16 %v3215_v57, %v3214_v15 }
 0x6c4   :  { %v3505_v7 = vmul.f32 -1.442695, %v3047_v18 }
 0x6c5   :  { %4995 = vpow2.f32 %v3506_v33  ;;  %4845 = vmatprep.subr.bf16.mxu0 %v4844_v49 }
 0x6c6   :  { %4997 = vpow2.f32 %v3505_v7  ;;  %4847 = vmatpush3.bf16.msra.mxu0 %v4844_v49  ;;  %v5027_v7 = vld [vmem:[#allocation8 + $0x8] sm:$0xff] }
 0x6c7   :  { %4999 = vpow2.f32 %v3504_v21  ;;  %4872 = vmatprep.subr.bf16.mxu0 %v5253_v24  ;;  %v5028_v21 = vld [vmem:[#allocation8] sm:$0xff] }
 0x6c8   :  { %5001 = vpow2.f32 %v3503_v11 }
 0x6cf   :  { %v4996_v50 = vpop.eup %4995 }
 0x6d0   :  { %v4998_v40 = vpop.eup %4997  ;;  %v3074_v52 = vadd.f32 1.0, %v4996_v50 }
 0x6d1   :  { %v3073_v19 = vadd.f32 1.0, %v4998_v40  ;;  %v5000_v5 = vpop.eup %4999 }
 0x6d2   :  { %5003 = vrcp.f32 %v3074_v52  ;;  %v5002_v46 = vpop.eup %5001  ;;  %v3062_v6 = vadd.f32 1.0, %v5000_v5 }
 0x6d3   :  { %5005 = vrcp.f32 %v3073_v19  ;;  %v3061_v39 = vadd.f32 1.0, %v5002_v46 }
 0x6d4   :  { %5007 = vrcp.f32 %v3062_v6 }
 0x6d5   :  { %5009 = vrcp.f32 %v3061_v39 }
 0x6dc   :  { %v5004_v45 = vpop.eup %5003 }
 0x6dd   :  { %v5006_v17 = vpop.eup %5005  ;;  %v3082_v8 = vsub.f32 1.0, %v5004_v45  ;;  %v3080_v36 = vmul.f32 %v5004_v45, %v5911_v31 }
 0x6de   :  { %v3081_v61 = vsub.f32 1.0, %v5006_v17  ;;  %v3079_v60 = vmul.f32 %v5006_v17, %v5907_v10  ;;  %v5008_v14 = vpop.eup %5007 }
 0x6df   :  { %v3084_v54 = vmul.f32 %v3082_v8, %v2852_v28  ;;  %v5010_v34 = vpop.eup %5009  ;;  %v3092_v63 = vsub.f32 1.0, %v5008_v14 }
 0x6e0   :  { %v3083_v43 = vmul.f32 %v3081_v61, %v2847_v42  ;;  %v3091_v35 = vsub.f32 1.0, %v5010_v34 }
 0x6e1   :  { %v3086_v23 = vadd.f32 %v3084_v54, %v3080_v36  ;;  %v3094_v26 = vmul.f32 %v3092_v63, %v5911_v31 }
 0x6e2   :  { %v3085_v16 = vadd.f32 %v3083_v43, %v3079_v60  ;;  %v3093_v3 = vmul.f32 %v3091_v35, %v5907_v10 }
 0x6e3   :  { %5011 = vtanh.f32 %v3086_v23 }
 0x6e4   :  { %5013 = vtanh.f32 %v3085_v16 }
 0x6ed   :  { %v5012_v1 = vpop.eup %5011 }
 0x6ee   :  { %v5014_v20 = vpop.eup %5013  ;;  %v3090_v29 = vmul.f32 %v5012_v1, %v5008_v14 }
 0x6ef   :  { %v3089_v9 = vmul.f32 %v5014_v20, %v5010_v34 }
 0x6f0   :  { %v3096_v37 = vadd.f32 %v3094_v26, %v3090_v29 }
 0x6f1   :  { %v3095_v0 = vadd.f32 %v3093_v3, %v3089_v9 }
 0x6f3   :  { %4196 = vmatprep.mubr.f32.mxu1 %v3095_v0 }
 0x6f4   :  { %4197 = vmatmul.mubr.f32.vlgmr.msra.gmra.mrb[42].mxu1 %v3096_v37 }
 0x6f5   :  { %4850 = vmatpush3.bf16.xpose.msra.mxu1 %v5496_v22  ;;  %v3508_v22 = vld [vmem:[%s5977_s8 + $0x4] ss:$0 sm:$0xff] }
 0x6f6   :  { %4851 = vmatprep.subr.bf16.mxu1 %v5253_v24 }
 0x6fd   :  { %4853 = vmatpush3.bf16.xpose.msra.mxu1 %v5504_v27 }
 0x6fe   :  { %4854 = vmatprep.subr.bf16.mxu1 %v5253_v24 }
 0x705   :  { %4856 = vmatpush3.bf16.xpose.msra.mxu1 %v5509_v32 }
 0x706   :  { %4857 = vmatprep.subr.bf16.mxu1 %v5253_v24 }
 0x70d   :  { %4859 = vmatpush3.bf16.xpose.msra.mxu1 %v5520_v38 }
 0x70e   :  { %4860 = vmatprep.subr.bf16.mxu1 %v5253_v24 }
 0x715   :  { %4862 = vmatpush3.bf16.xpose.msra.mxu1 %v5528_v44 }
 0x716   :  { %4863 = vmatprep.subr.bf16.mxu1 %v5253_v24 }
 0x71d   :  { %4865 = vmatpush3.bf16.xpose.msra.mxu1 %v5536_v51 }
 0x71e   :  { %4866 = vmatprep.subr.bf16.mxu1 %v5253_v24 }
 0x725   :  { %4868 = vmatpush3.bf16.xpose.msra.mxu1 %v5540_v56 }
 0x726   :  { %4869 = vmatprep.subr.bf16.mxu1 %v5253_v24 }
 0x72d   :  { %4871 = vmatpush3.bf16.xpose.msra.mxu1 %v5552_v62 }
 0x7c7   :  { %v4198_v27 = vpop.f32.mrb[42].mxu1 }
 0x7c8   :  { %v3194_v32 = vadd.f32 %v4198_v27, %v3508_v22  ;;  %v3188_v10 = vpop.f32.mrb[43].mxu1 }
 0x7c9   :  { %v3189_v38 = vadd.f32 %v3508_v22, %v3188_v10 }
 0x7ca   :  { %v3198_v58 = vmax.f32 %v3194_v32, 0.0 }
 0x7cb   :  { %v3197_v31 = vmax.f32 %v3189_v38, 0.0 }
 0x7cd   :  { %4231 = vmatprep.mubr.f32.mxu0 %v3197_v31 }
 0x7ce   :  { %4232 = vmatmul.mubr.f32.vlgmr.msra.gmra.mrb[36].mxu0 %v3198_v58 }
 0x7cf   :  { %4874 = vmatpush3.bf16.xpose.msra.mxu0 %v5500_v25  ;;  %v5981_v25 = vmov 0.0  }
 0x7d0   :  { %4875 = vmatprep.subr.bf16.mxu0 %v5253_v24  ;;  %4301 = vmatprep.mubr.msk.f32.mxu0 %vm5254_vm1, %v5981_v25 }
 0x7d1   :  { %4266 = vmatprep.mubr.msk.f32.mxu1 %vm5254_vm1, %v5981_v25 }
 0x7d7   :  { %4877 = vmatpush3.bf16.xpose.msra.mxu0 %v5506_v30  ;;  %v3510_v30 = vld [vmem:[%s5977_s8 + $0x5] ss:$0 sm:$0xff]  ;;  %s5255_s8 = smov [#allocation16]  }
 0x7d8   :  { %4878 = vmatprep.subr.bf16.mxu0 %v5253_v24  ;;  %s3472_s17 = sshll.u32 %s5255_s8, 4  ;;  %s3473_s17 = int_to_ptr.vmem [resolvable:$true] %s3472_s17 }
 0x7d9   :  { %s5205_s28 = scalar_lea.vmem %s3473_s17, 256  ;;  %p5210_p9 = scmp.lt.s32.totalorder %s3473_s17, %s3473_s17 }
 0x7da   :  { %p5206_p8 = scmp.ne.s32.totalorder %s3473_s17, %s5205_s28  ;;  %p5211_p10 = scmp.lt.s32.totalorder %s5205_s28, %s5205_s28 }
 0x7dc   :  { %p5212_p11 = por %p5211_p10, %p5210_p9 }
 0x7de   :  { %p5213_p12 = pnand %p5212_p11, %p5206_p8 }
 0x7df   :  { %4880 = vmatpush3.bf16.xpose.msra.mxu0 %v5516_v12 }
 0x7e0   :  { %4881 = vmatprep.subr.bf16.mxu0 %v5253_v24 }
 0x7e7   :  { %4883 = vmatpush3.bf16.xpose.msra.mxu0 %v5524_v41 }
 0x7e8   :  { %4884 = vmatprep.subr.bf16.mxu0 %v5253_v24 }
 0x7ef   :  { %4886 = vmatpush3.bf16.xpose.msra.mxu0 %v5532_v47 }
 0x7f0   :  { %4887 = vmatprep.subr.bf16.mxu0 %v5253_v24 }
 0x7f7   :  { %4889 = vmatpush3.bf16.xpose.msra.mxu0 %v5538_v55 }
 0x7f8   :  { %4890 = vmatprep.subr.bf16.mxu0 %v5253_v24 }
 0x7ff   :  { %4892 = vmatpush3.bf16.xpose.msra.mxu0 %v5548_v59 }
 0x800   :  { %4893 = vmatprep.subr.bf16.mxu0 %v5253_v24 }
 0x807   :  { %4895 = vmatpush3.bf16.xpose.msra.mxu0 %v5556_v2 }
 0x8a1   :  { %v4233_v12 = vpop.f32.mrb[36].mxu0 }
 0x8a2   :  { %v3296_v41 = vadd.f32 %v4233_v12, %v3510_v30  ;;  %v3290_v44 = vpop.f32.mrb[37].mxu0 }
 0x8a3   :  { %v3291_v47 = vadd.f32 %v3510_v30, %v3290_v44 }
 0x8a4   :  { %4302 = vmatmul.mubr.f32.vlgmr.msra.gmra.mrb[38].mxu0 %v3296_v41 }
 0x8a5   :  { %4267 = vmatmul.mubr.f32.vlgmr.msra.gmra.mrb[44].mxu1 %v3291_v47 }
 0x977   :  { %v3435_v51 = vpop.f32.mrb[38].mxu0 }
 0x978   :  { %v3440_v55 = vmul.f32 0.088388346, %v3435_v51  ;;  %v3365_v56 = vpop.f32.mrb[44].mxu1  ;;  %v4303_v59 = vpop.f32.mrb[39].mxu0 }
 0x979   :  { %v3439_v62 = vmul.f32 0.088388346, %v3365_v56  ;;  %v4268_v2 = vpop.f32.mrb[45].mxu1 }
 0x97a   :  { %5015 = vtanh.f32 %v3440_v55 }
 0x97b   :  { %5017 = vtanh.f32 %v3439_v62 }
 0x984   :  { %v5016_v53 = vpop.eup %5015 }
 0x985   :  { %v5018_v18 = vpop.eup %5017  ;;  %v3444_v33 = vmul.f32 10.0, %v5016_v53 }
 0x986   :  { %v3443_v48 = vmul.f32 10.0, %v5018_v18 }
 0x987   :  { %v3446_v4 = vadd.f32 %v5027_v7, %v3444_v33 }
 0x988   :  { %v3445_v11 = vadd.f32 %v5028_v21, %v3443_v48 }
 0x989   :  { %3449 = vmax.xlane.f32.xlu1 %v3446_v4 }
 0x98a   :  { %3447 = vmax.xlane.f32.xlu0 %v3445_v11 }
 0xa16   :  { %v3450_v50 = vpop.xlane.xlu1 %3449 }
 0xa17   :  { %v3452_v40 = vsub.f32 %v3446_v4, %v3450_v50  ;;  %v3448_v52 = vpop.xlane.xlu0 %3447 }
 0xa18   :  { %v3451_v19 = vsub.f32 %v3445_v11, %v3448_v52 }
 0xa19   :  { %v3455_v5 = vmul.f32 1.442695, %v3452_v40 }
 0xa1a   :  { %v3453_v46 = vmul.f32 1.442695, %v3451_v19 }
 0xa1b   :  { %5019 = vpow2.f32 %v3455_v5 }
 0xa1c   :  { %5021 = vpow2.f32 %v3453_v46 }
 0xa25   :  { %v5020_v6 = vpop.eup %5019 }
 0xa26   :  { %v5022_v13 = vpop.eup %5021  ;;  %3459 = vadd.xlane.f32.xlu1 %v5020_v6 }
 0xa27   :  { %3457 = vadd.xlane.f32.xlu0 %v5022_v13 }
 0xab3   :  { %v3460_v39 = vpop.xlane.xlu1 %3459 }
 0xab4   :  { %5023 = vrcp.f32 %v3460_v39  ;;  %v3458_v45 = vpop.xlane.xlu0 %3457 }
 0xab5   :  { %5025 = vrcp.f32 %v3458_v45 }
 0xabe   :  { %v5024_v17 = vpop.eup %5023 }
 0xabf   :  { %v5026_v28 = vpop.eup %5025  ;;  %v3464_v8 = vmul.f32 %v5024_v17, %v5020_v6 }
 0xac0   :  { %v3463_v42 = vmul.f32 %v5026_v28, %v5022_v13 }
 0xac1   :  { %3466 = vst [vmem:[#allocation16 + $0x8] sm:$0xff] %v3464_v8 }
 0xac2   :  { %3465 = vst [vmem:[#allocation16] sm:$0xff] %v3463_v42 }
 0xac3   :  { %5216 = shalt.err (!%p5213_p12)
}
 0xac4   :  { %s5217_s29 = scalar_lea.hbm %s5978_s9, 256 }
 0xac5   :  { %p5218_p13 = scmp.ne.s32.totalorder %s5978_s9, %s5217_s29  ;;  %p5221_p0 = scmp.lt.u32.totalorder %s5217_s29, %s5978_s9 }
 0xac7   :  { %p5223_p1 = pnand %p5221_p0, %p5218_p13 }
 0xac9   :  { %5226 = shalt.err (!%p5223_p1)
}
 0xaca   :  { %3478 = dma.vmem_to_hbm [thread:$0]  %s3473_s17, 256, %s5978_s9, [#allocation4], %s5241_s21, %s5241_s21, %s5242_s22  }
 0xacb   :  { %5237 = dma.done.wait [#allocation4], 256  }
 0xacc   :  { %5238 = vsyncadd [#allocation4], 4294967040 }
 0xacd   :  { %3482 = vsyncpa [#allocation3], 1 }
 0xace   :  { %3483 = vsyncpa [#allocation6], 1 }
 0xacf   :  { %3484 = vsyncpa [#allocation9], 1 }
 0xad0   :  { %3485 = vsyncpa [#allocation12], 1 }
 0xad1   :  { %3486 = vsyncpa [#allocation15], 1 }
 0xad2   :  { %3487 = vsyncpa [#allocation4], 1 }

</bundles_post_ra>
